<compile_context>
chip_gen: v5e
topology: v5e:2x2
jax: 0.10.0
libtpu: 0.0.40
codegen_flags: <defaults>
</compile_context>

<pallas_src>
import jax
import jax.numpy as jnp
from jax import lax
from jax.experimental import pallas as pl
from jax.experimental.pallas import tpu as pltpu

HALO = 2     # extra x rows needed per side of a row tile (two stacked 3x3 convs)
LPAD = 16    # left zero-pad columns in the x staging scratch (16 => aligned bf16 stores)


def _round_up(x, m):
    return ((x + m - 1) // m) * m


def _col_geometry(W):
    """Column counts padded so bf16 (rows, cols, C)->(rows*cols, C) reshapes are free."""
    Wo = _round_up(max(W, 1), 16)   # output cols computed per tile (extra ones discarded)
    Wh = Wo + 16                    # h cols computed per tile   (>= W + 2)
    Wx = Wh + 16                    # staged x cols per tile     (>= W + 4 + shift room)
    return Wo, Wh, Wx


# --------------------------------------------------------------------------- #
# Kernel
# --------------------------------------------------------------------------- #
def _make_bottleneck_kernel(W, C1, Ch, C2, TH, with_residual):
    Wo, Wh, Wx = _col_geometry(W)
    rows1 = TH + 2          # h rows computed per tile
    rowsx = TH + 4          # x rows staged per tile
    bf16 = jnp.bfloat16

    def kernel(x_top_ref, x_mid_ref, x_bot_ref,
               w1_ref, s1_ref, b1_ref, w2_ref, s2_ref, b2_ref,
               out_ref, xrows_ref, hpad_ref):
        i = pl.program_id(1)
        last = pl.num_programs(1) - 1

        # ---- stage the x row tile (+ 2-row halos) into bf16 VMEM -------------
        # In-kernel W zero-padding: zero the pad columns, then store the data.
        xrows_ref[:, 0:LPAD, :] = jnp.zeros((rowsx, LPAD, C1), bf16)
        xrows_ref[:, LPAD + W:, :] = jnp.zeros((rowsx, Wx - (LPAD + W), C1), bf16)
        xrows_ref[HALO:HALO + TH, LPAD:LPAD + W, :] = x_mid_ref[0].astype(bf16)

        @pl.when(i == 0)            # top halo rows are conv padding on the first tile
        def _():
            xrows_ref[0:HALO, LPAD:LPAD + W, :] = jnp.zeros((HALO, W, C1), bf16)

        @pl.when(i > 0)
        def _():
            xrows_ref[0:HALO, LPAD:LPAD + W, :] = x_top_ref[0].astype(bf16)

        @pl.when(i == last)         # bottom halo rows are conv padding on the last tile
        def _():
            xrows_ref[HALO + TH:, LPAD:LPAD + W, :] = jnp.zeros((HALO, W, C1), bf16)

        @pl.when(i < last)
        def _():
            xrows_ref[HALO + TH:, LPAD:LPAD + W, :] = x_bot_ref[0].astype(bf16)

        # ---- conv1 (3x3) + BN (f32 scale/bias) + SiLU ------------------------
        # Local f32 accumulation across the 9 taps; one column shift per dx,
        # shared by the three dy taps.  All flatten reshapes are layout no-ops.
        x_all = xrows_ref[...]                                  # (rowsx, Wx, C1) bf16
        acc1 = None
        for dx in range(3):
            s = LPAD - 2 + dx
            xs = x_all[:, s:s + Wh, :]
            for dy in range(3):
                patch = xs[dy:dy + rows1].reshape(rows1 * Wh, C1)
                contrib = jnp.dot(patch, w1_ref[3 * dy + dx],
                                  preferred_element_type=jnp.float32)
                acc1 = contrib if acc1 is None else acc1 + contrib

        h = acc1 * s1_ref[...] + b1_ref[...]                    # BN in f32
        h = h * jax.nn.sigmoid(h)                               # SiLU in f32
        h = h.reshape(rows1, Wh, Ch)

        # Columns of h that are conv2 zero-padding (image cols -1 and >= W)
        # must be exactly zero (single cheap column mask, lanes untouched).
        col = lax.broadcasted_iota(jnp.int32, (rows1, Wh, 1), 1)
        keep = jnp.logical_and(col >= 1, col <= W)
        hpad_ref[...] = jnp.where(keep, h, 0.0).astype(bf16)

        # Rows of h outside the image (conv2 padding) only exist on boundary tiles.
        @pl.when(i == 0)
        def _():
            hpad_ref[0:1, :, :] = jnp.zeros((1, Wh, Ch), bf16)           # image row -1

        @pl.when(i == last)
        def _():
            hpad_ref[TH + 1:TH + 2, :, :] = jnp.zeros((1, Wh, Ch), bf16)  # image row H

        # ---- conv2 (3x3) + BN + SiLU + residual ------------------------------
        h_all = hpad_ref[...]                                   # (rows1, Wh, Ch) bf16
        acc2 = None
        for dx in range(3):
            hs = h_all[:, dx:dx + Wo, :]
            for dy in range(3):
                patch = hs[dy:dy + TH].reshape(TH * Wo, Ch)
                contrib = jnp.dot(patch, w2_ref[3 * dy + dx],
                                  preferred_element_type=jnp.float32)
                acc2 = contrib if acc2 is None else acc2 + contrib

        y = acc2 * s2_ref[...] + b2_ref[...]
        y = y * jax.nn.sigmoid(y)
        y = y.reshape(TH, Wo, C2)[:, :W, :]
        if with_residual:
            y = y + x_mid_ref[0].astype(jnp.float32)            # exact f32 residual
        out_ref[0] = y.astype(out_ref.dtype)

    return kernel


# --------------------------------------------------------------------------- #
# Parameter prep (eval-mode BatchNorm)
# --------------------------------------------------------------------------- #
def _bn_scale_bias(gamma, beta, mean, var, eps=1e-5):
    scale = gamma / jnp.sqrt(var + eps)
    return scale, beta - mean * scale


def _conv_bn_params(w_kkio, gamma, beta, mean, var, eps=1e-5):
    """(K,K,Cin,Cout) conv weight + BN -> (bf16 tap-major weight, f32 scale, f32 bias).

    BN scale/bias stay in f32 and are applied after the f32 matmul accumulator
    (more accurate than folding the scale into bf16 weights)."""
    scale, bias = _bn_scale_bias(gamma, beta, mean, var, eps)
    K, _, Cin, Cout = w_kkio.shape
    w = w_kkio.reshape(K * K, Cin, Cout).astype(jnp.bfloat16)
    return (w,
            scale.reshape(1, Cout).astype(jnp.float32),
            bias.reshape(1, Cout).astype(jnp.float32))


# --------------------------------------------------------------------------- #
# Footprint-aware tiling
# --------------------------------------------------------------------------- #
def _vmem_budget_bytes():
    """Per-generation VMEM budget (headroom under physical VMEM per TensorCore).
    v7x has only 64 MiB -> stay around 44 MiB; v5e/v6e have 128 MiB -> ~96 MiB."""
    try:
        kind = jax.devices()[0].device_kind.lower()
    except Exception:
        kind = ""
    if "v5" in kind or "v6" in kind:
        return 96 * 1024 * 1024
    return 44 * 1024 * 1024


def _tile_vmem_bytes(TH, W, C1, Ch, C2, in_bytes, out_bytes):
    """Estimated per-tile VMEM bill: double-buffered I/O blocks + bf16 staging
    scratches + a conservative allowance for in-kernel temporaries."""
    Wo, Wh, Wx = _col_geometry(W)
    rows1, rowsx = TH + 2, TH + 4
    io = 2 * ((TH * W * C1 + 2 * (HALO * W * C1)) * in_bytes      # x_mid + 2 halos
              + TH * W * C2 * out_bytes)                           # out
    consts = 2 * (9 * C1 * Ch * 2 + 9 * Ch * C2 * 2 + 2 * (Ch + C2) * 4)
    scratch = rowsx * Wx * C1 * 2 + rows1 * Wh * Ch * 2            # bf16 staging
    temps = (2 * rowsx * Wx * C1 * 2          # staged x value + one dx-shifted copy
             + rows1 * Wh * C1 * 2            # flattened bf16 conv1 patch
             + rows1 * Wh * Ch * 4            # f32 conv1 accumulator
             + 2 * rows1 * Wh * Ch * 2        # h value + one dx-shifted copy
             + TH * Wo * Ch * 2               # conv2 bf16 patch
             + TH * Wo * C2 * 4)              # f32 conv2 accumulator
    return io + consts + scratch + temps


def _pick_row_tile(H, W, C1, Ch, C2, in_bytes, out_bytes, budget):
    """Largest even row tile dividing H whose VMEM footprint fits the budget."""
    best = None
    for th in range(2, min(H, 256) + 1, 2):
        if H % th == 0 and _tile_vmem_bytes(th, W, C1, Ch, C2,
                                            in_bytes, out_bytes) <= budget:
            best = th
    if best is not None:
        return best
    # Nothing fits: smallest even divisor (still correct; compiler may spill).
    # TODO(synk): add a W tile for very large W * C products.
    for th in range(2, H + 1, 2):
        if H % th == 0:
            return th
    raise NotImplementedError("H must be even")  # TODO(synk): odd-H halo blocks


# --------------------------------------------------------------------------- #
# Forward wrappers
# --------------------------------------------------------------------------- #
def bottleneck_forward_nhwc(x_nhwc, params, shortcut=True, row_tile=None,
                            out_dtype=None):
    """Fused Bottleneck forward on NHWC activations (channels on lanes).

    Keep activations NHWC across chained blocks and pass out_dtype=jnp.bfloat16
    there to halve HBM write traffic; only the model boundary should transpose."""
    N, H, W, C1 = x_nhwc.shape
    K = params["w1"].shape[0]
    Ch = params["w1"].shape[-1]
    C2 = params["w2"].shape[-1]
    assert K == 3, "kernel is specialized for 3x3 convs"
    out_dtype = x_nhwc.dtype if out_dtype is None else out_dtype

    budget = _vmem_budget_bytes()
    in_bytes = jnp.dtype(x_nhwc.dtype).itemsize
    out_bytes = jnp.dtype(out_dtype).itemsize
    TH = row_tile if row_tile is not None else _pick_row_tile(
        H, W, C1, Ch, C2, in_bytes, out_bytes, budget)
    assert H % TH == 0 and TH % 2 == 0, "row tile must be even and divide H"
    n_tiles = H // TH
    R = TH // HALO               # halo-block index stride (halo blocks are 2 rows)
    last_blk = H // HALO - 1     # last valid 2-row block index

    add = bool(shortcut) and (C1 == C2)

    w1, s1, b1 = _conv_bn_params(params["w1"], params["g1"], params["be1"],
                                 params["m1"], params["v1"])
    w2, s2, b2 = _conv_bn_params(params["w2"], params["g2"], params["be2"],
                                 params["m2"], params["v2"])

    kernel = _make_bottleneck_kernel(W, C1, Ch, C2, TH, add)
    _, Wh, Wx = _col_geometry(W)

    x_mid_spec = pl.BlockSpec((1, TH, W, C1), lambda n, i: (n, i, 0, 0))
    x_top_spec = pl.BlockSpec(
        (1, HALO, W, C1), lambda n, i: (n, jnp.maximum(i * R - 1, 0), 0, 0))
    x_bot_spec = pl.BlockSpec(
        (1, HALO, W, C1), lambda n, i: (n, jnp.minimum((i + 1) * R, last_blk), 0, 0))

    def _const_spec(shape):
        zeros = (0,) * len(shape)
        return pl.BlockSpec(shape, lambda n, i: zeros)

    grid_spec = pltpu.PrefetchScalarGridSpec(
        num_scalar_prefetch=0,
        # Both axes parallel (v7x megacore); N * n_tiles >= 2 keeps both TCs busy.
        grid=(N, n_tiles),
        in_specs=[x_top_spec, x_mid_spec, x_bot_spec,
                  _const_spec(w1.shape), _const_spec(s1.shape), _const_spec(b1.shape),
                  _const_spec(w2.shape), _const_spec(s2.shape), _const_spec(b2.shape)],
        out_specs=pl.BlockSpec((1, TH, W, C2), lambda n, i: (n, i, 0, 0)),
        scratch_shapes=[
            pltpu.VMEM((TH + 2 * HALO, Wx, C1), jnp.bfloat16),   # staged, W-padded x
            pltpu.VMEM((TH + HALO, Wh, Ch), jnp.bfloat16),       # intermediate h
        ],
    )

    footprint = _tile_vmem_bytes(TH, W, C1, Ch, C2, in_bytes, out_bytes)
    vmem_limit = int(min(max(footprint + (8 << 20), 32 << 20), budget + (16 << 20)))

    return pl.pallas_call(
        kernel,
        grid_spec=grid_spec,
        out_shape=jax.ShapeDtypeStruct((N, H, W, C2), out_dtype),
        compiler_params=pltpu.CompilerParams(
            dimension_semantics=("parallel", "parallel"),
            vmem_limit_bytes=vmem_limit,
        ),
    )(x_nhwc, x_nhwc, x_nhwc, w1, s1, b1, w2, s2, b2)


def bottleneck_forward(x_nchw, params, shortcut=True, row_tile=None):
    """PyTorch-compatible NCHW/f32 wrapper (transpose only at the module boundary)."""
    x_nhwc = jnp.transpose(x_nchw, (0, 2, 3, 1))
    y = bottleneck_forward_nhwc(x_nhwc, params, shortcut=shortcut,
                                row_tile=row_tile, out_dtype=jnp.float32)
    return jnp.transpose(y, (0, 3, 1, 2))


# --------------------------------------------------------------------------- #
# Pure-JAX reference (correctness check)
# --------------------------------------------------------------------------- #
def _ref_conv_bn_silu(x_nhwc, w_kkio, gamma, beta, mean, var):
    scale, bias = _bn_scale_bias(gamma, beta, mean, var)
    y = lax.conv_general_dilated(
        x_nhwc, w_kkio, window_strides=(1, 1), padding="SAME",
        dimension_numbers=("NHWC", "HWIO", "NHWC"))
    y = y * scale + bias
    return y * jax.nn.sigmoid(y)


def _ref_bottleneck(x_nchw, params, shortcut=True):
    c1 = x_nchw.shape[1]
    c2 = params["w2"].shape[-1]
    add = shortcut and (c1 == c2)
    x_nhwc = jnp.transpose(x_nchw, (0, 2, 3, 1))
    h = _ref_conv_bn_silu(x_nhwc, params["w1"], params["g1"], params["be1"],
                          params["m1"], params["v1"])
    y = _ref_conv_bn_silu(h, params["w2"], params["g2"], params["be2"],
                          params["m2"], params["v2"])
    if add:
        y = y + x_nhwc
    return jnp.transpose(y, (0, 3, 1, 2))


if __name__ == "__main__":
    key = jax.random.PRNGKey(0)
    N, C1, H, W = 2, 4, 16, 16
    C2 = 4
    C_ = int(C2 * 0.5)      # hidden channels (e = 0.5)
    K = 3

    keys = jax.random.split(key, 8)
    x = jax.random.normal(keys[0], (N, C1, H, W), jnp.float32)

    # Conv weights stored HWIO: (K, K, Cin, Cout)
    w1 = 0.1 * jax.random.normal(keys[1], (K, K, C1, C_), jnp.float32)
    w2 = 0.1 * jax.random.normal(keys[2], (K, K, C_, C2), jnp.float32)

    params = dict(
        w1=w1, w2=w2,
        g1=1.0 + 0.1 * jax.random.normal(keys[3], (C_,), jnp.float32),
        be1=0.1 * jax.random.normal(keys[4], (C_,), jnp.float32),
        m1=0.05 * jax.random.normal(keys[5], (C_,), jnp.float32),
        v1=jnp.ones((C_,), jnp.float32),
        g2=1.0 + 0.1 * jax.random.normal(keys[6], (C2,), jnp.float32),
        be2=0.1 * jax.random.normal(keys[7], (C2,), jnp.float32),
        m2=jnp.zeros((C2,), jnp.float32),
        v2=jnp.ones((C2,), jnp.float32),
    )

    y_ref = _ref_bottleneck(x, params, shortcut=True)

    # Multi-tile path (row_tile=8 -> 2 row tiles per image): exercises the
    # clamped halo BlockSpecs and the boundary-row zeroing.
    y = jax.block_until_ready(
        bottleneck_forward(x, params, shortcut=True, row_tile=8))
    assert y.shape == (N, C2, H, W)
    err = float(jnp.max(jnp.abs(y - y_ref)))
    # bf16 MXU operands with f32 accumulation + f32 BN/SiLU -> small error.
    assert err < 5e-2, f"multi-tile mismatch vs reference: max abs err {err}"

    # Footprint-aware auto tile selection (single tile at this size).
    y2 = jax.block_until_ready(bottleneck_forward(x, params, shortcut=True))
    err2 = float(jnp.max(jnp.abs(y2 - y_ref)))
    assert err2 < 5e-2, f"auto-tile mismatch vs reference: max abs err {err2}"

    print("KERNEL_OK")
</pallas_src>

<mosaic_0001>
module attributes {stable_mosaic.version = 11 : i64} {
  func.func @kernel(%arg0: i32, %arg1: i32, %arg2: memref<1x2x16x4xf32, #tpu.memory_space<vmem>>, %arg3: memref<1x8x16x4xf32, #tpu.memory_space<vmem>>, %arg4: memref<1x2x16x4xf32, #tpu.memory_space<vmem>>, %arg5: memref<9x4x2xbf16, #tpu.memory_space<vmem>>, %arg6: memref<1x2xf32, #tpu.memory_space<vmem>>, %arg7: memref<1x2xf32, #tpu.memory_space<vmem>>, %arg8: memref<9x2x4xbf16, #tpu.memory_space<vmem>>, %arg9: memref<1x4xf32, #tpu.memory_space<vmem>>, %arg10: memref<1x4xf32, #tpu.memory_space<vmem>>, %arg11: memref<1x8x16x4xf32, #tpu.memory_space<vmem>>, %arg12: memref<12x48x4xbf16, #tpu.memory_space<vmem>>, %arg13: memref<10x32x2xbf16, #tpu.memory_space<vmem>>) attributes {dimension_semantics = [#tpu.dimension_semantics<parallel>, #tpu.dimension_semantics<parallel>], iteration_bounds = array<i64: 2, 2>, scalar_prefetch = 0 : i64, scratch_operands = 2 : i64, tpu.core_type = #tpu.core_type<tc>, window_params = [{transform_indices = @transform_0, window_bounds = array<i64: 1, 2, 16, 4>}, {transform_indices = @transform_1, window_bounds = array<i64: 1, 8, 16, 4>}, {transform_indices = @transform_2, window_bounds = array<i64: 1, 2, 16, 4>}, {pipeline_mode = #tpu.pipeline_mode<synchronous>, transform_indices = @transform_3, window_bounds = array<i64: 9, 4, 2>}, {pipeline_mode = #tpu.pipeline_mode<synchronous>, transform_indices = @transform_4, window_bounds = array<i64: 1, 2>}, {pipeline_mode = #tpu.pipeline_mode<synchronous>, transform_indices = @transform_5, window_bounds = array<i64: 1, 2>}, {pipeline_mode = #tpu.pipeline_mode<synchronous>, transform_indices = @transform_6, window_bounds = array<i64: 9, 2, 4>}, {pipeline_mode = #tpu.pipeline_mode<synchronous>, transform_indices = @transform_7, window_bounds = array<i64: 1, 4>}, {pipeline_mode = #tpu.pipeline_mode<synchronous>, transform_indices = @transform_8, window_bounds = array<i64: 1, 4>}, {transform_indices = @transform_9, window_bounds = array<i64: 1, 8, 16, 4>}]} {
    %cst = arith.constant 0.000000e+00 : bf16
    %0 = vector.broadcast %cst : bf16 to vector<12x16x4xbf16>
    %c0 = arith.constant 0 : index
    %c0_0 = arith.constant 0 : index
    %c0_1 = arith.constant 0 : index
    %1 = vector.load %arg12[%c0, %c0_0, %c0_1] : memref<12x48x4xbf16, #tpu.memory_space<vmem>>, vector<12x16x4xbf16>
    tpu.vector_store %arg12[%c0, %c0_0, %c0_1], %0 {strides = array<i32>} : memref<12x48x4xbf16, #tpu.memory_space<vmem>>, vector<12x16x4xbf16>,
    %cst_2 = arith.constant 0.000000e+00 : bf16
    %2 = vector.broadcast %cst_2 : bf16 to vector<12x16x4xbf16>
    %c0_3 = arith.constant 0 : index
    %c32 = arith.constant 32 : index
    %c0_4 = arith.constant 0 : index
    %3 = vector.load %arg12[%c0_3, %c32, %c0_4] : memref<12x48x4xbf16, #tpu.memory_space<vmem>>, vector<12x16x4xbf16>
    tpu.vector_store %arg12[%c0_3, %c32, %c0_4], %2 {strides = array<i32>} : memref<12x48x4xbf16, #tpu.memory_space<vmem>>, vector<12x16x4xbf16>,
    %c0_5 = arith.constant 0 : index
    %c0_6 = arith.constant 0 : index
    %c0_7 = arith.constant 0 : index
    %c0_8 = arith.constant 0 : index
    %4 = vector.load %arg3[%c0_5, %c0_6, %c0_7, %c0_8] : memref<1x8x16x4xf32, #tpu.memory_space<vmem>>, vector<1x8x16x4xf32>
    %5 = vector.shape_cast %4 : vector<1x8x16x4xf32> to vector<8x16x4xf32>
    %6 = arith.truncf %5 : vector<8x16x4xf32> to vector<8x16x4xbf16>
    %c2 = arith.constant 2 : index
    %c16 = arith.constant 16 : index
    %c0_9 = arith.constant 0 : index
    %7 = vector.load %arg12[%c2, %c16, %c0_9] : memref<12x48x4xbf16, #tpu.memory_space<vmem>>, vector<8x16x4xbf16>
    tpu.vector_store %arg12[%c2, %c16, %c0_9], %6 {strides = array<i32>} : memref<12x48x4xbf16, #tpu.memory_space<vmem>>, vector<8x16x4xbf16>,
    %c0_i32 = arith.constant 0 : i32
    %8 = arith.cmpi eq, %arg1, %c0_i32 : i32
    %9 = arith.extui %8 : i1 to i32
    %c0_i32_10 = arith.constant 0 : i32
    %10 = arith.cmpi ne, %9, %c0_i32_10 : i32
    scf.if %10 {
      %cst_114 = arith.constant 0.000000e+00 : bf16
      %184 = vector.broadcast %cst_114 : bf16 to vector<2x16x4xbf16>
      %c0_115 = arith.constant 0 : index
      %c16_116 = arith.constant 16 : index
      %c0_117 = arith.constant 0 : index
      %185 = vector.load %arg12[%c0_115, %c16_116, %c0_117] : memref<12x48x4xbf16, #tpu.memory_space<vmem>>, vector<2x16x4xbf16>
      tpu.vector_store %arg12[%c0_115, %c16_116, %c0_117], %184 {strides = array<i32>} : memref<12x48x4xbf16, #tpu.memory_space<vmem>>, vector<2x16x4xbf16>,
    } else {
    }
    %c0_i32_11 = arith.constant 0 : i32
    %11 = arith.cmpi sgt, %arg1, %c0_i32_11 : i32
    %12 = arith.extui %11 : i1 to i32
    %c0_i32_12 = arith.constant 0 : i32
    %13 = arith.cmpi ne, %12, %c0_i32_12 : i32
    scf.if %13 {
      %c0_114 = arith.constant 0 : index
      %c0_115 = arith.constant 0 : index
      %c0_116 = arith.constant 0 : index
      %c0_117 = arith.constant 0 : index
      %184 = vector.load %arg2[%c0_114, %c0_115, %c0_116, %c0_117] : memref<1x2x16x4xf32, #tpu.memory_space<vmem>>, vector<1x2x16x4xf32>
      %185 = vector.shape_cast %184 : vector<1x2x16x4xf32> to vector<2x16x4xf32>
      %186 = arith.truncf %185 : vector<2x16x4xf32> to vector<2x16x4xbf16>
      %c0_118 = arith.constant 0 : index
      %c16_119 = arith.constant 16 : index
      %c0_120 = arith.constant 0 : index
      %187 = vector.load %arg12[%c0_118, %c16_119, %c0_120] : memref<12x48x4xbf16, #tpu.memory_space<vmem>>, vector<2x16x4xbf16>
      tpu.vector_store %arg12[%c0_118, %c16_119, %c0_120], %186 {strides = array<i32>} : memref<12x48x4xbf16, #tpu.memory_space<vmem>>, vector<2x16x4xbf16>,
    } else {
    }
    %c1_i32 = arith.constant 1 : i32
    %14 = arith.cmpi eq, %arg1, %c1_i32 : i32
    %15 = arith.extui %14 : i1 to i32
    %c0_i32_13 = arith.constant 0 : i32
    %16 = arith.cmpi ne, %15, %c0_i32_13 : i32
    scf.if %16 {
      %cst_114 = arith.constant 0.000000e+00 : bf16
      %184 = vector.broadcast %cst_114 : bf16 to vector<2x16x4xbf16>
      %c10 = arith.constant 10 : index
      %c16_115 = arith.constant 16 : index
      %c0_116 = arith.constant 0 : index
      %185 = vector.load %arg12[%c10, %c16_115, %c0_116] : memref<12x48x4xbf16, #tpu.memory_space<vmem>>, vector<2x16x4xbf16>
      tpu.vector_store %arg12[%c10, %c16_115, %c0_116], %184 {strides = array<i32>} : memref<12x48x4xbf16, #tpu.memory_space<vmem>>, vector<2x16x4xbf16>,
    } else {
    }
    %c1_i32_14 = arith.constant 1 : i32
    %17 = arith.cmpi slt, %arg1, %c1_i32_14 : i32
    %18 = arith.extui %17 : i1 to i32
    %c0_i32_15 = arith.constant 0 : i32
    %19 = arith.cmpi ne, %18, %c0_i32_15 : i32
    scf.if %19 {
      %c0_114 = arith.constant 0 : index
      %c0_115 = arith.constant 0 : index
      %c0_116 = arith.constant 0 : index
      %c0_117 = arith.constant 0 : index
      %184 = vector.load %arg4[%c0_114, %c0_115, %c0_116, %c0_117] : memref<1x2x16x4xf32, #tpu.memory_space<vmem>>, vector<1x2x16x4xf32>
      %185 = vector.shape_cast %184 : vector<1x2x16x4xf32> to vector<2x16x4xf32>
      %186 = arith.truncf %185 : vector<2x16x4xf32> to vector<2x16x4xbf16>
      %c10 = arith.constant 10 : index
      %c16_118 = arith.constant 16 : index
      %c0_119 = arith.constant 0 : index
      %187 = vector.load %arg12[%c10, %c16_118, %c0_119] : memref<12x48x4xbf16, #tpu.memory_space<vmem>>, vector<2x16x4xbf16>
      tpu.vector_store %arg12[%c10, %c16_118, %c0_119], %186 {strides = array<i32>} : memref<12x48x4xbf16, #tpu.memory_space<vmem>>, vector<2x16x4xbf16>,
    } else {
    }
    %c0_16 = arith.constant 0 : index
    %c0_17 = arith.constant 0 : index
    %c0_18 = arith.constant 0 : index
    %20 = vector.load %arg12[%c0_16, %c0_17, %c0_18] : memref<12x48x4xbf16, #tpu.memory_space<vmem>>, vector<12x48x4xbf16>
    %21 = vector.extract_strided_slice %20 {offsets = [0, 14, 0], sizes = [12, 32, 4], strides = [1, 1, 1]} : vector<12x48x4xbf16> to vector<12x32x4xbf16>
    %22 = vector.extract_strided_slice %21 {offsets = [0, 0, 0], sizes = [10, 32, 4], strides = [1, 1, 1]} : vector<12x32x4xbf16> to vector<10x32x4xbf16>
    %23 = vector.shape_cast %22 : vector<10x32x4xbf16> to vector<320x4xbf16>
    %c0_19 = arith.constant 0 : index
    %c0_20 = arith.constant 0 : index
    %c0_21 = arith.constant 0 : index
    %24 = vector.load %arg5[%c0_19, %c0_20, %c0_21] : memref<9x4x2xbf16, #tpu.memory_space<vmem>>, vector<1x4x2xbf16>
    %25 = vector.shape_cast %24 : vector<1x4x2xbf16> to vector<4x2xbf16>
    %cst_22 = arith.constant dense<0.000000e+00> : vector<320x2xf32>
    %26 = tpu.matmul %23, %25, %cst_22 {dimension_numbers = #tpu.dot_dimension_numbers<[1], [0], [0], [1], [0, 0, 1, 1], [], []>} : vector<320x4xbf16>, vector<4x2xbf16>, vector<320x2xf32> -> vector<320x2xf32>
    %27 = vector.extract_strided_slice %21 {offsets = [1, 0, 0], sizes = [10, 32, 4], strides = [1, 1, 1]} : vector<12x32x4xbf16> to vector<10x32x4xbf16>
    %28 = vector.shape_cast %27 : vector<10x32x4xbf16> to vector<320x4xbf16>
    %c3 = arith.constant 3 : index
    %c0_23 = arith.constant 0 : index
    %c0_24 = arith.constant 0 : index
    %29 = vector.load %arg5[%c3, %c0_23, %c0_24] : memref<9x4x2xbf16, #tpu.memory_space<vmem>>, vector<1x4x2xbf16>
    %30 = vector.shape_cast %29 : vector<1x4x2xbf16> to vector<4x2xbf16>
    %cst_25 = arith.constant dense<0.000000e+00> : vector<320x2xf32>
    %31 = tpu.matmul %28, %30, %cst_25 {dimension_numbers = #tpu.dot_dimension_numbers<[1], [0], [0], [1], [0, 0, 1, 1], [], []>} : vector<320x4xbf16>, vector<4x2xbf16>, vector<320x2xf32> -> vector<320x2xf32>
    %32 = arith.addf %26, %31 : vector<320x2xf32>
    %33 = vector.extract_strided_slice %21 {offsets = [2, 0, 0], sizes = [10, 32, 4], strides = [1, 1, 1]} : vector<12x32x4xbf16> to vector<10x32x4xbf16>
    %34 = vector.shape_cast %33 : vector<10x32x4xbf16> to vector<320x4xbf16>
    %c6 = arith.constant 6 : index
    %c0_26 = arith.constant 0 : index
    %c0_27 = arith.constant 0 : index
    %35 = vector.load %arg5[%c6, %c0_26, %c0_27] : memref<9x4x2xbf16, #tpu.memory_space<vmem>>, vector<1x4x2xbf16>
    %36 = vector.shape_cast %35 : vector<1x4x2xbf16> to vector<4x2xbf16>
    %cst_28 = arith.constant dense<0.000000e+00> : vector<320x2xf32>
    %37 = tpu.matmul %34, %36, %cst_28 {dimension_numbers = #tpu.dot_dimension_numbers<[1], [0], [0], [1], [0, 0, 1, 1], [], []>} : vector<320x4xbf16>, vector<4x2xbf16>, vector<320x2xf32> -> vector<320x2xf32>
    %38 = arith.addf %32, %37 : vector<320x2xf32>
    %39 = vector.extract_strided_slice %20 {offsets = [0, 15, 0], sizes = [12, 32, 4], strides = [1, 1, 1]} : vector<12x48x4xbf16> to vector<12x32x4xbf16>
    %40 = vector.extract_strided_slice %39 {offsets = [0, 0, 0], sizes = [10, 32, 4], strides = [1, 1, 1]} : vector<12x32x4xbf16> to vector<10x32x4xbf16>
    %41 = vector.shape_cast %40 : vector<10x32x4xbf16> to vector<320x4xbf16>
    %c1 = arith.constant 1 : index
    %c0_29 = arith.constant 0 : index
    %c0_30 = arith.constant 0 : index
    %42 = vector.load %arg5[%c1, %c0_29, %c0_30] : memref<9x4x2xbf16, #tpu.memory_space<vmem>>, vector<1x4x2xbf16>
    %43 = vector.shape_cast %42 : vector<1x4x2xbf16> to vector<4x2xbf16>
    %cst_31 = arith.constant dense<0.000000e+00> : vector<320x2xf32>
    %44 = tpu.matmul %41, %43, %cst_31 {dimension_numbers = #tpu.dot_dimension_numbers<[1], [0], [0], [1], [0, 0, 1, 1], [], []>} : vector<320x4xbf16>, vector<4x2xbf16>, vector<320x2xf32> -> vector<320x2xf32>
    %45 = arith.addf %38, %44 : vector<320x2xf32>
    %46 = vector.extract_strided_slice %39 {offsets = [1, 0, 0], sizes = [10, 32, 4], strides = [1, 1, 1]} : vector<12x32x4xbf16> to vector<10x32x4xbf16>
    %47 = vector.shape_cast %46 : vector<10x32x4xbf16> to vector<320x4xbf16>
    %c4 = arith.constant 4 : index
    %c0_32 = arith.constant 0 : index
    %c0_33 = arith.constant 0 : index
    %48 = vector.load %arg5[%c4, %c0_32, %c0_33] : memref<9x4x2xbf16, #tpu.memory_space<vmem>>, vector<1x4x2xbf16>
    %49 = vector.shape_cast %48 : vector<1x4x2xbf16> to vector<4x2xbf16>
    %cst_34 = arith.constant dense<0.000000e+00> : vector<320x2xf32>
    %50 = tpu.matmul %47, %49, %cst_34 {dimension_numbers = #tpu.dot_dimension_numbers<[1], [0], [0], [1], [0, 0, 1, 1], [], []>} : vector<320x4xbf16>, vector<4x2xbf16>, vector<320x2xf32> -> vector<320x2xf32>
    %51 = arith.addf %45, %50 : vector<320x2xf32>
    %52 = vector.extract_strided_slice %39 {offsets = [2, 0, 0], sizes = [10, 32, 4], strides = [1, 1, 1]} : vector<12x32x4xbf16> to vector<10x32x4xbf16>
    %53 = vector.shape_cast %52 : vector<10x32x4xbf16> to vector<320x4xbf16>
    %c7 = arith.constant 7 : index
    %c0_35 = arith.constant 0 : index
    %c0_36 = arith.constant 0 : index
    %54 = vector.load %arg5[%c7, %c0_35, %c0_36] : memref<9x4x2xbf16, #tpu.memory_space<vmem>>, vector<1x4x2xbf16>
    %55 = vector.shape_cast %54 : vector<1x4x2xbf16> to vector<4x2xbf16>
    %cst_37 = arith.constant dense<0.000000e+00> : vector<320x2xf32>
    %56 = tpu.matmul %53, %55, %cst_37 {dimension_numbers = #tpu.dot_dimension_numbers<[1], [0], [0], [1], [0, 0, 1, 1], [], []>} : vector<320x4xbf16>, vector<4x2xbf16>, vector<320x2xf32> -> vector<320x2xf32>
    %57 = arith.addf %51, %56 : vector<320x2xf32>
    %58 = vector.extract_strided_slice %20 {offsets = [0, 16, 0], sizes = [12, 32, 4], strides = [1, 1, 1]} : vector<12x48x4xbf16> to vector<12x32x4xbf16>
    %59 = vector.extract_strided_slice %58 {offsets = [0, 0, 0], sizes = [10, 32, 4], strides = [1, 1, 1]} : vector<12x32x4xbf16> to vector<10x32x4xbf16>
    %60 = vector.shape_cast %59 : vector<10x32x4xbf16> to vector<320x4xbf16>
    %c2_38 = arith.constant 2 : index
    %c0_39 = arith.constant 0 : index
    %c0_40 = arith.constant 0 : index
    %61 = vector.load %arg5[%c2_38, %c0_39, %c0_40] : memref<9x4x2xbf16, #tpu.memory_space<vmem>>, vector<1x4x2xbf16>
    %62 = vector.shape_cast %61 : vector<1x4x2xbf16> to vector<4x2xbf16>
    %cst_41 = arith.constant dense<0.000000e+00> : vector<320x2xf32>
    %63 = tpu.matmul %60, %62, %cst_41 {dimension_numbers = #tpu.dot_dimension_numbers<[1], [0], [0], [1], [0, 0, 1, 1], [], []>} : vector<320x4xbf16>, vector<4x2xbf16>, vector<320x2xf32> -> vector<320x2xf32>
    %64 = arith.addf %57, %63 : vector<320x2xf32>
    %65 = vector.extract_strided_slice %58 {offsets = [1, 0, 0], sizes = [10, 32, 4], strides = [1, 1, 1]} : vector<12x32x4xbf16> to vector<10x32x4xbf16>
    %66 = vector.shape_cast %65 : vector<10x32x4xbf16> to vector<320x4xbf16>
    %c5 = arith.constant 5 : index
    %c0_42 = arith.constant 0 : index
    %c0_43 = arith.constant 0 : index
    %67 = vector.load %arg5[%c5, %c0_42, %c0_43] : memref<9x4x2xbf16, #tpu.memory_space<vmem>>, vector<1x4x2xbf16>
    %68 = vector.shape_cast %67 : vector<1x4x2xbf16> to vector<4x2xbf16>
    %cst_44 = arith.constant dense<0.000000e+00> : vector<320x2xf32>
    %69 = tpu.matmul %66, %68, %cst_44 {dimension_numbers = #tpu.dot_dimension_numbers<[1], [0], [0], [1], [0, 0, 1, 1], [], []>} : vector<320x4xbf16>, vector<4x2xbf16>, vector<320x2xf32> -> vector<320x2xf32>
    %70 = arith.addf %64, %69 : vector<320x2xf32>
    %71 = vector.extract_strided_slice %58 {offsets = [2, 0, 0], sizes = [10, 32, 4], strides = [1, 1, 1]} : vector<12x32x4xbf16> to vector<10x32x4xbf16>
    %72 = vector.shape_cast %71 : vector<10x32x4xbf16> to vector<320x4xbf16>
    %c8 = arith.constant 8 : index
    %c0_45 = arith.constant 0 : index
    %c0_46 = arith.constant 0 : index
    %73 = vector.load %arg5[%c8, %c0_45, %c0_46] : memref<9x4x2xbf16, #tpu.memory_space<vmem>>, vector<1x4x2xbf16>
    %74 = vector.shape_cast %73 : vector<1x4x2xbf16> to vector<4x2xbf16>
    %cst_47 = arith.constant dense<0.000000e+00> : vector<320x2xf32>
    %75 = tpu.matmul %72, %74, %cst_47 {dimension_numbers = #tpu.dot_dimension_numbers<[1], [0], [0], [1], [0, 0, 1, 1], [], []>} : vector<320x4xbf16>, vector<4x2xbf16>, vector<320x2xf32> -> vector<320x2xf32>
    %76 = arith.addf %70, %75 : vector<320x2xf32>
    %c0_48 = arith.constant 0 : index
    %c0_49 = arith.constant 0 : index
    %77 = vector.load %arg6[%c0_48, %c0_49] : memref<1x2xf32, #tpu.memory_space<vmem>>, vector<1x2xf32>
    %78 = vector.broadcast %77 : vector<1x2xf32> to vector<320x2xf32>
    %79 = arith.mulf %76, %78 : vector<320x2xf32>
    %c0_50 = arith.constant 0 : index
    %c0_51 = arith.constant 0 : index
    %80 = vector.load %arg7[%c0_50, %c0_51] : memref<1x2xf32, #tpu.memory_space<vmem>>, vector<1x2xf32>
    %81 = vector.broadcast %80 : vector<1x2xf32> to vector<320x2xf32>
    %82 = arith.addf %79, %81 : vector<320x2xf32>
    %83 = arith.negf %82 : vector<320x2xf32>
    %84 = math.exp %83 : vector<320x2xf32>
    %cst_52 = arith.constant 1.000000e+00 : f32
    %85 = vector.broadcast %cst_52 : f32 to vector<320x2xf32>
    %86 = arith.addf %85, %84 : vector<320x2xf32>
    %87 = arith.divf %85, %86 : vector<320x2xf32>
    %88 = arith.mulf %82, %87 : vector<320x2xf32>
    %89 = vector.shape_cast %88 : vector<320x2xf32> to vector<10x32x2xf32>
    %90 = tpu.iota {dimensions = array<i32: 1>} : vector<10x32x1xi32>
    %c1_i32_53 = arith.constant 1 : i32
    %91 = vector.broadcast %c1_i32_53 : i32 to vector<10x32x1xi32>
    %92 = arith.cmpi sge, %90, %91 : vector<10x32x1xi32>
    %c16_i32 = arith.constant 16 : i32
    %93 = vector.broadcast %c16_i32 : i32 to vector<10x32x1xi32>
    %94 = arith.cmpi sle, %90, %93 : vector<10x32x1xi32>
    %95 = arith.andi %92, %94 : vector<10x32x1xi1>
    %cst_54 = arith.constant 0.000000e+00 : f32
    %96 = vector.shape_cast %95 : vector<10x32x1xi1> to vector<10x32x1xi1>
    %97 = vector.broadcast %96 : vector<10x32x1xi1> to vector<10x32x2xi1>
    %98 = vector.broadcast %cst_54 : f32 to vector<10x32x2xf32>
    %99 = arith.select %97, %89, %98 : vector<10x32x2xi1>, vector<10x32x2xf32>
    %100 = arith.truncf %99 : vector<10x32x2xf32> to vector<10x32x2xbf16>
    %c0_55 = arith.constant 0 : index
    %c0_56 = arith.constant 0 : index
    %c0_57 = arith.constant 0 : index
    %101 = vector.load %arg13[%c0_55, %c0_56, %c0_57] : memref<10x32x2xbf16, #tpu.memory_space<vmem>>, vector<10x32x2xbf16>
    tpu.vector_store %arg13[%c0_55, %c0_56, %c0_57], %100 {strides = array<i32>} : memref<10x32x2xbf16, #tpu.memory_space<vmem>>, vector<10x32x2xbf16>,
    %c0_i32_58 = arith.constant 0 : i32
    %102 = arith.cmpi eq, %arg1, %c0_i32_58 : i32
    %103 = arith.extui %102 : i1 to i32
    %c0_i32_59 = arith.constant 0 : i32
    %104 = arith.cmpi ne, %103, %c0_i32_59 : i32
    scf.if %104 {
      %cst_114 = arith.constant 0.000000e+00 : bf16
      %184 = vector.broadcast %cst_114 : bf16 to vector<1x32x2xbf16>
      %c0_115 = arith.constant 0 : index
      %c0_116 = arith.constant 0 : index
      %c0_117 = arith.constant 0 : index
      %185 = vector.load %arg13[%c0_115, %c0_116, %c0_117] : memref<10x32x2xbf16, #tpu.memory_space<vmem>>, vector<1x32x2xbf16>
      tpu.vector_store %arg13[%c0_115, %c0_116, %c0_117], %184 {strides = array<i32>} : memref<10x32x2xbf16, #tpu.memory_space<vmem>>, vector<1x32x2xbf16>,
    } else {
    }
    %c1_i32_60 = arith.constant 1 : i32
    %105 = arith.cmpi eq, %arg1, %c1_i32_60 : i32
    %106 = arith.extui %105 : i1 to i32
    %c0_i32_61 = arith.constant 0 : i32
    %107 = arith.cmpi ne, %106, %c0_i32_61 : i32
    scf.if %107 {
      %cst_114 = arith.constant 0.000000e+00 : bf16
      %184 = vector.broadcast %cst_114 : bf16 to vector<1x32x2xbf16>
      %c9 = arith.constant 9 : index
      %c0_115 = arith.constant 0 : index
      %c0_116 = arith.constant 0 : index
      %185 = vector.load %arg13[%c9, %c0_115, %c0_116] : memref<10x32x2xbf16, #tpu.memory_space<vmem>>, vector<1x32x2xbf16>
      tpu.vector_store %arg13[%c9, %c0_115, %c0_116], %184 {strides = array<i32>} : memref<10x32x2xbf16, #tpu.memory_space<vmem>>, vector<1x32x2xbf16>,
    } else {
    }
    %c0_62 = arith.constant 0 : index
    %c0_63 = arith.constant 0 : index
    %c0_64 = arith.constant 0 : index
    %108 = vector.load %arg13[%c0_62, %c0_63, %c0_64] : memref<10x32x2xbf16, #tpu.memory_space<vmem>>, vector<10x32x2xbf16>
    %109 = vector.extract_strided_slice %108 {offsets = [0, 0, 0], sizes = [10, 16, 2], strides = [1, 1, 1]} : vector<10x32x2xbf16> to vector<10x16x2xbf16>
    %110 = vector.extract_strided_slice %109 {offsets = [0, 0, 0], sizes = [8, 16, 2], strides = [1, 1, 1]} : vector<10x16x2xbf16> to vector<8x16x2xbf16>
    %111 = vector.shape_cast %110 : vector<8x16x2xbf16> to vector<128x2xbf16>
    %c0_65 = arith.constant 0 : index
    %c0_66 = arith.constant 0 : index
    %c0_67 = arith.constant 0 : index
    %112 = vector.load %arg8[%c0_65, %c0_66, %c0_67] : memref<9x2x4xbf16, #tpu.memory_space<vmem>>, vector<1x2x4xbf16>
    %113 = vector.shape_cast %112 : vector<1x2x4xbf16> to vector<2x4xbf16>
    %cst_68 = arith.constant dense<0.000000e+00> : vector<128x4xf32>
    %114 = tpu.matmul %111, %113, %cst_68 {dimension_numbers = #tpu.dot_dimension_numbers<[1], [0], [0], [1], [0, 0, 1, 1], [], []>} : vector<128x2xbf16>, vector<2x4xbf16>, vector<128x4xf32> -> vector<128x4xf32>
    %115 = vector.extract_strided_slice %109 {offsets = [1, 0, 0], sizes = [8, 16, 2], strides = [1, 1, 1]} : vector<10x16x2xbf16> to vector<8x16x2xbf16>
    %116 = vector.shape_cast %115 : vector<8x16x2xbf16> to vector<128x2xbf16>
    %c3_69 = arith.constant 3 : index
    %c0_70 = arith.constant 0 : index
    %c0_71 = arith.constant 0 : index
    %117 = vector.load %arg8[%c3_69, %c0_70, %c0_71] : memref<9x2x4xbf16, #tpu.memory_space<vmem>>, vector<1x2x4xbf16>
    %118 = vector.shape_cast %117 : vector<1x2x4xbf16> to vector<2x4xbf16>
    %cst_72 = arith.constant dense<0.000000e+00> : vector<128x4xf32>
    %119 = tpu.matmul %116, %118, %cst_72 {dimension_numbers = #tpu.dot_dimension_numbers<[1], [0], [0], [1], [0, 0, 1, 1], [], []>} : vector<128x2xbf16>, vector<2x4xbf16>, vector<128x4xf32> -> vector<128x4xf32>
    %120 = arith.addf %114, %119 : vector<128x4xf32>
    %121 = vector.extract_strided_slice %109 {offsets = [2, 0, 0], sizes = [8, 16, 2], strides = [1, 1, 1]} : vector<10x16x2xbf16> to vector<8x16x2xbf16>
    %122 = vector.shape_cast %121 : vector<8x16x2xbf16> to vector<128x2xbf16>
    %c6_73 = arith.constant 6 : index
    %c0_74 = arith.constant 0 : index
    %c0_75 = arith.constant 0 : index
    %123 = vector.load %arg8[%c6_73, %c0_74, %c0_75] : memref<9x2x4xbf16, #tpu.memory_space<vmem>>, vector<1x2x4xbf16>
    %124 = vector.shape_cast %123 : vector<1x2x4xbf16> to vector<2x4xbf16>
    %cst_76 = arith.constant dense<0.000000e+00> : vector<128x4xf32>
    %125 = tpu.matmul %122, %124, %cst_76 {dimension_numbers = #tpu.dot_dimension_numbers<[1], [0], [0], [1], [0, 0, 1, 1], [], []>} : vector<128x2xbf16>, vector<2x4xbf16>, vector<128x4xf32> -> vector<128x4xf32>
    %126 = arith.addf %120, %125 : vector<128x4xf32>
    %127 = vector.extract_strided_slice %108 {offsets = [0, 1, 0], sizes = [10, 16, 2], strides = [1, 1, 1]} : vector<10x32x2xbf16> to vector<10x16x2xbf16>
    %128 = vector.extract_strided_slice %127 {offsets = [0, 0, 0], sizes = [8, 16, 2], strides = [1, 1, 1]} : vector<10x16x2xbf16> to vector<8x16x2xbf16>
    %129 = vector.shape_cast %128 : vector<8x16x2xbf16> to vector<128x2xbf16>
    %c1_77 = arith.constant 1 : index
    %c0_78 = arith.constant 0 : index
    %c0_79 = arith.constant 0 : index
    %130 = vector.load %arg8[%c1_77, %c0_78, %c0_79] : memref<9x2x4xbf16, #tpu.memory_space<vmem>>, vector<1x2x4xbf16>
    %131 = vector.shape_cast %130 : vector<1x2x4xbf16> to vector<2x4xbf16>
    %cst_80 = arith.constant dense<0.000000e+00> : vector<128x4xf32>
    %132 = tpu.matmul %129, %131, %cst_80 {dimension_numbers = #tpu.dot_dimension_numbers<[1], [0], [0], [1], [0, 0, 1, 1], [], []>} : vector<128x2xbf16>, vector<2x4xbf16>, vector<128x4xf32> -> vector<128x4xf32>
    %133 = arith.addf %126, %132 : vector<128x4xf32>
    %134 = vector.extract_strided_slice %127 {offsets = [1, 0, 0], sizes = [8, 16, 2], strides = [1, 1, 1]} : vector<10x16x2xbf16> to vector<8x16x2xbf16>
    %135 = vector.shape_cast %134 : vector<8x16x2xbf16> to vector<128x2xbf16>
    %c4_81 = arith.constant 4 : index
    %c0_82 = arith.constant 0 : index
    %c0_83 = arith.constant 0 : index
    %136 = vector.load %arg8[%c4_81, %c0_82, %c0_83] : memref<9x2x4xbf16, #tpu.memory_space<vmem>>, vector<1x2x4xbf16>
    %137 = vector.shape_cast %136 : vector<1x2x4xbf16> to vector<2x4xbf16>
    %cst_84 = arith.constant dense<0.000000e+00> : vector<128x4xf32>
    %138 = tpu.matmul %135, %137, %cst_84 {dimension_numbers = #tpu.dot_dimension_numbers<[1], [0], [0], [1], [0, 0, 1, 1], [], []>} : vector<128x2xbf16>, vector<2x4xbf16>, vector<128x4xf32> -> vector<128x4xf32>
    %139 = arith.addf %133, %138 : vector<128x4xf32>
    %140 = vector.extract_strided_slice %127 {offsets = [2, 0, 0], sizes = [8, 16, 2], strides = [1, 1, 1]} : vector<10x16x2xbf16> to vector<8x16x2xbf16>
    %141 = vector.shape_cast %140 : vector<8x16x2xbf16> to vector<128x2xbf16>
    %c7_85 = arith.constant 7 : index
    %c0_86 = arith.constant 0 : index
    %c0_87 = arith.constant 0 : index
    %142 = vector.load %arg8[%c7_85, %c0_86, %c0_87] : memref<9x2x4xbf16, #tpu.memory_space<vmem>>, vector<1x2x4xbf16>
    %143 = vector.shape_cast %142 : vector<1x2x4xbf16> to vector<2x4xbf16>
    %cst_88 = arith.constant dense<0.000000e+00> : vector<128x4xf32>
    %144 = tpu.matmul %141, %143, %cst_88 {dimension_numbers = #tpu.dot_dimension_numbers<[1], [0], [0], [1], [0, 0, 1, 1], [], []>} : vector<128x2xbf16>, vector<2x4xbf16>, vector<128x4xf32> -> vector<128x4xf32>
    %145 = arith.addf %139, %144 : vector<128x4xf32>
    %146 = vector.extract_strided_slice %108 {offsets = [0, 2, 0], sizes = [10, 16, 2], strides = [1, 1, 1]} : vector<10x32x2xbf16> to vector<10x16x2xbf16>
    %147 = vector.extract_strided_slice %146 {offsets = [0, 0, 0], sizes = [8, 16, 2], strides = [1, 1, 1]} : vector<10x16x2xbf16> to vector<8x16x2xbf16>
    %148 = vector.shape_cast %147 : vector<8x16x2xbf16> to vector<128x2xbf16>
    %c2_89 = arith.constant 2 : index
    %c0_90 = arith.constant 0 : index
    %c0_91 = arith.constant 0 : index
    %149 = vector.load %arg8[%c2_89, %c0_90, %c0_91] : memref<9x2x4xbf16, #tpu.memory_space<vmem>>, vector<1x2x4xbf16>
    %150 = vector.shape_cast %149 : vector<1x2x4xbf16> to vector<2x4xbf16>
    %cst_92 = arith.constant dense<0.000000e+00> : vector<128x4xf32>
    %151 = tpu.matmul %148, %150, %cst_92 {dimension_numbers = #tpu.dot_dimension_numbers<[1], [0], [0], [1], [0, 0, 1, 1], [], []>} : vector<128x2xbf16>, vector<2x4xbf16>, vector<128x4xf32> -> vector<128x4xf32>
    %152 = arith.addf %145, %151 : vector<128x4xf32>
    %153 = vector.extract_strided_slice %146 {offsets = [1, 0, 0], sizes = [8, 16, 2], strides = [1, 1, 1]} : vector<10x16x2xbf16> to vector<8x16x2xbf16>
    %154 = vector.shape_cast %153 : vector<8x16x2xbf16> to vector<128x2xbf16>
    %c5_93 = arith.constant 5 : index
    %c0_94 = arith.constant 0 : index
    %c0_95 = arith.constant 0 : index
    %155 = vector.load %arg8[%c5_93, %c0_94, %c0_95] : memref<9x2x4xbf16, #tpu.memory_space<vmem>>, vector<1x2x4xbf16>
    %156 = vector.shape_cast %155 : vector<1x2x4xbf16> to vector<2x4xbf16>
    %cst_96 = arith.constant dense<0.000000e+00> : vector<128x4xf32>
    %157 = tpu.matmul %154, %156, %cst_96 {dimension_numbers = #tpu.dot_dimension_numbers<[1], [0], [0], [1], [0, 0, 1, 1], [], []>} : vector<128x2xbf16>, vector<2x4xbf16>, vector<128x4xf32> -> vector<128x4xf32>
    %158 = arith.addf %152, %157 : vector<128x4xf32>
    %159 = vector.extract_strided_slice %146 {offsets = [2, 0, 0], sizes = [8, 16, 2], strides = [1, 1, 1]} : vector<10x16x2xbf16> to vector<8x16x2xbf16>
    %160 = vector.shape_cast %159 : vector<8x16x2xbf16> to vector<128x2xbf16>
    %c8_97 = arith.constant 8 : index
    %c0_98 = arith.constant 0 : index
    %c0_99 = arith.constant 0 : index
    %161 = vector.load %arg8[%c8_97, %c0_98, %c0_99] : memref<9x2x4xbf16, #tpu.memory_space<vmem>>, vector<1x2x4xbf16>
    %162 = vector.shape_cast %161 : vector<1x2x4xbf16> to vector<2x4xbf16>
    %cst_100 = arith.constant dense<0.000000e+00> : vector<128x4xf32>
    %163 = tpu.matmul %160, %162, %cst_100 {dimension_numbers = #tpu.dot_dimension_numbers<[1], [0], [0], [1], [0, 0, 1, 1], [], []>} : vector<128x2xbf16>, vector<2x4xbf16>, vector<128x4xf32> -> vector<128x4xf32>
    %164 = arith.addf %158, %163 : vector<128x4xf32>
    %c0_101 = arith.constant 0 : index
    %c0_102 = arith.constant 0 : index
    %165 = vector.load %arg9[%c0_101, %c0_102] : memref<1x4xf32, #tpu.memory_space<vmem>>, vector<1x4xf32>
    %166 = vector.broadcast %165 : vector<1x4xf32> to vector<128x4xf32>
    %167 = arith.mulf %164, %166 : vector<128x4xf32>
    %c0_103 = arith.constant 0 : index
    %c0_104 = arith.constant 0 : index
    %168 = vector.load %arg10[%c0_103, %c0_104] : memref<1x4xf32, #tpu.memory_space<vmem>>, vector<1x4xf32>
    %169 = vector.broadcast %168 : vector<1x4xf32> to vector<128x4xf32>
    %170 = arith.addf %167, %169 : vector<128x4xf32>
    %171 = arith.negf %170 : vector<128x4xf32>
    %172 = math.exp %171 : vector<128x4xf32>
    %cst_105 = arith.constant 1.000000e+00 : f32
    %173 = vector.broadcast %cst_105 : f32 to vector<128x4xf32>
    %174 = arith.addf %173, %172 : vector<128x4xf32>
    %175 = arith.divf %173, %174 : vector<128x4xf32>
    %176 = arith.mulf %170, %175 : vector<128x4xf32>
    %177 = vector.shape_cast %176 : vector<128x4xf32> to vector<8x16x4xf32>
    %c0_106 = arith.constant 0 : index
    %c0_107 = arith.constant 0 : index
    %c0_108 = arith.constant 0 : index
    %c0_109 = arith.constant 0 : index
    %178 = vector.load %arg3[%c0_106, %c0_107, %c0_108, %c0_109] : memref<1x8x16x4xf32, #tpu.memory_space<vmem>>, vector<1x8x16x4xf32>
    %179 = vector.shape_cast %178 : vector<1x8x16x4xf32> to vector<8x16x4xf32>
    %180 = arith.addf %177, %179 : vector<8x16x4xf32>
    %c0_110 = arith.constant 0 : index
    %c0_111 = arith.constant 0 : index
    %c0_112 = arith.constant 0 : index
    %c0_113 = arith.constant 0 : index
    %181 = vector.load %arg11[%c0_110, %c0_111, %c0_112, %c0_113] : memref<1x8x16x4xf32, #tpu.memory_space<vmem>>, vector<1x8x16x4xf32>
    %182 = vector.shape_cast %181 : vector<1x8x16x4xf32> to vector<8x16x4xf32>
    %183 = vector.shape_cast %180 : vector<8x16x4xf32> to vector<1x8x16x4xf32>
    tpu.vector_store %arg11[%c0_110, %c0_111, %c0_112, %c0_113], %183 {strides = array<i32>} : memref<1x8x16x4xf32, #tpu.memory_space<vmem>>, vector<1x8x16x4xf32>,
    return
  }
  func.func @transform_0(%arg0: i32, %arg1: i32) -> (i32, i32, i32, i32) {
    %c4_i32 = arith.constant 4 : i32
    %0 = arith.muli %arg1, %c4_i32 : i32
    %c1_i32 = arith.constant 1 : i32
    %1 = arith.subi %0, %c1_i32 : i32
    %c0_i32 = arith.constant 0 : i32
    %2 = arith.maxsi %1, %c0_i32 : i32
    %c0_i32_0 = arith.constant 0 : i32
    %c0_i32_1 = arith.constant 0 : i32
    %c0_i32_2 = arith.constant 0 : i32
    return %arg0, %2, %c0_i32_0, %c0_i32_1 : i32, i32, i32, i32
  }
  func.func @transform_1(%arg0: i32, %arg1: i32) -> (i32, i32, i32, i32) {
    %c0_i32 = arith.constant 0 : i32
    %c0_i32_0 = arith.constant 0 : i32
    %c0_i32_1 = arith.constant 0 : i32
    return %arg0, %arg1, %c0_i32, %c0_i32_0 : i32, i32, i32, i32
  }
  func.func @transform_2(%arg0: i32, %arg1: i32) -> (i32, i32, i32, i32) {
    %c1_i32 = arith.constant 1 : i32
    %0 = arith.addi %arg1, %c1_i32 : i32
    %c4_i32 = arith.constant 4 : i32
    %1 = arith.muli %0, %c4_i32 : i32
    %c7_i32 = arith.constant 7 : i32
    %2 = arith.minsi %1, %c7_i32 : i32
    %c0_i32 = arith.constant 0 : i32
    %c0_i32_0 = arith.constant 0 : i32
    %c0_i32_1 = arith.constant 0 : i32
    return %arg0, %2, %c0_i32, %c0_i32_0 : i32, i32, i32, i32
  }
  func.func @transform_3(%arg0: i32, %arg1: i32) -> (i32, i32, i32) {
    %c0_i32 = arith.constant 0 : i32
    %c0_i32_0 = arith.constant 0 : i32
    %c0_i32_1 = arith.constant 0 : i32
    %c0_i32_2 = arith.constant 0 : i32
    return %c0_i32, %c0_i32_0, %c0_i32_1 : i32, i32, i32
  }
  func.func @transform_4(%arg0: i32, %arg1: i32) -> (i32, i32) {
    %c0_i32 = arith.constant 0 : i32
    %c0_i32_0 = arith.constant 0 : i32
    %c0_i32_1 = arith.constant 0 : i32
    return %c0_i32, %c0_i32_0 : i32, i32
  }
  func.func @transform_5(%arg0: i32, %arg1: i32) -> (i32, i32) {
    %c0_i32 = arith.constant 0 : i32
    %c0_i32_0 = arith.constant 0 : i32
    %c0_i32_1 = arith.constant 0 : i32
    return %c0_i32, %c0_i32_0 : i32, i32
  }
  func.func @transform_6(%arg0: i32, %arg1: i32) -> (i32, i32, i32) {
    %c0_i32 = arith.constant 0 : i32
    %c0_i32_0 = arith.constant 0 : i32
    %c0_i32_1 = arith.constant 0 : i32
    %c0_i32_2 = arith.constant 0 : i32
    return %c0_i32, %c0_i32_0, %c0_i32_1 : i32, i32, i32
  }
  func.func @transform_7(%arg0: i32, %arg1: i32) -> (i32, i32) {
    %c0_i32 = arith.constant 0 : i32
    %c0_i32_0 = arith.constant 0 : i32
    %c0_i32_1 = arith.constant 0 : i32
    return %c0_i32, %c0_i32_0 : i32, i32
  }
  func.func @transform_8(%arg0: i32, %arg1: i32) -> (i32, i32) {
    %c0_i32 = arith.constant 0 : i32
    %c0_i32_0 = arith.constant 0 : i32
    %c0_i32_1 = arith.constant 0 : i32
    return %c0_i32, %c0_i32_0 : i32, i32
  }
  func.func @transform_9(%arg0: i32, %arg1: i32) -> (i32, i32, i32, i32) {
    %c0_i32 = arith.constant 0 : i32
    %c0_i32_0 = arith.constant 0 : i32
    %c0_i32_1 = arith.constant 0 : i32
    return %arg0, %arg1, %c0_i32, %c0_i32_0 : i32, i32, i32, i32
  }
}

</mosaic_0001>

<bundles_post_ra>
// kernel: tpu_custom_call.1
= control target key start
LH: loop header
LB: loop body
LE: loop exit
PB: predicated region body
PF: predicated region fallthrough
CT: control target
= control target key end

     0   :  { %s6824_s30 = smov 0   ;;  %s6826_s10 = smov 0   ;;  %s9250_s0 = inlined_call_operand.vmem [shape: f32[2,16,16,4], index: 0, kind: input, shape index: {}]   ;;  %s9251_s1 = inlined_call_operand.vmem [shape: f32[2,16,16,4], index: 1, kind: input, shape index: {}]   ;;  %s9252_s2 = inlined_call_operand.vmem [shape: f32[2,16,16,4], index: 2, kind: input, shape index: {}]   ;;  %s9253_s3 = inlined_call_operand.vmem [shape: bf16[9,4,2], index: 3, kind: input, shape index: {}]   ;;  %s9254_s4 = inlined_call_operand.vmem [shape: f32[1,2], index: 4, kind: input, shape index: {}]   ;;  %s9255_s5 = inlined_call_operand.vmem [shape: f32[1,2], index: 5, kind: input, shape index: {}]   ;;  %s9256_s6 = inlined_call_operand.vmem [shape: bf16[9,2,4], index: 6, kind: input, shape index: {}]   ;;  %s9257_s7 = inlined_call_operand.vmem [shape: f32[1,4], index: 7, kind: input, shape index: {}]   ;;  %s9258_s8 = inlined_call_operand.vmem [shape: f32[1,4], index: 8, kind: input, shape index: {}]   ;;  %s9259_s9 = inlined_call_operand.vmem [shape: f32[2,16,16,4], index: 9, kind: output, shape index: {}]  }
   0x1   :  { %s6828_s11 = smov 0   ;;  %s6830_s12 = smov 0  }
   0x2   :  { %s6832_s13 = smov 0  }
   0x3 LB: > { %s28_s14 = sadd.s32 1, %s6759_s11  ;;  %s31_s15 = sadd.s32 1, %s6763_s12  ;;  %s6767_s13 = sphi %s6832_s13, %s19_s13   ;;  %s6763_s12 = sphi %s6830_s12, %s9386_s12   ;;  %s6759_s11 = sphi %s6828_s11, %s9385_s11   ;;  %s6755_s10 = sphi %s6826_s10, %s9384_s10   ;;  %s6751_s30 = sphi %s6824_s30, %s9383_s30  }
   0x4   : > { %p29_p0 = scmp.ge.s32.totalorder %s28_s14, 2  ;;  %p5924_p1 = scmp.ge.s32.totalorder %s6767_s13, 1 }
   0x5   : > { %p377_p2 = scmp.lt.s32.totalorder %s6767_s13, 5 }
   0x6   : > { %s9388_s14 = smov (%p29_p0, %s28_s14), 0  ;;  %s9390_s15 = smov (!%p29_p0, %s31_s15), %s6763_s12 }
   0x7   : > { %p378_p3 = pnand %p5924_p1, %p377_p2  ;;  %p33_p4 = scmp.ge.s32.totalorder %s9390_s15, 2 }
   0x9   : > { %s9392_s15 = smov (%p33_p4, %s9390_s15), 0  ;;  %381 = sbr.rel (%p378_p3) target bundleno = 1848 (0x738), region = 56 }
   0xe   : > { %vm512_vm0 = vcmask 27648   ;;  %s5925_s16 = sshll.u32 %s6751_s30, 2  ;;  %p456_p5 = scmp.lt.s32.totalorder %s6755_s10, 1  ;;  %v6769_v0 = vmov 0  }
   0xf   : > { %s5926_s17 = sadd.s32 4294967295, %s5925_s16  ;;  %s5931_s18 = sshll.u32 %s6751_s30, 3  ;;  %514 = vst.msk [vmem:[#allocation2 + $0x4] sm:$0xf] %vm512_vm0, %v6769_v0 }
  0x10   : > { %p453_p6 = scmp.gt.s32.totalorder %s5926_s17, 0  ;;  %p473_p7 = scmp.lt.s32.totalorder %s5931_s18, 15  ;;  %516 = vst.msk [vmem:[#allocation2 + $0x1c] sm:$0xf] %vm512_vm0, %v6769_v0 }
  0x11   : > { %s9394_s10 = smov (!%p456_p5, %s6755_s10), 1  ;;  %518 = vst.msk [vmem:[#allocation2 + $0x34] sm:$0xf] %vm512_vm0, %v6769_v0  ;;  %s6451_s21 = sadd.s32 4, %s5925_s16 }
  0x12   : > { %s9396_s17 = smov (!%p453_p6, %s5926_s17), 0  ;;  %s5929_s20 = sshll.u32 %s9394_s10, 5  ;;  %520 = vst.msk [vmem:[#allocation2 + $0x4c] sm:$0xf] %vm512_vm0, %v6769_v0 }
  0x13   : > { %s5927_s19 = sshll.u32 %s9396_s17, 1  ;;  %s9398_s18 = smov (!%p473_p7, %s5931_s18), 15  ;;  %522 = vst.msk [vmem:[#allocation2 + $0x64] sm:$0xf] %vm512_vm0, %v6769_v0 }
  0x14   : > { %p458_p8 = scmp.lt.s32.totalorder %s5927_s19, 15  ;;  %s5932_s22 = sshll.u32 %s9398_s18, 1  ;;  %524 = vst.msk [vmem:[#allocation2 + $0x7c] sm:$0xf] %vm512_vm0, %v6769_v0 }
  0x15   : > { %p483_p9 = scmp.lt.s32.totalorder %s6451_s21, 7  ;;  %s6868_s24 = sadd.s32 %s5932_s22, %s5929_s20  ;;  %526 = vst.msk [vmem:[#allocation2 + $0x94] sm:$0xf] %vm512_vm0, %v6769_v0 }
  0x16   : > { %s9400_s19 = smov (!%p458_p8, %s5927_s19), 15  ;;  %s5934_s27 = sshll.u32 %s6868_s24, 3  ;;  %528 = vst.msk [vmem:[#allocation2 + $0xac] sm:$0xf] %vm512_vm0, %v6769_v0 }
  0x17   : > { %s5928_s23 = sshll.u32 %s9400_s19, 1  ;;  %s6885_s18 = scalar_lea.vmem %s9259_s9, %s5934_s27  ;;  %530 = vst.msk [vmem:[#allocation2 + $0xc4] sm:$0xf] %vm512_vm0, %v6769_v0 }
  0x18   : > { %s462_s25 = sadd.s32 %s5929_s20, %s5928_s23  ;;  %s9402_s21 = smov (!%p483_p9, %s6451_s21), 7  ;;  %532 = vst.msk [vmem:[#allocation2 + $0xdc] sm:$0xf] %vm512_vm0, %v6769_v0 }
  0x19   : > { %s5930_s26 = sshll.u32 %s462_s25, 3  ;;  %s5936_s19 = sshll.u32 %s9402_s21, 1  ;;  %534 = vst.msk [vmem:[#allocation2 + $0xf4] sm:$0xf] %vm512_vm0, %v6769_v0 }
  0x1a   : > { %s6878_s10 = scalar_lea.vmem %s9250_s0, %s5930_s26  ;;  %p488_p10 = scmp.lt.s32.totalorder %s5936_s19, 15  ;;  %536 = vst.msk [vmem:[#allocation2 + $0x10c] sm:$0xf] %vm512_vm0, %v6769_v0 }
  0x1b   : > { %537 = vst.msk [vmem:[#allocation2 + $0x10] sm:$0xf] %vm512_vm0, %v6769_v0  ;;  %s6937_s16 = scalar_lea.vmem %s9251_s1, %s5934_s27  ;;  %p5944_p11 = scmp.ne.s32.totalorder %s6751_s30, 0 }
  0x1c   : > { %s9404_s19 = smov (!%p488_p10, %s5936_s19), 15  ;;  %538 = vst.msk [vmem:[#allocation2 + $0x14] sm:$0xf] %vm512_vm0, %v6769_v0  ;;  %v561_v1 = vld [vmem:[%s6937_s16] sm:$0xff]  ;;  %v562_v2 = vld [vmem:[%s6937_s16 + $0x8] sm:$0xff]  ;;  %v563_v3 = vld [vmem:[%s6937_s16 + $0x10] sm:$0xff] }
  0x1d   : > { %s5937_s22 = sshll.u32 %s9404_s19, 1  ;;  %539 = vst.msk [vmem:[#allocation2 + $0x28] sm:$0xf] %vm512_vm0, %v6769_v0  ;;  %v577_v4 = vpack.c.bf16 %v561_v1, %v561_v1  ;;  %v564_v5 = vld [vmem:[%s6937_s16 + $0x18] sm:$0xff]  ;;  %v578_v6 = vpack.c.bf16 %v562_v2, %v562_v2  ;;  %v565_v7 = vld [vmem:[%s6937_s16 + $0x20] sm:$0xff]  ;;  %v579_v8 = vpack.c.bf16 %v563_v3, %v563_v3  ;;  %v566_v9 = vld [vmem:[%s6937_s16 + $0x28] sm:$0xff] }
  0x1e   : > { %s492_s23 = sadd.s32 %s5937_s22, %s5929_s20  ;;  %540 = vst.msk [vmem:[#allocation2 + $0x2c] sm:$0xf] %vm512_vm0, %v6769_v0  ;;  %v580_v10 = vpack.c.bf16 %v564_v5, %v564_v5  ;;  %v567_v11 = vld [vmem:[%s6937_s16 + $0x30] sm:$0xff]  ;;  %v581_v12 = vpack.c.bf16 %v565_v7, %v565_v7  ;;  %v568_v13 = vld [vmem:[%s6937_s16 + $0x38] sm:$0xff]  ;;  %v582_v14 = vpack.c.bf16 %v566_v9, %v566_v9  ;;  %v569_v15 = vld [vmem:[%s6937_s16 + $0x40] sm:$0xff] }
  0x1f   : > { %s5939_s25 = sshll.u32 %s492_s23, 3  ;;  %541 = vst.msk [vmem:[#allocation2 + $0x40] sm:$0xf] %vm512_vm0, %v6769_v0  ;;  %v583_v16 = vpack.c.bf16 %v567_v11, %v567_v11  ;;  %v570_v17 = vld [vmem:[%s6937_s16 + $0x48] sm:$0xff]  ;;  %v584_v18 = vpack.c.bf16 %v568_v13, %v568_v13  ;;  %v571_v19 = vld [vmem:[%s6937_s16 + $0x50] sm:$0xff]  ;;  %v585_v20 = vpack.c.bf16 %v569_v15, %v569_v15  ;;  %v572_v21 = vld [vmem:[%s6937_s16 + $0x58] sm:$0xff] }
  0x20   : > { %s6902_s28 = scalar_lea.vmem %s9252_s2, %s5939_s25  ;;  %542 = vst.msk [vmem:[#allocation2 + $0x44] sm:$0xf] %vm512_vm0, %v6769_v0  ;;  %v586_v22 = vpack.c.bf16 %v570_v17, %v570_v17  ;;  %v573_v23 = vld [vmem:[%s6937_s16 + $0x60] sm:$0xff]  ;;  %v587_v24 = vpack.c.bf16 %v571_v19, %v571_v19  ;;  %v574_v25 = vld [vmem:[%s6937_s16 + $0x68] sm:$0xff]  ;;  %v588_v26 = vpack.c.bf16 %v572_v21, %v572_v21  ;;  %v575_v27 = vld [vmem:[%s6937_s16 + $0x70] sm:$0xff] }
  0x21   : > { %543 = vst.msk [vmem:[#allocation2 + $0x58] sm:$0xf] %vm512_vm0, %v6769_v0  ;;  %v589_v28 = vpack.c.bf16 %v573_v23, %v573_v23  ;;  %v576_v29 = vld [vmem:[%s6937_s16 + $0x78] sm:$0xff]  ;;  %v590_v30 = vpack.c.bf16 %v574_v25, %v574_v25  ;;  %v591_v31 = vpack.c.bf16 %v575_v27, %v575_v27 }
  0x22   : > { %544 = vst.msk [vmem:[#allocation2 + $0x5c] sm:$0xf] %vm512_vm0, %v6769_v0  ;;  %v592_v32 = vpack.c.bf16 %v576_v29, %v576_v29 }
  0x23   : > { %545 = vst.msk [vmem:[#allocation2 + $0x70] sm:$0xf] %vm512_vm0, %v6769_v0 }
  0x24   : > { %546 = vst.msk [vmem:[#allocation2 + $0x74] sm:$0xf] %vm512_vm0, %v6769_v0 }
  0x25   : > { %547 = vst.msk [vmem:[#allocation2 + $0x88] sm:$0xf] %vm512_vm0, %v6769_v0 }
  0x26   : > { %548 = vst.msk [vmem:[#allocation2 + $0x8c] sm:$0xf] %vm512_vm0, %v6769_v0 }
  0x27   : > { %549 = vst.msk [vmem:[#allocation2 + $0xa0] sm:$0xf] %vm512_vm0, %v6769_v0 }
  0x28   : > { %550 = vst.msk [vmem:[#allocation2 + $0xa4] sm:$0xf] %vm512_vm0, %v6769_v0 }
  0x29   : > { %551 = vst.msk [vmem:[#allocation2 + $0xb8] sm:$0xf] %vm512_vm0, %v6769_v0 }
  0x2a   : > { %552 = vst.msk [vmem:[#allocation2 + $0xbc] sm:$0xf] %vm512_vm0, %v6769_v0 }
  0x2b   : > { %553 = vst.msk [vmem:[#allocation2 + $0xd0] sm:$0xf] %vm512_vm0, %v6769_v0 }
  0x2c   : > { %554 = vst.msk [vmem:[#allocation2 + $0xd4] sm:$0xf] %vm512_vm0, %v6769_v0 }
  0x2d   : > { %555 = vst.msk [vmem:[#allocation2 + $0xe8] sm:$0xf] %vm512_vm0, %v6769_v0 }
  0x2e   : > { %556 = vst.msk [vmem:[#allocation2 + $0xec] sm:$0xf] %vm512_vm0, %v6769_v0 }
  0x2f   : > { %557 = vst.msk [vmem:[#allocation2 + $0x100] sm:$0xf] %vm512_vm0, %v6769_v0 }
  0x30   : > { %558 = vst.msk [vmem:[#allocation2 + $0x104] sm:$0xf] %vm512_vm0, %v6769_v0 }
  0x31   : > { %559 = vst.msk [vmem:[#allocation2 + $0x118] sm:$0xf] %vm512_vm0, %v6769_v0 }
  0x32   : > { %560 = vst.msk [vmem:[#allocation2 + $0x11c] sm:$0xf] %vm512_vm0, %v6769_v0 }
  0x33   : > { %594 = vst.msk [vmem:[#allocation2 + $0x38] sm:$0xf] %vm512_vm0, %v577_v4 }
  0x34   : > { %595 = vst.msk [vmem:[#allocation2 + $0x3c] sm:$0xf] %vm512_vm0, %v578_v6 }
  0x35   : > { %596 = vst.msk [vmem:[#allocation2 + $0x50] sm:$0xf] %vm512_vm0, %v579_v8 }
  0x36   : > { %597 = vst.msk [vmem:[#allocation2 + $0x54] sm:$0xf] %vm512_vm0, %v580_v10 }
  0x37   : > { %598 = vst.msk [vmem:[#allocation2 + $0x68] sm:$0xf] %vm512_vm0, %v581_v12 }
  0x38   : > { %599 = vst.msk [vmem:[#allocation2 + $0x6c] sm:$0xf] %vm512_vm0, %v582_v14 }
  0x39   : > { %600 = vst.msk [vmem:[#allocation2 + $0x80] sm:$0xf] %vm512_vm0, %v583_v16 }
  0x3a   : > { %601 = vst.msk [vmem:[#allocation2 + $0x84] sm:$0xf] %vm512_vm0, %v584_v18 }
  0x3b   : > { %602 = vst.msk [vmem:[#allocation2 + $0x98] sm:$0xf] %vm512_vm0, %v585_v20 }
  0x3c   : > { %603 = vst.msk [vmem:[#allocation2 + $0x9c] sm:$0xf] %vm512_vm0, %v586_v22 }
  0x3d   : > { %604 = vst.msk [vmem:[#allocation2 + $0xb0] sm:$0xf] %vm512_vm0, %v587_v24 }
  0x3e   : > { %605 = vst.msk [vmem:[#allocation2 + $0xb4] sm:$0xf] %vm512_vm0, %v588_v26  ;;  %613 = sbr.rel (%p5944_p11) target bundleno = 72 (0x48), region = 60 }
  0x3f   : > { %606 = vst.msk [vmem:[#allocation2 + $0xc8] sm:$0xf] %vm512_vm0, %v589_v28 }
  0x40   : > { %607 = vst.msk [vmem:[#allocation2 + $0xcc] sm:$0xf] %vm512_vm0, %v590_v30 }
  0x41   : > { %608 = vst.msk [vmem:[#allocation2 + $0xe0] sm:$0xf] %vm512_vm0, %v591_v31 }
  0x42   : > { %609 = vst.msk [vmem:[#allocation2 + $0xe4] sm:$0xf] %vm512_vm0, %v592_v32 }
  0x43   : > { %v6770_v33 = vmov 0  }
  0x44   : > { %614 = vst.msk [vmem:[#allocation2 + $0x8] sm:$0xf] %vm512_vm0, %v6770_v33 }
  0x45   : > { %615 = vst.msk [vmem:[#allocation2 + $0xc] sm:$0xf] %vm512_vm0, %v6770_v33 }
  0x46   : > { %616 = vst.msk [vmem:[#allocation2 + $0x20] sm:$0xf] %vm512_vm0, %v6770_v33 }
  0x47   : > { %617 = vst.msk [vmem:[#allocation2 + $0x24] sm:$0xf] %vm512_vm0, %v6770_v33 }
  0x48 PF: > { %p5945_p12 = scmp.le.s32.totalorder %s6751_s30, 0 }
  0x4a   : > { %621 = sbr.rel (%p5945_p12) target bundleno = 86 (0x56), region = 64 }
  0x4f   : > { %v622_v34 = vld [vmem:[%s6878_s10] sm:$0xff]  ;;  %v623_v35 = vld [vmem:[%s6878_s10 + $0x8] sm:$0xff]  ;;  %v624_v36 = vld [vmem:[%s6878_s10 + $0x10] sm:$0xff] }
  0x50   : > { %v626_v37 = vpack.c.bf16 %v622_v34, %v622_v34  ;;  %v627_v38 = vpack.c.bf16 %v623_v35, %v623_v35  ;;  %v628_v39 = vpack.c.bf16 %v624_v36, %v624_v36  ;;  %v625_v40 = vld [vmem:[%s6878_s10 + $0x18] sm:$0xff] }
  0x51   : > { %v629_v41 = vpack.c.bf16 %v625_v40, %v625_v40 }
  0x52   : > { %630 = vst.msk [vmem:[#allocation2 + $0x8] sm:$0xf] %vm512_vm0, %v626_v37 }
  0x53   : > { %631 = vst.msk [vmem:[#allocation2 + $0xc] sm:$0xf] %vm512_vm0, %v627_v38 }
  0x54   : > { %632 = vst.msk [vmem:[#allocation2 + $0x20] sm:$0xf] %vm512_vm0, %v628_v39 }
  0x55   : > { %633 = vst.msk [vmem:[#allocation2 + $0x24] sm:$0xf] %vm512_vm0, %v629_v41 }
  0x56 PF: > { %p5946_p13 = scmp.ne.s32.totalorder %s6751_s30, 1 }
  0x58   : > { %637 = sbr.rel (%p5946_p13) target bundleno = 98 (0x62), region = 68 }
  0x5d   : > { %v6771_v42 = vmov 0  }
  0x5e   : > { %639 = vst.msk [vmem:[#allocation2 + $0xf8] sm:$0xf] %vm512_vm0, %v6771_v42 }
  0x5f   : > { %640 = vst.msk [vmem:[#allocation2 + $0xfc] sm:$0xf] %vm512_vm0, %v6771_v42 }
  0x60   : > { %641 = vst.msk [vmem:[#allocation2 + $0x110] sm:$0xf] %vm512_vm0, %v6771_v42 }
  0x61   : > { %642 = vst.msk [vmem:[#allocation2 + $0x114] sm:$0xf] %vm512_vm0, %v6771_v42 }
  0x62 PF: > { %p5947_p0 = scmp.ge.s32.totalorder %s6751_s30, 1 }
  0x64   : > { %646 = sbr.rel (%p5947_p0) target bundleno = 112 (0x70), region = 72 }
  0x69   : > { %v647_v43 = vld [vmem:[%s6902_s28] sm:$0xff]  ;;  %v648_v44 = vld [vmem:[%s6902_s28 + $0x8] sm:$0xff]  ;;  %v649_v45 = vld [vmem:[%s6902_s28 + $0x10] sm:$0xff] }
  0x6a   : > { %v651_v46 = vpack.c.bf16 %v647_v43, %v647_v43  ;;  %v652_v47 = vpack.c.bf16 %v648_v44, %v648_v44  ;;  %v653_v48 = vpack.c.bf16 %v649_v45, %v649_v45  ;;  %v650_v49 = vld [vmem:[%s6902_s28 + $0x18] sm:$0xff] }
  0x6b   : > { %v654_v50 = vpack.c.bf16 %v650_v49, %v650_v49 }
  0x6c   : > { %656 = vst.msk [vmem:[#allocation2 + $0xf8] sm:$0xf] %vm512_vm0, %v651_v46 }
  0x6d   : > { %657 = vst.msk [vmem:[#allocation2 + $0xfc] sm:$0xf] %vm512_vm0, %v652_v47 }
  0x6e   : > { %658 = vst.msk [vmem:[#allocation2 + $0x110] sm:$0xf] %vm512_vm0, %v653_v48 }
  0x6f   : > { %659 = vst.msk [vmem:[#allocation2 + $0x114] sm:$0xf] %vm512_vm0, %v654_v50 }
  0x70 PF: > { %v5959_v51 = vld [vmem:[%s9253_s3 + $0x6] sm:$0x3]  ;;  %vm1045_vm1 = vcmask 1041408   ;;  %v7024_v52 = vld [vmem:[#allocation2 + $0x1c] sm:$0xf]  ;;  %vm770_vm2 = vcmask 1040384  }
  0x71   : > { %v1047_v53 = vsel %vm1045_vm1, %v5959_v51, 0  ;;  %v7027_v54 = vld [vmem:[#allocation2 + $0x20] sm:$0xf]  ;;  %v7029_v55 = vld [vmem:[#allocation2 + $0x24] sm:$0xf]  ;;  %vm771_vm3 = vcmask 1044484  }
  0x72   : > { %1056 = vmatpush.bf16.msra.mxu0 %v1047_v53  ;;  %vm7032_vm4 = vmor %vm770_vm2, %vm771_vm3  ;;  %v5949_v57 = vrot.slane %v7024_v52, 11  ;;  %v788_v58 = vrot.slane %v7027_v54, 7  ;;  %v791_v59 = vrot.slane %v7029_v55, 7  ;;  %v903_v60 = vld [vmem:[%s9253_s3] sm:$0x3]  ;;  %vm984_vm5 = vcmask 31744  }
  0x73   : > { %v1171_v61 = vsel %vm1045_vm1, %v903_v60, 0  ;;  %v6001_v62 = vld [vmem:[%s9253_s3 + $0xc] sm:$0x3]  ;;  %v6032_v63 = vld [vmem:[%s9253_s3 + $0x2] sm:$0x3]  ;;  %v1510_v45 = vshrl.u32 %v7024_v52, 16 }
  0x74   : > { %v789_v0 = vsel %vm7032_vm4, %v5949_v57, %v788_v58  ;;  %v790_v1 = vrot.slane %v788_v58, 4  ;;  %v1315_v2 = vsel %vm1045_vm1, %v6001_v62, 0  ;;  %v7053_v3 = vsel %vm1045_vm1, %v6032_v63, 0  ;;  %v7055_v4 = vld [vmem:[#allocation2 + $0x3c] sm:$0xf]  ;;  %6486 = vmatpush.bf16.msra.mxu1 %v1171_v61 }
  0x75   : > { %v924_v5 = vunpack.c.l.b16 %v789_v0  ;;  %6487 = vmatpush.bf16.msra.mxu2 %v1315_v2  ;;  %6488 = vmatpush.bf16.msra.mxu3 %v7053_v3  ;;  %v7058_v6 = vld [vmem:[#allocation2 + $0x40] sm:$0xf]  ;;  %v7060_v7 = vld [vmem:[#allocation2 + $0x44] sm:$0xf]  ;;  %v804_v8 = vrot.slane %v7055_v4, 7  ;;  %v793_v31 = vrot.slane %v791_v59, 4 }
  0x76   : > { %1180 = vmatpush.bf16.msrb.mxu0 %v1171_v61  ;;  %v792_v9 = vsel %vm7032_vm4, %v790_v1, %v791_v59  ;;  %v807_v10 = vrot.slane %v7058_v6, 7  ;;  %v810_v11 = vrot.slane %v7060_v7, 7  ;;  %v7067_v12 = vld [vmem:[#allocation2 + $0xc] sm:$0xf]  ;;  %v663_v15 = vld [vmem:[#allocation2 + $0x10] sm:$0xf] }
  0x77   : > { %v925_v13 = vunpack.c.l.b16 %v792_v9  ;;  %v806_v14 = vrot.slane %v804_v8, 4  ;;  %v664_v17 = vld [vmem:[#allocation2 + $0x14] sm:$0xf]  ;;  %vm1466_vm6 = vsmask.f32 256  ;;  %v1484_v18 = vshrl.u32 %v7067_v12, 16 }
  0x78   : > { %v809_v16 = vrot.slane %v807_v10, 4  ;;  %vm1467_vm7 = vsmask.f32 4368  ;;  %v1487_v21 = vshll.u32 %v7067_v12, 16  ;;  %v1493_v25 = vshrl.u32 %v663_v15, 16 }
  0x79   : > { %v7072_v19 = vpack.c.b16 %v925_v13, %v924_v5  ;;  %v808_v20 = vsel %vm7032_vm4, %v806_v14, %v807_v10  ;;  %v1486_v24 = vrot.slane %v1484_v18, 7  ;;  %v7079_v26 = vld [vmem:[#allocation2 + $0x28] sm:$0xf]  ;;  %v7081_v27 = vld [vmem:[#allocation2 + $0x2c] sm:$0xf]  ;;  %v1496_v29 = vshll.u32 %v663_v15, 16  ;;  %vm7091_vm8 = vmor %vm1466_vm6, %vm1467_vm7 }
  0x7a   : > { %v811_v22 = vsel %vm7032_vm4, %v809_v16, %v810_v11  ;;  %v930_v23 = vunpack.c.l.b16 %v808_v20  ;;  %v1502_v30 = vshrl.u32 %v664_v17, 16  ;;  %v1495_v34 = vrot.slane %v1493_v25, 7  ;;  %v7098_v44 = vld [vmem:[#allocation2 + $0x4c] sm:$0xf]  ;;  %v7109_v58 = vld [vmem:[#allocation2 + $0x50] sm:$0xf] }
  0x7b   : > { %5960 = vmatmul.msk.bf16.vlgmr.msra.gmra.mxu0 %vm984_vm5, %v7072_v19  ;;  %v931_v28 = vunpack.c.l.b16 %v811_v22  ;;  %v7085_v32 = vor.u32 %v1487_v21, %v1486_v24  ;;  %v1491_v33 = vrot.slane %v1486_v24, 4  ;;  %v1505_v35 = vshll.u32 %v664_v17, 16  ;;  %v7111_v52 = vld [vmem:[#allocation2 + $0x54] sm:$0xf]  ;;  %v7128_v20 = vld [vmem:[#allocation2 + $0x38] sm:$0xf] }
  0x7c   : > { %1324 = vmatpush.bf16.msra.mxu0 %v1315_v2  ;;  %v1504_v38 = vrot.slane %v1502_v30, 7  ;;  %v794_v39 = vrot.slane %v7079_v26, 7  ;;  %v797_v40 = vrot.slane %v7081_v27, 7  ;;  %v1498_v41 = vor.u32 %v1496_v29, %v1495_v34 }
  0x7d   : > { %v7087_v36 = vpack.c.b16 %v931_v28, %v930_v23  ;;  %v1500_v42 = vrot.slane %v1495_v34, 4  ;;  %v9260_v43 = vrot.slane %v7067_v12, 7  ;;  %v781_v49 = vrot.slane %v663_v15, 7 }
  0x7e   : > { %v1507_v46 = vor.u32 %v1505_v35, %v1504_v38  ;;  %v795_v47 = vsel %vm7032_vm4, %v793_v31, %v794_v39  ;;  %v796_v48 = vrot.slane %v794_v39, 4  ;;  %v1499_v50 = vsel %vm7091_vm8, %v1491_v33, %v1498_v41  ;;  %v7138_v33 = vld [vmem:[#allocation2 + $0x34] sm:$0xf]  ;;  %v7141_v39 = vld [vmem:[#allocation2 + $0x58] sm:$0xf] }
  0x7f   : > { %6003 = vmatmul.msk.bf16.vlgmr.msra.gmra.mxu2 %vm984_vm5, %v7087_v36  ;;  %v926_v51 = vunpack.c.l.b16 %v795_v47  ;;  %v780_v53 = vrot.slane %v9260_v43, 4  ;;  %v784_v57 = vrot.slane %v664_v17, 7  ;;  %v1873_v60 = vunpack.c.l.b16 %v1499_v50 }
  0x80   : > { %v1508_v59 = vsel %vm7091_vm8, %v1500_v42, %v1507_v46  ;;  %v798_v61 = vsel %vm7032_vm4, %v796_v48, %v797_v40  ;;  %v783_v62 = vrot.slane %v781_v49, 4  ;;  %v5951_v2 = vrot.slane %v7098_v44, 11  ;;  %v7153_v48 = vld [vmem:[#allocation2 + $0x5c] sm:$0xf] }
  0x81   : > { %v1874_v63 = vunpack.c.l.b16 %v1508_v59  ;;  %v927_v0 = vunpack.c.l.b16 %v798_v61  ;;  %v782_v1 = vsel %vm7032_vm4, %v780_v53, %v781_v49  ;;  %v814_v10 = vrot.slane %v7109_v58, 7 }
  0x82   : > { %v785_v5 = vsel %vm7032_vm4, %v783_v62, %v784_v57  ;;  %v1160_v9 = vunpack.c.l.b16 %v782_v1  ;;  %v817_v11 = vrot.slane %v7111_v52, 7  ;;  %v1515_v17 = vshrl.u32 %v7027_v54, 16 }
  0x83   : > { %v1912_v13 = vpack.c.b16 %v1874_v63, %v1873_v60  ;;  %v1161_v14 = vunpack.c.l.b16 %v785_v5  ;;  %v815_v15 = vsel %vm7032_vm4, %v5951_v2, %v814_v10  ;;  %v816_v16 = vrot.slane %v814_v10, 4 }
  0x84   : > { %v1518_v18 = vshll.u32 %v7027_v54, 16  ;;  %v7131_v21 = vpack.c.b16 %v927_v0, %v926_v51  ;;  %v1524_v23 = vshrl.u32 %v7029_v55, 16  ;;  %v1527_v24 = vshll.u32 %v7029_v55, 16 }
  0x85   : > { %6034 = vmatmul.msk.bf16.vlgmr.msra.gmra.mxu3 %vm984_vm5, %v1912_v13  ;;  %v1163_v22 = vpack.c.b16 %v1161_v14, %v1160_v9  ;;  %v818_v25 = vsel %vm7032_vm4, %v816_v16, %v817_v11  ;;  %v932_v28 = vunpack.c.l.b16 %v815_v15  ;;  %v6023_v29 = vrot.slane %v1510_v45, 11 }
  0x86   : > { %v1517_v30 = vrot.slane %v1515_v17, 7  ;;  %v933_v54 = vunpack.c.l.b16 %v818_v25  ;;  %v1526_v31 = vrot.slane %v1524_v23, 7  ;;  %v801_v34 = vrot.slane %v7128_v20, 7  ;;  %v7184_v23 = vld [vmem:[#allocation2 + $0x64] sm:$0xf] }
  0x87   : > { %5981 = vmatmul.msk.bf16.vlgmr.msra.gmra.mxu1 %vm984_vm5, %v1163_v22  ;;  %v5950_v42 = vrot.slane %v7138_v33, 11  ;;  %v820_v47 = vrot.slane %v7141_v39, 7  ;;  %v1533_v51 = vshrl.u32 %v7079_v26, 16  ;;  %v819_v57 = vrot.slane %v817_v11, 4  ;;  %v7180_v22 = vld [vmem:[#allocation2 + $0x68] sm:$0xf] }
  0x88   : > { %v1520_v35 = vor.u32 %v1518_v18, %v1517_v30  ;;  %v1522_v38 = vrot.slane %v1517_v30, 4  ;;  %v1529_v40 = vor.u32 %v1527_v24, %v1526_v31  ;;  %v7145_v55 = vpack.c.b16 %v933_v54, %v932_v28  ;;  %v7186_v24 = vld [vmem:[#allocation2 + $0x6c] sm:$0xf] }
  0x89   : > { %v803_v46 = vrot.slane %v801_v34, 4  ;;  %v802_v53 = vsel %vm7032_vm4, %v5950_v42, %v801_v34  ;;  %v1542_v59 = vshrl.u32 %v7081_v27, 16  ;;  %v822_v61 = vrot.slane %v820_v47, 4 }
  0x8a   : > { %v1521_v41 = vsel %vm7091_vm8, %v6023_v29, %v1520_v35  ;;  %v1530_v45 = vsel %vm7091_vm8, %v1522_v38, %v1529_v40  ;;  %v823_v62 = vrot.slane %v7153_v48, 7  ;;  %v928_v0 = vunpack.c.l.b16 %v802_v53 }
  0x8b   : > { %5961 = vmatmul.msk.bf16.gmra.mxu0 %vm984_vm5, %v7131_v21  ;;  %v1875_v49 = vunpack.c.l.b16 %v1521_v41  ;;  %v1876_v50 = vunpack.c.l.b16 %v1530_v45  ;;  %v805_v60 = vsel %vm7032_vm4, %v803_v46, %v804_v8  ;;  %v1535_v1 = vrot.slane %v1533_v51, 7 }
  0x8c   : > { %v1536_v2 = vshll.u32 %v7079_v26, 16  ;;  %v929_v5 = vunpack.c.l.b16 %v805_v60  ;;  %v821_v9 = vsel %vm7032_vm4, %v819_v57, %v820_v47  ;;  %v1544_v10 = vrot.slane %v1542_v59, 7 }
  0x8d   : > { %v7166_v63 = vpack.c.b16 %v1876_v50, %v1875_v49  ;;  %v1545_v11 = vshll.u32 %v7081_v27, 16  ;;  %v824_v13 = vsel %vm7032_vm4, %v822_v61, %v823_v62  ;;  %v934_v8 = vunpack.c.l.b16 %v821_v9 }
  0x8e   : > { %v1531_v14 = vrot.slane %v1526_v31, 4  ;;  %v1538_v15 = vor.u32 %v1536_v2, %v1535_v1  ;;  %v7176_v16 = vpack.c.b16 %v929_v5, %v928_v0  ;;  %v935_v17 = vunpack.c.l.b16 %v824_v13 }
  0x8f   : > { %6004 = vmatmul.msk.bf16.gmra.mxu2 %vm984_vm5, %v7145_v55  ;;  %v1540_v26 = vrot.slane %v1535_v1, 4  ;;  %v1547_v18 = vor.u32 %v1545_v11, %v1544_v10  ;;  %v1564_v25 = vshrl.u32 %v7055_v4, 16  ;;  %v5952_v54 = vrot.slane %v7184_v23, 11 }
  0x90   : > { %v1539_v27 = vsel %vm7091_vm8, %v1531_v14, %v1538_v15  ;;  %v7191_v28 = vpack.c.b16 %v935_v17, %v934_v8  ;;  %v830_v31 = vrot.slane %v7186_v24, 7  ;;  %v1573_v38 = vshrl.u32 %v7058_v6, 16 }
  0x91   : > { %v1548_v29 = vsel %vm7091_vm8, %v1540_v26, %v1547_v18  ;;  %v1877_v30 = vunpack.c.l.b16 %v1539_v27  ;;  %v1566_v35 = vrot.slane %v1564_v25, 7  ;;  %v1582_v40 = vshrl.u32 %v7060_v7, 16  ;;  %v7235_v27 = vld [vmem:[#allocation2 + $0x74] sm:$0xf] }
  0x92   : > { %v1878_v34 = vunpack.c.l.b16 %v1548_v29  ;;  %v1555_v42 = vshrl.u32 %v7128_v20, 16  ;;  %v1576_v45 = vshll.u32 %v7058_v6, 16  ;;  %v1585_v46 = vshll.u32 %v7060_v7, 16 }
  0x93   : > { %v1571_v47 = vrot.slane %v1566_v35, 4  ;;  %v1575_v49 = vrot.slane %v1573_v38, 7  ;;  %v1584_v50 = vrot.slane %v1582_v40, 7  ;;  %v1550_v53 = vshrl.u32 %v7138_v33, 16 }
  0x94   : > { %v7208_v57 = vpack.c.b16 %v1878_v34, %v1877_v30  ;;  %v1557_v0 = vrot.slane %v1555_v42, 7  ;;  %v1558_v6 = vshll.u32 %v7128_v20, 16  ;;  %v1567_v7 = vshll.u32 %v7055_v4, 16  ;;  %v7224_v4 = vld [vmem:[#allocation2 + $0x70] sm:$0xf] }
  0x95   : > { %6035 = vmatmul.msk.bf16.gmra.mxu3 %vm984_vm5, %v7166_v63  ;;  %v1578_v59 = vor.u32 %v1576_v45, %v1575_v49  ;;  %v1580_v60 = vrot.slane %v1575_v49, 4  ;;  %v1587_v61 = vor.u32 %v1585_v46, %v1584_v50  ;;  %v6024_v11 = vrot.slane %v1550_v53, 11 }
  0x96   : > { %v1560_v13 = vor.u32 %v1558_v6, %v1557_v0  ;;  %v1562_v8 = vrot.slane %v1557_v0, 4  ;;  %v1569_v14 = vor.u32 %v1567_v7, %v1566_v35  ;;  %v833_v18 = vrot.slane %v7224_v4, 7  ;;  %v7267_v6 = vld [vmem:[#allocation2 + $0x7c] sm:$0xf]  ;;  %v7269_v7 = vld [vmem:[#allocation2 + $0x84] sm:$0xf] }
  0x97   : > { %5982 = vmatmul.msk.bf16.gmra.mxu1 %vm984_vm5, %v7072_v19  ;;  %v827_v19 = vrot.slane %v7180_v22, 7  ;;  %v1579_v1 = vsel %vm7091_vm8, %v1571_v47, %v1578_v59  ;;  %v1588_v2 = vsel %vm7091_vm8, %v1580_v60, %v1587_v61  ;;  %v832_v30 = vrot.slane %v830_v31, 4 }
  0x98   : > { %v1881_v33 = vunpack.c.l.b16 %v1579_v1  ;;  %v1882_v5 = vunpack.c.l.b16 %v1588_v2  ;;  %v1561_v17 = vsel %vm7091_vm8, %v6024_v11, %v1560_v13  ;;  %v1570_v26 = vsel %vm7091_vm8, %v1562_v8, %v1569_v14 }
  0x99   : > { %v829_v41 = vrot.slane %v827_v19, 4  ;;  %v828_v51 = vsel %vm7032_vm4, %v5952_v54, %v827_v19  ;;  %v1879_v25 = vunpack.c.l.b16 %v1561_v17  ;;  %v1880_v29 = vunpack.c.l.b16 %v1570_v26 }
  0x9a   : > { %v936_v9 = vunpack.c.l.b16 %v828_v51  ;;  %v7220_v20 = vpack.c.b16 %v1882_v5, %v1881_v33  ;;  %v1604_v19 = vshrl.u32 %v7111_v52, 16  ;;  %v1590_v54 = vshrl.u32 %v7098_v44, 16 }
  0x9b   : > { %5962 = vmatmul.msk.bf16.gmra.mxu0 %vm984_vm5, %v7176_v16  ;;  %v831_v62 = vsel %vm7032_vm4, %v829_v41, %v830_v31  ;;  %v1598_v34 = vshll.u32 %v7109_v58, 16  ;;  %v1607_v35 = vshll.u32 %v7111_v52, 16  ;;  %v835_v38 = vrot.slane %v833_v18, 4 }
  0x9c   : > { %v937_v10 = vunpack.c.l.b16 %v831_v62  ;;  %v836_v40 = vrot.slane %v7235_v27, 7  ;;  %v1606_v42 = vrot.slane %v1604_v19, 7  ;;  %v6025_v45 = vrot.slane %v1590_v54, 11  ;;  %v7261_v62 = vld [vmem:[#allocation2 + $0x80] sm:$0xf] }
  0x9d   : > { %v7245_v46 = vpack.c.b16 %v1880_v29, %v1879_v25  ;;  %v834_v31 = vsel %vm7032_vm4, %v832_v30, %v833_v18  ;;  %v840_v1 = vrot.slane %v7261_v62, 7  ;;  %v1613_v2 = vshrl.u32 %v7141_v39, 16 }
  0x9e   : > { %v7228_v15 = vpack.c.b16 %v937_v10, %v936_v9  ;;  %v1609_v50 = vor.u32 %v1607_v35, %v1606_v42  ;;  %v837_v44 = vsel %vm7032_vm4, %v835_v38, %v836_v40  ;;  %v938_v59 = vunpack.c.l.b16 %v834_v31  ;;  %v7294_v38 = vld [vmem:[#allocation2 + $0x88] sm:$0xf] }
  0x9f   : > { %6005 = vmatmul.msk.bf16.gmra.mxu2 %vm984_vm5, %v7191_v28  ;;  %v939_v60 = vunpack.c.l.b16 %v837_v44  ;;  %v1622_v33 = vshrl.u32 %v7153_v48, 16  ;;  %v5953_v5 = vrot.slane %v7267_v6, 11  ;;  %v843_v9 = vrot.slane %v7269_v7, 7 }
  0xa0   : > { %v1616_v10 = vshll.u32 %v7141_v39, 16  ;;  %v1625_v11 = vshll.u32 %v7153_v48, 16  ;;  %v842_v13 = vrot.slane %v840_v1, 4  ;;  %v1611_v8 = vrot.slane %v1606_v42, 4  ;;  %v7301_v42 = vld [vmem:[#allocation2 + $0x8c] sm:$0xf] }
  0xa1   : > { %v7265_v0 = vpack.c.b16 %v939_v60, %v938_v59  ;;  %v1615_v14 = vrot.slane %v1613_v2, 7  ;;  %v1624_v17 = vrot.slane %v1622_v33, 7  ;;  %v841_v29 = vsel %vm7032_vm4, %v5953_v5, %v840_v1  ;;  %v7323_v59 = vld [vmem:[#allocation2 + $0x9c] sm:$0xf] }
  0xa2   : > { %v940_v54 = vunpack.c.l.b16 %v841_v29  ;;  %v1635_v60 = vshrl.u32 %v7180_v22, 16  ;;  %v1644_v1 = vshrl.u32 %v7186_v24, 16  ;;  %v856_v33 = vrot.slane %v7323_v59, 7 }
  0xa3   : > { %v1618_v26 = vor.u32 %v1616_v10, %v1615_v14  ;;  %v1620_v18 = vrot.slane %v1615_v14, 4  ;;  %v1627_v25 = vor.u32 %v1625_v11, %v1624_v17  ;;  %v1630_v5 = vshrl.u32 %v7184_v23, 16 }
  0xa4   : > { %v1638_v10 = vshll.u32 %v7180_v22, 16  ;;  %v1646_v11 = vrot.slane %v1644_v1, 7  ;;  %v7342_v22 = vld [vmem:[#allocation2 + $0xa0] sm:$0xf]  ;;  %vm4154_vm9 = vcmask 11264  }
  0xa5   : > { %6036 = vmatmul.msk.bf16.gmra.mxu3 %vm984_vm5, %v7208_v57  ;;  %v1619_v19 = vsel %vm7091_vm8, %v1611_v8, %v1618_v26  ;;  %v1628_v39 = vsel %vm7091_vm8, %v1620_v18, %v1627_v25  ;;  %v6026_v17 = vrot.slane %v1630_v5, 11 }
  0xa6   : > { %v1885_v48 = vunpack.c.l.b16 %v1619_v19  ;;  %v1886_v30 = vunpack.c.l.b16 %v1628_v39  ;;  %v859_v39 = vrot.slane %v7342_v22, 7  ;;  %v1651_v1 = vrot.slane %v1646_v11, 4 }
  0xa7   : > { %5983 = vmatmul.msk.bf16.gmra.mxu1 %vm984_vm5, %v7131_v21  ;;  %v1595_v21 = vshrl.u32 %v7109_v58, 16 }
  0xa8   : > { %v7290_v35 = vpack.c.b16 %v1886_v30, %v1885_v48 }
  0xa9   : > { %v1597_v41 = vrot.slane %v1595_v21, 7  ;;  %v844_v21 = vsel %vm7032_vm4, %v842_v13, %v843_v9  ;;  %v1647_v13 = vshll.u32 %v7186_v24, 16 }
  0xab   : > { %5963 = vmatmul.msk.bf16.gmra.mxu0 %vm984_vm5, %v7087_v36  ;;  %v1600_v47 = vor.u32 %v1598_v34, %v1597_v41  ;;  %v1602_v49 = vrot.slane %v1597_v41, 4  ;;  %v941_v34 = vunpack.c.l.b16 %v844_v21  ;;  %v846_v41 = vrot.slane %v7294_v38, 7 }
  0xac   : > { %v1649_v25 = vor.u32 %v1647_v13, %v1646_v11 }
  0xad   : > { %v1601_v58 = vsel %vm7091_vm8, %v6025_v45, %v1600_v47  ;;  %v1610_v52 = vsel %vm7091_vm8, %v1602_v49, %v1609_v50  ;;  %v7298_v40 = vpack.c.b16 %v941_v34, %v940_v54  ;;  %v845_v45 = vrot.slane %v843_v9, 4  ;;  %v7353_v54 = vld [vmem:[#allocation2 + $0xa4] sm:$0xf] }
  0xae   : > { %v1883_v51 = vunpack.c.l.b16 %v1601_v58  ;;  %v1884_v53 = vunpack.c.l.b16 %v1610_v52  ;;  %v848_v47 = vrot.slane %v846_v41, 4  ;;  %v849_v49 = vrot.slane %v7301_v42, 7  ;;  %v7314_v58 = vld [vmem:[#allocation2 + $0x98] sm:$0xf] }
  0xaf   : > { %6006 = vmatmul.msk.bf16.gmra.mxu2 %vm984_vm5, %v7228_v15  ;;  %v1637_v9 = vrot.slane %v1635_v60, 7  ;;  %v1662_v34 = vshrl.u32 %v7235_v27, 16 }
  0xb0   : > { %v7257_v61 = vpack.c.b16 %v1884_v53, %v1883_v51  ;;  %v850_v50 = vsel %vm7032_vm4, %v848_v47, %v849_v49  ;;  %v853_v51 = vrot.slane %v7314_v58, 7  ;;  %v7321_v53 = vld [vmem:[#allocation2 + $0x94] sm:$0xf]  ;;  %v862_v47 = vrot.slane %v7353_v54, 7 }
  0xb1   : > { %v943_v44 = vunpack.c.l.b16 %v850_v50  ;;  %v1640_v26 = vor.u32 %v1638_v10, %v1637_v9  ;;  %v1642_v18 = vrot.slane %v1637_v9, 4  ;;  %v1656_v50 = vshll.u32 %v7224_v4, 16 }
  0xb2   : > { %v855_v2 = vrot.slane %v853_v51, 4 }
  0xb3   : > { %v1641_v24 = vsel %vm7091_vm8, %v6026_v17, %v1640_v26  ;;  %v1650_v21 = vsel %vm7091_vm8, %v1642_v18, %v1649_v25  ;;  %v7385_v26 = vld [vmem:[#allocation2 + $0xac] sm:$0xf]  ;;  %v1675_v18 = vshrl.u32 %v7261_v62, 16  ;;  %v1684_v25 = vshrl.u32 %v7269_v7, 16 }
  0xb4   : > { %v857_v14 = vsel %vm7032_vm4, %v855_v2, %v856_v33  ;;  %v1887_v48 = vunpack.c.l.b16 %v1641_v24  ;;  %v1888_v30 = vunpack.c.l.b16 %v1650_v21 }
  0xb5   : > { %6037 = vmatmul.msk.bf16.gmra.mxu3 %vm984_vm5, %v7245_v46  ;;  %v945_v29 = vunpack.c.l.b16 %v857_v14 }
  0xb6   : > { %v7360_v49 = vpack.c.b16 %v1888_v30, %v1887_v48  ;;  %v1670_v48 = vshrl.u32 %v7267_v6, 16 }
  0xb7   : > { %5984 = vmatmul.msk.bf16.gmra.mxu1 %vm984_vm5, %v7176_v16 }
  0xbb   : > { %5964 = vmatmul.msk.bf16.gmra.mxu0 %vm984_vm5, %v7145_v55 }
  0xbf   : > { %6007 = vmatmul.msk.bf16.gmra.mxu2 %vm984_vm5, %v7265_v0 }
  0xc5   : > { %6038 = vmatmul.msk.bf16.gmra.mxu3 %vm984_vm5, %v7220_v20 }
  0xc7   : > { %5985 = vmatmul.msk.bf16.gmra.mxu1 %vm984_vm5, %v7087_v36  ;;  %v847_v36 = vsel %vm7032_vm4, %v845_v45, %v846_v41  ;;  %v858_v41 = vrot.slane %v856_v33, 4  ;;  %v861_v45 = vrot.slane %v859_v39, 4 }
  0xc8   : > { %v942_v31 = vunpack.c.l.b16 %v847_v36 }
  0xc9   : > { %v863_v60 = vsel %vm7032_vm4, %v861_v45, %v862_v47  ;;  %v1687_v45 = vshll.u32 %v7269_v7, 16 }
  0xca   : > { %v7318_v52 = vpack.c.b16 %v943_v44, %v942_v31  ;;  %v1664_v31 = vrot.slane %v1662_v34, 7  ;;  %v1665_v44 = vshll.u32 %v7235_v27, 16  ;;  %v947_v9 = vunpack.c.l.b16 %v863_v60 }
  0xcb   : > { %5965 = vmatmul.msk.bf16.gmra.mxu0 %vm984_vm5, %v7191_v28  ;;  %v1678_v34 = vshll.u32 %v7261_v62, 16 }
  0xcc   : > { %v1667_v33 = vor.u32 %v1665_v44, %v1664_v31  ;;  %v6027_v31 = vrot.slane %v1670_v48, 11 }
  0xcf   : > { %6008 = vmatmul.msk.bf16.gmra.mxu2 %vm984_vm5, %v7298_v40 }
  0xd5   : > { %6039 = vmatmul.msk.bf16.gmra.mxu3 %vm984_vm5, %v7257_v61 }
  0xd7   : > { %5986 = vmatmul.msk.bf16.gmra.mxu1 %vm984_vm5, %v7145_v55  ;;  %v5954_v55 = vrot.slane %v7321_v53, 11 }
  0xd9   : > { %v854_v8 = vsel %vm7032_vm4, %v5954_v55, %v853_v51  ;;  %v860_v51 = vsel %vm7032_vm4, %v858_v41, %v859_v39  ;;  %v1686_v41 = vrot.slane %v1684_v25, 7  ;;  %v7423_v25 = vld [vmem:[#allocation2 + $0xbc] sm:$0xf] }
  0xda   : > { %v944_v23 = vunpack.c.l.b16 %v854_v8  ;;  %v946_v5 = vunpack.c.l.b16 %v860_v51 }
  0xdb   : > { %5966 = vmatmul.msk.bf16.gmra.mxu0 %vm984_vm5, %v7228_v15  ;;  %v1689_v51 = vor.u32 %v1687_v45, %v1686_v41 }
  0xdc   : > { %v7350_v19 = vpack.c.b16 %v945_v29, %v944_v23  ;;  %v7382_v11 = vpack.c.b16 %v947_v9, %v946_v5  ;;  %v5955_v29 = vrot.slane %v7385_v26, 11 }
  0xdf   : > { %6009 = vmatmul.msk.bf16.gmra.mxu2 %vm984_vm5, %v7318_v52 }
  0xe5   : > { %6040 = vmatmul.msk.bf16.gmra.mxu3 %vm984_vm5, %v7290_v35 }
  0xe7   : > { %5987 = vmatmul.msk.bf16.gmra.mxu1 %vm984_vm5, %v7191_v28  ;;  %v1653_v28 = vshrl.u32 %v7224_v4, 16  ;;  %v7374_v4 = vld [vmem:[#allocation2 + $0xb0] sm:$0xf] }
  0xe8   : > { %v866_v8 = vrot.slane %v7374_v4, 7 }
  0xe9   : > { %v1655_v36 = vrot.slane %v1653_v28, 7  ;;  %v1677_v28 = vrot.slane %v1675_v18, 7 }
  0xea   : > { %v868_v24 = vrot.slane %v866_v8, 4  ;;  %v867_v47 = vsel %vm7032_vm4, %v5955_v29, %v866_v8  ;;  %v1693_v29 = vshrl.u32 %v7294_v38, 16 }
  0xeb   : > { %5967 = vmatmul.msk.bf16.gmra.mxu0 %vm984_vm5, %v7265_v0  ;;  %v1658_v55 = vor.u32 %v1656_v50, %v1655_v36  ;;  %v1660_v2 = vrot.slane %v1655_v36, 4  ;;  %v1680_v44 = vor.u32 %v1678_v34, %v1677_v28  ;;  %v1682_v6 = vrot.slane %v1677_v28, 4 }
  0xec   : > { %v948_v60 = vunpack.c.l.b16 %v867_v47  ;;  %v875_v34 = vrot.slane %v7423_v25, 7 }
  0xed   : > { %v1659_v27 = vsel %vm7091_vm8, %v1651_v1, %v1658_v55  ;;  %v1668_v13 = vsel %vm7091_vm8, %v1660_v2, %v1667_v33  ;;  %v7410_v2 = vld [vmem:[#allocation2 + $0xb8] sm:$0xf]  ;;  %v1681_v5 = vsel %vm7091_vm8, %v6027_v31, %v1680_v44  ;;  %v1690_v9 = vsel %vm7091_vm8, %v1682_v6, %v1689_v51 }
  0xee   : > { %v1889_v14 = vunpack.c.l.b16 %v1659_v27  ;;  %v1890_v17 = vunpack.c.l.b16 %v1668_v13  ;;  %v872_v8 = vrot.slane %v7410_v2, 7  ;;  %v1892_v18 = vunpack.c.l.b16 %v1690_v9 }
  0xef   : > { %6010 = vmatmul.msk.bf16.gmra.mxu2 %vm984_vm5, %v7350_v19  ;;  %v1696_v31 = vshll.u32 %v7294_v38, 16  ;;  %v1705_v6 = vshll.u32 %v7301_v42, 16  ;;  %v7440_v38 = vld [vmem:[#allocation2 + $0xc8] sm:$0xf] }
  0xf0   : > { %v7397_v39 = vpack.c.b16 %v1890_v17, %v1889_v14  ;;  %v1891_v17 = vunpack.c.l.b16 %v1681_v5  ;;  %v874_v28 = vrot.slane %v872_v8, 4 }
  0xf2   : > { %v7430_v47 = vpack.c.b16 %v1892_v18, %v1891_v17  ;;  %v7449_v18 = vld [vmem:[#allocation2 + $0xc4] sm:$0xf] }
  0xf5   : > { %6041 = vmatmul.msk.bf16.gmra.mxu3 %vm984_vm5, %v7360_v49 }
  0xf7   : > { %5988 = vmatmul.msk.bf16.gmra.mxu1 %vm984_vm5, %v7228_v15  ;;  %v7387_v15 = vld [vmem:[#allocation2 + $0xb4] sm:$0xf] }
  0xf8   : > { %v7370_v10 = vpop.f32.mrf.mxu0  ;;  %v869_v21 = vrot.slane %v7387_v15, 7 }
  0xfa   : > { %v870_v36 = vsel %vm7032_vm4, %v868_v24, %v869_v21  ;;  %v1702_v24 = vshrl.u32 %v7301_v42, 16 }
  0xfb   : > { %5968 = vmatmul.msk.bf16.gmra.mxu0 %vm984_vm5, %v7298_v40  ;;  %v949_v1 = vunpack.c.l.b16 %v870_v36 }
  0xfc   : > { %v1704_v44 = vrot.slane %v1702_v24, 7 }
  0xfd   : > { %v7418_v13 = vpack.c.b16 %v949_v1, %v948_v60  ;;  %v876_v60 = vsel %vm7032_vm4, %v874_v28, %v875_v34  ;;  %v1691_v1 = vrot.slane %v1686_v41, 4  ;;  %v1742_v28 = vshrl.u32 %v7353_v54, 16 }
  0xfe   : > { %v951_v5 = vunpack.c.l.b16 %v876_v60  ;;  %v1724_v34 = vshrl.u32 %v7323_v59, 16 }
  0xff   : > { %6011 = vmatmul.msk.bf16.gmra.mxu2 %vm984_vm5, %v7382_v11 }
 0x100   : > { %v7393_v23 = vpop.f32.mrf.mxu0 }
 0x102   : > { %v1331_v30 = vpop.f32.mrf.mxu2 }
 0x104   : > { %v1187_v50 = vpop.f32.mrf.mxu1 }
 0x105   : > { %6042 = vmatmul.msk.bf16.gmra.mxu3 %vm984_vm5, %v7397_v39 }
 0x107   : > { %5989 = vmatmul.msk.bf16.gmra.mxu1 %vm984_vm5, %v7265_v0 }
 0x108   : > { %v1063_v62 = vpop.f32.mrf.mxu0  ;;  %v2008_v55 = vpop.f32.mrf.mxu3 }
 0x109   : > { %v1188_v7 = vadd.f32 %v1187_v50, %v1063_v62  ;;  %v1695_v50 = vrot.slane %v1693_v29, 7  ;;  %v879_v29 = vrot.slane %v7440_v38, 7 }
 0x10a   : > { %v1333_v33 = vpop.f32.mrf.mxu2 }
 0x10b   : > { %v1428_v27 = vadd.f32 %v1331_v30, %v1188_v7  ;;  %5969 = vmatmul.msk.bf16.gmra.mxu0 %vm984_vm5, %v7318_v52  ;;  %v871_v30 = vrot.slane %v869_v21, 4  ;;  %v1698_v62 = vor.u32 %v1696_v31, %v1695_v50  ;;  %v1700_v7 = vrot.slane %v1695_v50, 4 }
 0x10c   : > { %v1189_v14 = vpop.f32.mrf.mxu1 }
 0x10d   : > { %v7421_v0 = vadd.f32 %v2008_v55, %v1428_v27  ;;  %v873_v51 = vsel %vm7032_vm4, %v871_v30, %v872_v8  ;;  %v1707_v55 = vor.u32 %v1705_v6, %v1704_v44  ;;  %v1733_v8 = vshrl.u32 %v7342_v22, 16 }
 0x10e   : > { %v950_v33 = vunpack.c.l.b16 %v873_v51  ;;  %v1699_v17 = vsel %vm7091_vm8, %v1691_v1, %v1698_v62  ;;  %v1736_v30 = vshll.u32 %v7342_v22, 16  ;;  %v881_v51 = vrot.slane %v879_v29, 4 }
 0x10f   : > { %6012 = vmatmul.msk.bf16.gmra.mxu2 %vm984_vm5, %v7418_v13  ;;  %v1708_v41 = vsel %vm7091_vm8, %v1700_v7, %v1707_v55  ;;  %v1893_v31 = vunpack.c.l.b16 %v1699_v17  ;;  %v1735_v6 = vrot.slane %v1733_v8, 7  ;;  %v1744_v22 = vrot.slane %v1742_v28, 7 }
 0x110   : > { %v1065_v48 = vpop.f32.mrf.mxu0  ;;  %v2010_v45 = vpop.f32.mrf.mxu3  ;;  %v1894_v44 = vunpack.c.l.b16 %v1708_v41  ;;  %v1745_v1 = vshll.u32 %v7353_v54, 16  ;;  %v1726_v7 = vrot.slane %v1724_v34, 7  ;;  %v1718_v54 = vshll.u32 %v7314_v58, 16 }
 0x111   : > { %v7456_v48 = vld [vmem:[#allocation2 + $0xcc] sm:$0xf]  ;;  %v1727_v34 = vshll.u32 %v7323_v59, 16 }
 0x112   : > { %v1336_v36 = vpop.f32.mrf.mxu2  ;;  %v882_v60 = vrot.slane %v7456_v48, 7  ;;  %v1731_v41 = vrot.slane %v1726_v7, 4 }
 0x114   : > { %v1192_v21 = vpop.f32.mrf.mxu1  ;;  %v883_v8 = vsel %vm7032_vm4, %v881_v51, %v882_v60 }
 0x115   : > { %6043 = vmatmul.msk.bf16.gmra.mxu3 %vm984_vm5, %v7430_v47 }
 0x117   : > { %5990 = vmatmul.msk.bf16.gmra.mxu1 %vm984_vm5, %v7298_v40  ;;  %v7454_v40 = vpack.c.b16 %v951_v5, %v950_v33  ;;  %v7469_v5 = vpack.c.b16 %v1894_v44, %v1893_v31  ;;  %v1747_v44 = vor.u32 %v1745_v1, %v1744_v22 }
 0x118   : > { %v1068_v9 = vpop.f32.mrf.mxu0  ;;  %v2013_v27 = vpop.f32.mrf.mxu3 }
 0x119   : > { %v1193_v42 = vadd.f32 %v1192_v21, %v1068_v9  ;;  %v1715_v21 = vshrl.u32 %v7314_v58, 16 }
 0x11a   : > { %v1338_v14 = vpop.f32.mrf.mxu2 }
 0x11b   : > { %v1430_v24 = vadd.f32 %v1336_v36, %v1193_v42  ;;  %5970 = vmatmul.msk.bf16.gmra.mxu0 %vm984_vm5, %v7350_v19  ;;  %v5956_v36 = vrot.slane %v7449_v18, 11  ;;  %v1710_v42 = vshrl.u32 %v7321_v53, 16  ;;  %v1717_v17 = vrot.slane %v1715_v21, 7 }
 0x11c   : > { %v1194_v50 = vpop.f32.mrf.mxu1  ;;  %v953_v21 = vunpack.c.l.b16 %v883_v8 }
 0x11d   : > { %v7461_v45 = vadd.f32 %v2013_v27, %v1430_v24  ;;  %v880_v9 = vsel %vm7032_vm4, %v5956_v36, %v879_v29  ;;  %v1738_v24 = vor.u32 %v1736_v30, %v1735_v6  ;;  %v6028_v30 = vrot.slane %v1710_v42, 11 }
 0x11e   : > { %v952_v51 = vunpack.c.l.b16 %v880_v9  ;;  %v1722_v59 = vrot.slane %v1717_v17, 4  ;;  %v1755_v9 = vshrl.u32 %v7374_v4, 16  ;;  %v1764_v42 = vshrl.u32 %v7387_v15, 16 }
 0x11f   : > { %6013 = vmatmul.msk.bf16.gmra.mxu2 %vm984_vm5, %v7454_v40  ;;  %v1739_v31 = vsel %vm7091_vm8, %v1731_v41, %v1738_v24 }
 0x120   : > { %v1070_v62 = vpop.f32.mrf.mxu0  ;;  %v2015_v33 = vpop.f32.mrf.mxu3  ;;  %v1897_v36 = vunpack.c.l.b16 %v1739_v31  ;;  %v7506_v31 = vld [vmem:[#allocation2 + $0xd4] sm:$0xf] }
 0x121   : > { %v1195_v55 = vadd.f32 %v1194_v50, %v1070_v62  ;;  %v1740_v50 = vrot.slane %v1735_v6, 4  ;;  %v1729_v6 = vor.u32 %v1727_v34, %v1726_v7  ;;  %v7496_v7 = vpack.c.b16 %v953_v21, %v952_v51 }
 0x122   : > { %v1341_v27 = vpop.f32.mrf.mxu2  ;;  %v1766_v51 = vrot.slane %v1764_v42, 7  ;;  %v1767_v21 = vshll.u32 %v7387_v15, 16 }
 0x123   : > { %v1431_v28 = vadd.f32 %v1338_v14, %v1195_v55  ;;  %v1748_v58 = vsel %vm7091_vm8, %v1740_v50, %v1747_v44  ;;  %v1720_v14 = vor.u32 %v1718_v54, %v1717_v17  ;;  %v1730_v17 = vsel %vm7091_vm8, %v1722_v59, %v1729_v6 }
 0x124   : > { %v1197_v53 = vpop.f32.mrf.mxu1  ;;  %v1898_v62 = vunpack.c.l.b16 %v1748_v58  ;;  %v1758_v44 = vshll.u32 %v7374_v4, 16  ;;  %v884_v58 = vrot.slane %v882_v60, 4  ;;  %v888_v59 = vrot.slane %v7506_v31, 7 }
 0x125   : > { %v7480_v29 = vadd.f32 %v2015_v33, %v1431_v28  ;;  %6044 = vmatmul.msk.bf16.gmra.mxu3 %vm984_vm5, %v7469_v5  ;;  %v7488_v33 = vld [vmem:[#allocation2 + $0xd0] sm:$0xf]  ;;  %v1750_v28 = vshrl.u32 %v7385_v26, 16 }
 0x126   : > { %v7490_v41 = vpack.c.b16 %v1898_v62, %v1897_v36  ;;  %v885_v54 = vrot.slane %v7488_v33, 7  ;;  %v1896_v36 = vunpack.c.l.b16 %v1730_v17 }
 0x127   : > { %5991 = vmatmul.msk.bf16.gmra.mxu1 %vm984_vm5, %v7318_v52  ;;  %v1721_v52 = vsel %vm7091_vm8, %v6028_v30, %v1720_v14  ;;  %v6029_v30 = vrot.slane %v1750_v28, 11 }
 0x128   : > { %v1073_v55 = vpop.f32.mrf.mxu0  ;;  %v2018_v1 = vpop.f32.mrf.mxu3  ;;  %v887_v14 = vrot.slane %v885_v54, 4 }
 0x129   : > { %v1198_v22 = vadd.f32 %v1197_v53, %v1073_v55  ;;  %v1895_v53 = vunpack.c.l.b16 %v1721_v52 }
 0x12a   : > { %v1343_v8 = vpop.f32.mrf.mxu2  ;;  %v889_v15 = vsel %vm7032_vm4, %v887_v14, %v888_v59 }
 0x12b   : > { %v1432_v24 = vadd.f32 %v1341_v27, %v1198_v22  ;;  %5971 = vmatmul.msk.bf16.gmra.mxu0 %vm984_vm5, %v7382_v11  ;;  %v1757_v27 = vrot.slane %v1755_v9, 7  ;;  %v7513_v62 = vpack.c.b16 %v1896_v36, %v1895_v53  ;;  %v886_v9 = vsel %vm7032_vm4, %v884_v58, %v885_v54  ;;  %v7529_v53 = vld [vmem:[#allocation2 + $0xe0] sm:$0xf] }
 0x12c   : > { %v1199_v50 = vpop.f32.mrf.mxu1  ;;  %v954_v17 = vunpack.c.l.b16 %v886_v9  ;;  %v955_v28 = vunpack.c.l.b16 %v889_v15  ;;  %v1773_v36 = vshrl.u32 %v7410_v2, 16  ;;  %v1782_v58 = vshrl.u32 %v7423_v25, 16 }
 0x12d   : > { %v7504_v34 = vadd.f32 %v2018_v1, %v1432_v24  ;;  %v1760_v22 = vor.u32 %v1758_v44, %v1757_v27  ;;  %v1762_v4 = vrot.slane %v1757_v27, 4  ;;  %v1769_v1 = vor.u32 %v1767_v21, %v1766_v51 }
 0x12e   : > { %v892_v14 = vrot.slane %v7529_v53, 7  ;;  %v1784_v9 = vrot.slane %v1782_v58, 7 }
 0x12f   : > { %6014 = vmatmul.msk.bf16.gmra.mxu2 %vm984_vm5, %v7496_v7  ;;  %v1761_v42 = vsel %vm7091_vm8, %v6029_v30, %v1760_v22  ;;  %v1770_v8 = vsel %vm7091_vm8, %v1762_v4, %v1769_v1  ;;  %v7542_v22 = vld [vmem:[#allocation2 + $0xe4] sm:$0xf]  ;;  %v1775_v4 = vrot.slane %v1773_v36, 7  ;;  %v1776_v1 = vshll.u32 %v7410_v2, 16 }
 0x130   : > { %v1075_v26 = vpop.f32.mrf.mxu0  ;;  %v2020_v6 = vpop.f32.mrf.mxu3  ;;  %v1899_v24 = vunpack.c.l.b16 %v1761_v42  ;;  %v1900_v52 = vunpack.c.l.b16 %v1770_v8  ;;  %v895_v8 = vrot.slane %v7542_v22, 7 }
 0x131   : > { %v7534_v26 = vpack.c.b16 %v955_v28, %v954_v17  ;;  %v7540_v6 = vld [vmem:[#allocation2 + $0xdc] sm:$0xf]  ;;  %v1771_v28 = vrot.slane %v1766_v51, 4 }
 0x132   : > { %v1346_v55 = vpop.f32.mrf.mxu2  ;;  %v7527_v54 = vpack.c.b16 %v1900_v52, %v1899_v24  ;;  %v5957_v42 = vrot.slane %v7540_v6, 11 }
 0x134   : > { %v1202_v60 = vpop.f32.mrf.mxu1  ;;  %v893_v2 = vsel %vm7032_vm4, %v5957_v42, %v892_v14 }
 0x135   : > { %6045 = vmatmul.msk.bf16.gmra.mxu3 %vm984_vm5, %v7513_v62 }
 0x137   : > { %5992 = vmatmul.msk.bf16.gmra.mxu1 %vm984_vm5, %v7350_v19 }
 0x138   : > { %v1078_v50 = vpop.f32.mrf.mxu0  ;;  %v2023_v44 = vpop.f32.mrf.mxu3 }
 0x139   : > { %v1203_v27 = vadd.f32 %v1202_v60, %v1078_v50  ;;  %v894_v60 = vrot.slane %v892_v14, 4  ;;  %v1778_v50 = vor.u32 %v1776_v1, %v1775_v4 }
 0x13a   : > { %v1348_v21 = vpop.f32.mrf.mxu2 }
 0x13b   : > { %v1434_v30 = vadd.f32 %v1346_v55, %v1203_v27  ;;  %5972 = vmatmul.msk.bf16.gmra.mxu0 %vm984_vm5, %v7418_v13  ;;  %v1785_v55 = vshll.u32 %v7423_v25, 16  ;;  %v896_v25 = vsel %vm7032_vm4, %v894_v60, %v895_v8  ;;  %v1779_v36 = vsel %vm7091_vm8, %v1771_v28, %v1778_v50 }
 0x13c   : > { %v1204_v59 = vpop.f32.mrf.mxu1  ;;  %v1795_v60 = vshrl.u32 %v7440_v38, 16 }
 0x13d   : > { %v7538_v19 = vadd.f32 %v2023_v44, %v1434_v30  ;;  %v1780_v44 = vrot.slane %v1775_v4, 4  ;;  %v1787_v30 = vor.u32 %v1785_v55, %v1784_v9  ;;  %v957_v4 = vunpack.c.l.b16 %v896_v25  ;;  %v7564_v55 = vld [vmem:[#allocation2 + $0xe8] sm:$0xf] }
 0x13e   : > { %v1797_v25 = vrot.slane %v1795_v60, 7 }
 0x13f   : > { %6015 = vmatmul.msk.bf16.gmra.mxu2 %vm984_vm5, %v7534_v26  ;;  %v1788_v51 = vsel %vm7091_vm8, %v1780_v44, %v1787_v30 }
 0x140   : > { %v1080_v15 = vpop.f32.mrf.mxu0  ;;  %v2025_v52 = vpop.f32.mrf.mxu3  ;;  %v1902_v14 = vunpack.c.l.b16 %v1788_v51 }
 0x141   : > { %v1205_v24 = vadd.f32 %v1204_v59, %v1080_v15  ;;  %v1901_v59 = vunpack.c.l.b16 %v1779_v36  ;;  %v1798_v36 = vshll.u32 %v7440_v38, 16 }
 0x142   : > { %v1351_v17 = vpop.f32.mrf.mxu2 }
 0x143   : > { %v1435_v27 = vadd.f32 %v1348_v21, %v1205_v24  ;;  %v956_v21 = vunpack.c.l.b16 %v893_v2  ;;  %v7566_v9 = vpack.c.b16 %v1902_v14, %v1901_v59  ;;  %v7578_v2 = vld [vmem:[#allocation2 + $0xec] sm:$0xf] }
 0x144   : > { %v1207_v43 = vpop.f32.mrf.mxu1 }
 0x145   : > { %v7556_v58 = vadd.f32 %v2025_v52, %v1435_v27  ;;  %6046 = vmatmul.msk.bf16.gmra.mxu3 %vm984_vm5, %v7490_v41  ;;  %v1804_v52 = vshrl.u32 %v7456_v48, 16  ;;  %v7572_v50 = vpack.c.b16 %v957_v4, %v956_v21  ;;  %v1790_v27 = vshrl.u32 %v7449_v18, 16 }
 0x146   : > { %v897_v18 = vrot.slane %v895_v8, 4  ;;  %v901_v4 = vrot.slane %v7578_v2, 7 }
 0x147   : > { %5993 = vmatmul.msk.bf16.gmra.mxu1 %vm984_vm5, %v7382_v11  ;;  %v7581_v30 = vrot.slane %v1804_v52, 7  ;;  %v6030_v59 = vrot.slane %v1790_v27, 11 }
 0x148   : > { %v1083_v1 = vpop.f32.mrf.mxu0  ;;  %v2028_v42 = vpop.f32.mrf.mxu3 }
 0x149   : > { %v1208_v15 = vadd.f32 %v1207_v43, %v1083_v1  ;;  %v898_v43 = vrot.slane %v7564_v55, 7 }
 0x14a   : > { %v1353_v24 = vpop.f32.mrf.mxu2 }
 0x14b   : > { %v1436_v28 = vadd.f32 %v1351_v17, %v1208_v15  ;;  %5973 = vmatmul.msk.bf16.gmra.mxu0 %vm984_vm5, %v7454_v40  ;;  %v1807_v17 = vshll.u32 %v7456_v48, 16  ;;  %v900_v21 = vrot.slane %v898_v43, 4  ;;  %v1800_v15 = vor.u32 %v1798_v36, %v1797_v25 }
 0x14c   : > { %v1209_v44 = vpop.f32.mrf.mxu1  ;;  %v899_v38 = vsel %vm7032_vm4, %v897_v18, %v898_v43 }
 0x14d   : > { %v7576_v11 = vadd.f32 %v2028_v42, %v1436_v28  ;;  %v1802_v42 = vrot.slane %v1797_v25, 4  ;;  %v1809_v60 = vor.u32 %v1807_v17, %v7581_v30  ;;  %v902_v48 = vsel %vm7032_vm4, %v900_v21, %v901_v4 }
 0x14e   : > { %v1801_v24 = vsel %vm7091_vm8, %v6030_v59, %v1800_v15  ;;  %v958_v44 = vunpack.c.l.b16 %v899_v38  ;;  %v959_v25 = vunpack.c.l.b16 %v902_v48  ;;  %v7602_v59 = vld [vmem:[#allocation2 + $0xf8] sm:$0xf] }
 0x14f   : > { %6016 = vmatmul.msk.bf16.gmra.mxu2 %vm984_vm5, %v7572_v50  ;;  %v1810_v8 = vsel %vm7091_vm8, %v1802_v42, %v1809_v60  ;;  %v1903_v28 = vunpack.c.l.b16 %v1801_v24  ;;  %v7611_v60 = vld [vmem:[#allocation2 + $0xf4] sm:$0xf] }
 0x150   : > { %v1085_v51 = vpop.f32.mrf.mxu0  ;;  %v2030_v14 = vpop.f32.mrf.mxu3  ;;  %v1904_v27 = vunpack.c.l.b16 %v1810_v8  ;;  %v7606_v4 = vpack.c.b16 %v959_v25, %v958_v44 }
 0x151   : > { %v911_v14 = vrot.slane %v7602_v59, 7 }
 0x152   : > { %v1356_v1 = vpop.f32.mrf.mxu2  ;;  %v7600_v43 = vpack.c.b16 %v1904_v27, %v1903_v28 }
 0x153   : > { %v913_v48 = vrot.slane %v911_v14, 4 }
 0x154   : > { %v1212_v52 = vpop.f32.mrf.mxu1 }
 0x155   : > { %6047 = vmatmul.msk.bf16.gmra.mxu3 %vm984_vm5, %v7527_v54 }
 0x157   : > { %5994 = vmatmul.msk.bf16.gmra.mxu1 %vm984_vm5, %v7418_v13  ;;  %v7613_v13 = vld [vmem:[#allocation2 + $0xfc] sm:$0xf] }
 0x158   : > { %v1088_v36 = vpop.f32.mrf.mxu0  ;;  %v2033_v51 = vpop.f32.mrf.mxu3  ;;  %v914_v24 = vrot.slane %v7613_v13, 7 }
 0x159   : > { %v1213_v17 = vadd.f32 %v1212_v52, %v1088_v36 }
 0x15a   : > { %v1358_v18 = vpop.f32.mrf.mxu2  ;;  %v915_v25 = vsel %vm7032_vm4, %v913_v48, %v914_v24 }
 0x15b   : > { %v1438_v21 = vadd.f32 %v1356_v1, %v1213_v17  ;;  %5974 = vmatmul.msk.bf16.gmra.mxu0 %vm984_vm5, %v7496_v7  ;;  %v5958_v1 = vrot.slane %v7611_v60, 11 }
 0x15c   : > { %v1214_v42 = vpop.f32.mrf.mxu1 }
 0x15d   : > { %v7609_v15 = vadd.f32 %v2033_v51, %v1438_v21  ;;  %v912_v44 = vsel %vm7032_vm4, %v5958_v1, %v911_v14  ;;  %v961_v21 = vunpack.c.l.b16 %v915_v25  ;;  %v916_v25 = vrot.slane %v914_v24, 4 }
 0x15e   : > { %v960_v51 = vunpack.c.l.b16 %v912_v44  ;;  %v7638_v44 = vld [vmem:[#allocation2 + $0x104] sm:$0xf]  ;;  %v1811_v24 = vrot.slane %v7581_v30, 4 }
 0x15f   : > { %9284 = vst [vmem:[#allocation4_spill] sm:$0xff] %v7609_v15  ;;  %6017 = vmatmul.msk.bf16.gmra.mxu2 %vm984_vm5, %v7606_v4 }
 0x160   : > { %v1090_v38 = vpop.f32.mrf.mxu0  ;;  %v2035_v8 = vpop.f32.mrf.mxu3  ;;  %v7633_v48 = vpack.c.b16 %v961_v21, %v960_v51  ;;  %9288 = vst [vmem:[#allocation8_spill] sm:$0xff] %v7638_v44  ;;  %v920_v51 = vrot.slane %v7638_v44, 7 }
 0x161   : > { %v1215_v52 = vadd.f32 %v1214_v42, %v1090_v38  ;;  %v7629_v38 = vld [vmem:[#allocation2 + $0x100] sm:$0xf] }
 0x162   : > { %v1361_v28 = vpop.f32.mrf.mxu2  ;;  %9286 = vst [vmem:[#allocation6_spill] sm:$0xff] %v7629_v38 }
 0x163   : > { %v1439_v27 = vadd.f32 %v1358_v18, %v1215_v52  ;;  %v917_v52 = vrot.slane %v7629_v38, 7 }
 0x164   : > { %v1217_v17 = vpop.f32.mrf.mxu1 }
 0x165   : > { %v7623_v36 = vadd.f32 %v2035_v8, %v1439_v27  ;;  %6048 = vmatmul.msk.bf16.gmra.mxu3 %vm984_vm5, %v7566_v9 }
 0x167   : > { %9285 = vst [vmem:[#allocation5_spill] sm:$0xff] %v7623_v36  ;;  %5995 = vmatmul.msk.bf16.gmra.mxu1 %vm984_vm5, %v7454_v40  ;;  %v1813_v40 = vshrl.u32 %v7488_v33, 16 }
 0x168   : > { %v1093_v15 = vpop.f32.mrf.mxu0  ;;  %v2038_v18 = vpop.f32.mrf.mxu3 }
 0x169   : > { %v1218_v42 = vadd.f32 %v1217_v17, %v1093_v15  ;;  %v1822_v15 = vshrl.u32 %v7506_v31, 16  ;;  %v919_v17 = vrot.slane %v917_v52, 4 }
 0x16a   : > { %v1363_v14 = vpop.f32.mrf.mxu2 }
 0x16b   : > { %v1440_v1 = vadd.f32 %v1361_v28, %v1218_v42  ;;  %5975 = vmatmul.msk.bf16.gmra.mxu0 %vm984_vm5, %v7534_v26  ;;  %v1815_v14 = vrot.slane %v1813_v40, 7  ;;  %v921_v38 = vsel %vm7032_vm4, %v919_v17, %v920_v51 }
 0x16c   : > { %v1219_v27 = vpop.f32.mrf.mxu1  ;;  %v963_v40 = vunpack.c.l.b16 %v921_v38 }
 0x16d   : > { %v7636_v8 = vadd.f32 %v2038_v18, %v1440_v1  ;;  %v1816_v18 = vshll.u32 %v7488_v33, 16  ;;  %v1824_v1 = vrot.slane %v1822_v15, 7  ;;  %v1825_v27 = vshll.u32 %v7506_v31, 16 }
 0x16f   : > { %9287 = vst [vmem:[#allocation7_spill] sm:$0xff] %v7636_v8  ;;  %6018 = vmatmul.msk.bf16.gmra.mxu2 %vm984_vm5, %v7633_v48  ;;  %v918_v8 = vsel %vm7032_vm4, %v916_v25, %v917_v52  ;;  %v1818_v44 = vor.u32 %v1816_v18, %v1815_v14  ;;  %v1827_v33 = vor.u32 %v1825_v27, %v1824_v1  ;;  %v7656_v25 = vld [vmem:[#allocation2 + $0x110] sm:$0xf] }
 0x170   : > { %v1095_v28 = vpop.f32.mrf.mxu0  ;;  %v2040_v21 = vpop.f32.mrf.mxu3  ;;  %9289 = vst [vmem:[#allocation9_spill] sm:$0xff] %v7656_v25 }
 0x171   : > { %v1820_v28 = vrot.slane %v1815_v14, 4  ;;  %v962_v21 = vunpack.c.l.b16 %v918_v8  ;;  %v1819_v38 = vsel %vm7091_vm8, %v1811_v24, %v1818_v44  ;;  %v7668_v14 = vld [vmem:[#allocation2 + $0x10c] sm:$0xf]  ;;  %v1844_v24 = vshrl.u32 %v7542_v22, 16 }
 0x172   : > { %v1366_v42 = vpop.f32.mrf.mxu2  ;;  %9291 = vst [vmem:[#allocation11_spill] sm:$0xff] %v7668_v14  ;;  %v1905_v1 = vunpack.c.l.b16 %v1819_v38  ;;  %v6000_v44 = vrot.slane %v7668_v14, 11 }
 0x173   : > { %v7662_v30 = vpack.c.b16 %v963_v40, %v962_v21  ;;  %v1828_v8 = vsel %vm7091_vm8, %v1820_v28, %v1827_v33  ;;  %v1835_v21 = vshrl.u32 %v7529_v53, 16 }
 0x174   : > { %v1222_v36 = vpop.f32.mrf.mxu1  ;;  %v1906_v27 = vunpack.c.l.b16 %v1828_v8 }
 0x175   : > { %6049 = vmatmul.msk.bf16.gmra.mxu3 %vm984_vm5, %v7600_v43  ;;  %v1837_v38 = vrot.slane %v1835_v21, 7 }
 0x177   : > { %5996 = vmatmul.msk.bf16.gmra.mxu1 %vm984_vm5, %v7496_v7  ;;  %v1289_v7 = vrot.slane %v7656_v25, 7  ;;  %v1842_v21 = vrot.slane %v1837_v38, 4 }
 0x178   : > { %v1098_v15 = vpop.f32.mrf.mxu0  ;;  %v2043_v52 = vpop.f32.mrf.mxu3 }
 0x179   : > { %v1223_v31 = vadd.f32 %v1222_v36, %v1098_v15  ;;  %v1291_v40 = vrot.slane %v1289_v7, 4  ;;  %v1290_v8 = vsel %vm7032_vm4, %v6000_v44, %v1289_v7 }
 0x17a   : > { %v7658_v17 = vpop.f32.mrf.mxu2 }
 0x17b   : > { %9290 = vst [vmem:[#allocation10_spill] sm:$0xff] %v7658_v17  ;;  %v1442_v51 = vadd.f32 %v1366_v42, %v1223_v31  ;;  %5976 = vmatmul.msk.bf16.gmra.mxu0 %vm984_vm5, %v7572_v50  ;;  %v7675_v42 = vld [vmem:[#allocation2 + $0x114] sm:$0xf]  ;;  %v7687_v31 = vpack.c.b16 %v1906_v27, %v1905_v1  ;;  %v1838_v17 = vshll.u32 %v7529_v53, 16  ;;  %v1302_v1 = vunpack.c.l.b16 %v1290_v8 }
 0x17c   : > { %v7673_v18 = vpop.f32.mrf.mxu1  ;;  %9294 = vst [vmem:[#allocation14_spill] sm:$0xff] %v7675_v42  ;;  %v1292_v33 = vrot.slane %v7675_v42, 7 }
 0x17d   : > { %v7671_v36 = vadd.f32 %v2043_v52, %v1442_v51  ;;  %9293 = vst [vmem:[#allocation13_spill] sm:$0xff] %v7673_v18  ;;  %v1830_v51 = vshrl.u32 %v7540_v6, 16  ;;  %v1847_v18 = vshll.u32 %v7542_v22, 16  ;;  %v1840_v6 = vor.u32 %v1838_v17, %v1837_v38  ;;  %v7700_v22 = vld [vmem:[#allocation2 + $0x118] sm:$0xf] }
 0x17f   : > { %9292 = vst [vmem:[#allocation12_spill] sm:$0xff] %v7671_v36  ;;  %6019 = vmatmul.msk.bf16.gmra.mxu2 %vm984_vm5, %v7662_v30  ;;  %v1846_v36 = vrot.slane %v1844_v24, 7  ;;  %v6031_v27 = vrot.slane %v1830_v51, 11 }
 0x180   : > { %v7682_v28 = vpop.f32.mrf.mxu0  ;;  %v7685_v15 = vpop.f32.mrf.mxu3 }
 0x181   : > { %9295 = vst [vmem:[#allocation15_spill] sm:$0xff] %v7682_v28  ;;  %v1293_v28 = vsel %vm7032_vm4, %v1291_v40, %v1292_v33  ;;  %v1849_v42 = vor.u32 %v1847_v18, %v1846_v36  ;;  %v1295_v18 = vrot.slane %v7700_v22, 7 }
 0x182   : > { %9296 = vst [vmem:[#allocation16_spill] sm:$0xff] %v7685_v15  ;;  %v1371_v52 = vpop.f32.mrf.mxu2  ;;  %v1303_v15 = vunpack.c.l.b16 %v1293_v28  ;;  %v1841_v28 = vsel %vm7091_vm8, %v6031_v27, %v1840_v6 }
 0x183   : > { %v1850_v17 = vsel %vm7091_vm8, %v1842_v21, %v1849_v42  ;;  %v1297_v27 = vrot.slane %v1295_v18, 4 }
 0x184   : > { %v1227_v14 = vpop.f32.mrf.mxu1  ;;  %v1306_v40 = vpack.c.b16 %v1303_v15, %v1302_v1  ;;  %v1908_v38 = vunpack.c.l.b16 %v1850_v17  ;;  %v1862_v15 = vshrl.u32 %v7578_v2, 16  ;;  %v1294_v1 = vrot.slane %v1292_v33, 4 }
 0x185   : > { %6050 = vmatmul.msk.bf16.gmra.mxu3 %vm984_vm5, %v7687_v31 }
 0x187   : > { %5997 = vmatmul.msk.bf16.gmra.mxu1 %vm984_vm5, %v7534_v26 }
 0x188   : > { %v1103_v25 = vpop.f32.mrf.mxu0  ;;  %v2048_v7 = vpop.f32.mrf.mxu3 }
 0x189   : > { %v1228_v53 = vadd.f32 %v1227_v14, %v1103_v25  ;;  %v7711_v25 = vld [vmem:[#allocation2 + $0x11c] sm:$0xf]  ;;  %v1907_v14 = vunpack.c.l.b16 %v1841_v28  ;;  %v1865_v28 = vshll.u32 %v7578_v2, 16 }
 0x18a   : > { %v1373_v44 = vpop.f32.mrf.mxu2  ;;  %v1298_v42 = vrot.slane %v7711_v25, 7 }
 0x18b   : > { %v1444_v24 = vadd.f32 %v1371_v52, %v1228_v53  ;;  %5977 = vmatmul.msk.bf16.gmra.mxu0 %vm984_vm5, %v7606_v4  ;;  %v1853_v52 = vshrl.u32 %v7564_v55, 16  ;;  %v7717_v21 = vpack.c.b16 %v1908_v38, %v1907_v14  ;;  %v1856_v44 = vshll.u32 %v7564_v55, 16 }
 0x18c   : > { %v1229_v26 = vpop.f32.mrf.mxu1  ;;  %v1299_v17 = vsel %vm7032_vm4, %v1297_v27, %v1298_v42 }
 0x18d   : > { %v7709_v51 = vadd.f32 %v2048_v7, %v1444_v24  ;;  %v1855_v7 = vrot.slane %v1853_v52, 7  ;;  %v1864_v24 = vrot.slane %v1862_v15, 7  ;;  %v1851_v26 = vrot.slane %v1846_v36, 4 }
 0x18f   : > { %6020 = vmatmul.msk.bf16.gmra.mxu2 %vm984_vm5, %v1306_v40  ;;  %v1296_v40 = vsel %vm7032_vm4, %v1294_v1, %v1295_v18  ;;  %v1860_v14 = vrot.slane %v1855_v7, 4  ;;  %v1858_v52 = vor.u32 %v1856_v44, %v1855_v7 }
 0x190   : > { %v1105_v8 = vpop.f32.mrf.mxu0  ;;  %v2050_v6 = vpop.f32.mrf.mxu3  ;;  %v1304_v38 = vunpack.c.l.b16 %v1296_v40 }
 0x191   : > { %v1305_v8 = vunpack.c.l.b16 %v1299_v17  ;;  %v1867_v6 = vor.u32 %v1865_v28, %v1864_v24  ;;  %v1859_v36 = vsel %vm7091_vm8, %v1851_v26, %v1858_v52  ;;  %v7748_v17 = vld [vmem:[#allocation2 + $0x8] sm:$0xf]  ;;  %v660_v52 = vld [vmem:[#allocation2 + $0x4] sm:$0xf] }
 0x192   : > { %v1376_v53 = vpop.f32.mrf.mxu2 }
 0x193   : > { %v1307_v27 = vpack.c.b16 %v1305_v8, %v1304_v38  ;;  %v1868_v42 = vsel %vm7091_vm8, %v1860_v14, %v1867_v6  ;;  %v775_v14 = vrot.slane %v7748_v17, 7 }
 0x194   : > { %v1232_v33 = vpop.f32.mrf.mxu1  ;;  %v1910_v24 = vunpack.c.l.b16 %v1868_v42 }
 0x195   : > { %6051 = vmatmul.msk.bf16.gmra.mxu3 %vm984_vm5, %v7717_v21 }
 0x197   : > { %5998 = vmatmul.msk.bf16.gmra.mxu1 %vm984_vm5, %v7572_v50  ;;  %v1909_v50 = vunpack.c.l.b16 %v1859_v36 }
 0x198   : > { %v1108_v55 = vpop.f32.mrf.mxu0  ;;  %v2053_v15 = vpop.f32.mrf.mxu3 }
 0x199   : > { %v1233_v2 = vadd.f32 %v1232_v33, %v1108_v55 }
 0x19a   : > { %v7729_v18 = vpop.f32.mrf.mxu2 }
 0x19b   : > { %v1446_v1 = vadd.f32 %v1376_v53, %v1233_v2  ;;  %5978 = vmatmul.msk.bf16.gmra.mxu0 %vm984_vm5, %v7633_v48  ;;  %v7746_v48 = vpack.c.b16 %v1910_v24, %v1909_v50  ;;  %v5948_v2 = vrot.slane %v660_v52, 11 }
 0x19c   : > { %v7739_v44 = vpop.f32.mrf.mxu1 }
 0x19d   : > { %v7737_v7 = vadd.f32 %v2053_v15, %v1446_v1  ;;  %v777_v15 = vrot.slane %v775_v14, 4  ;;  %v776_v42 = vsel %vm7032_vm4, %v5948_v2, %v775_v14 }
 0x19f   : > { %6021 = vmatmul.msk.bf16.gmra.mxu2 %vm984_vm5, %v1307_v27 }
 0x1a0   : > { %v7742_v28 = vpop.f32.mrf.mxu0  ;;  %v7744_v53 = vpop.f32.mrf.mxu3 }
 0x1a1   : > { %9297 = vst [vmem:[#allocation17_spill] sm:$0xff] %v7744_v53 }
 0x1a2   : > { %v1381_v40 = vpop.f32.mrf.mxu2 }
 0x1a4   : > { %v1237_v33 = vpop.f32.mrf.mxu1 }
 0x1a5   : > { %6052 = vmatmul.msk.bf16.gmra.mxu3 %vm984_vm5, %v7746_v48 }
 0x1a7   : > { %5999 = vmatmul.msk.bf16.gmra.mxu1 %vm984_vm5, %v7606_v4  ;;  %v9298_v4 = vrot.slane %v7067_v12, 7 }
 0x1a8   : > { %v1113_v26 = vpop.f32.mrf.mxu0  ;;  %v2058_v8 = vpop.f32.mrf.mxu3 }
 0x1a9   : > { %v1238_v38 = vadd.f32 %v1237_v33, %v1113_v26  ;;  %v779_v50 = vsel %vm7032_vm4, %v777_v15, %v9298_v4 }
 0x1aa   : > { %v1383_v6 = vpop.f32.mrf.mxu2  ;;  %v1159_v26 = vunpack.c.l.b16 %v779_v50  ;;  %v6198_v50 = vld [vmem:[%s9253_s3 + $0xa] sm:$0x3] }
 0x1ab   : > { %v1448_v55 = vadd.f32 %v1381_v40, %v1238_v38  ;;  %5979 = vmatmul.msk.bf16.gmra.mxu0 %vm984_vm5, %v7662_v30  ;;  %v1158_v40 = vunpack.c.l.b16 %v776_v42  ;;  %v6097_v42 = vld [vmem:[%s9253_s3 + $0x4] sm:$0x3] }
 0x1ac   : > { %v1239_v27 = vpop.f32.mrf.mxu1  ;;  %v2678_v4 = vsel %vm1045_vm1, %v6097_v42, 0 }
 0x1ad   : > { %v7757_v1 = vadd.f32 %v2058_v8, %v1448_v55  ;;  %v1162_v30 = vpack.c.b16 %v1159_v26, %v1158_v40  ;;  %2687 = vmatpush.bf16.msrb.mxu2 %v2678_v4  ;;  %v1470_v26 = vshrl.u32 %v660_v52, 16 }
 0x1b0   : > { %v1115_v36 = vpop.f32.mrf.mxu0  ;;  %v2060_v24 = vpop.f32.mrf.mxu3 }
 0x1b1   : > { %v1475_v36 = vshrl.u32 %v7748_v17, 16  ;;  %v2844_v24 = vsel %vm1045_vm1, %v6198_v50, 0  ;;  %v6454_v50 = vld [vmem:[#allocation2 + $0x20] sm:$0xff] }
 0x1b2   : > { %v1386_v33 = vpop.f32.mrf.mxu2  ;;  %2853 = vmatpush.bf16.msrb.mxu3 %v2844_v24 }
 0x1b3   : > { %v1477_v40 = vrot.slane %v1475_v36, 7  ;;  %v6022_v36 = vrot.slane %v1470_v26, 11 }
 0x1b4   : > { %v1242_v38 = vpop.f32.mrf.mxu1 }
 0x1b5   : > { %6207 = vmatmul.msk.bf16.vlgmr.msrb.gmra.mxu3 %vm984_vm5, %v6454_v50 }
 0x1b8   : > { %v1118_v6 = vpop.f32.mrf.mxu0  ;;  %v2063_v8 = vpop.f32.mrf.mxu3 }
 0x1b9   : > { %v1243_v53 = vadd.f32 %v1242_v38, %v1118_v6  ;;  %v6076_v6 = vld [vmem:[%s9253_s3 + $0xe] sm:$0x3] }
 0x1ba   : > { %v7765_v55 = vpop.f32.mrf.mxu2  ;;  %v2404_v4 = vsel %vm1045_vm1, %v6076_v6, 0 }
 0x1bb   : > { %v1450_v27 = vadd.f32 %v1386_v33, %v1243_v53  ;;  %5980 = vmatmul.msk.bf16.vlgmr.msrb.gmra.mxu0 %vm984_vm5, %v1162_v30  ;;  %v6452_v33 = vld [vmem:[#allocation2 + $0x8] sm:$0xff]  ;;  %v1478_v30 = vshll.u32 %v7748_v17, 16  ;;  %2413 = vmatpush.bf16.msrb.mxu1 %v2404_v4  ;;  %v1482_v17 = vrot.slane %v1477_v40, 4 }
 0x1bc   : > { %2001 = vmatpush.bf16.msrb.mxu0 %v7053_v3  ;;  %v7771_v56 = vpop.f32.mrf.mxu1  ;;  %v6054_v3 = vld [vmem:[%s9253_s3 + $0x8] sm:$0x3]  ;;  %6178 = vmatmul.msk.bf16.vlgmr.msrb.gmra.mxu2 %vm984_vm5, %v6452_v33 }
 0x1bd   : > { %v7769_v12 = vadd.f32 %v2063_v8, %v1450_v27  ;;  %v2198_v42 = vsel %vm1045_vm1, %v6054_v3, 0  ;;  %v1480_v24 = vor.u32 %v1478_v30, %v1477_v40  ;;  %v6227_v30 = vld [vmem:[%s9253_s3 + $0x10] sm:$0x3] }
 0x1be   : > { %6077 = vmatmul.msk.bf16.vlgmr.msrb.gmra.mxu1 %vm984_vm5, %v7245_v46 }
 0x1c0   : > { %v7773_v14 = vpop.f32.mrf.mxu0  ;;  %v7775_v2 = vpop.f32.mrf.mxu3 }
 0x1c1   : > { %9299 = vst [vmem:[#allocation18_spill] sm:$0xff] %v7775_v2 }
 0x1c2   : > { %v1391_v15 = vpop.f32.mrf.mxu2 }
 0x1c4   : > { %v1247_v53 = vpop.f32.mrf.mxu1 }
 0x1c8   : > { %v1123_v38 = vpop.f32.mrf.mxu0  ;;  %v2068_v27 = vpop.f32.mrf.mxu3 }
 0x1c9   : > { %v1248_v8 = vadd.f32 %v1247_v53, %v1123_v38 }
 0x1ca   : > { %v1393_v2 = vpop.f32.mrf.mxu2 }
 0x1cb   : > { %v1452_v52 = vadd.f32 %v1391_v15, %v1248_v8  ;;  %6002 = vmatmul.msk.bf16.vlgmr.msra.gmra.mxu0 %vm984_vm5, %v7176_v16  ;;  %v1490_v2 = vsel %vm7091_vm8, %v1482_v17, %v7085_v32  ;;  %v1481_v16 = vsel %vm7091_vm8, %v6022_v36, %v1480_v24  ;;  %v3010_v32 = vsel %vm1045_vm1, %v6227_v30, 0  ;;  %v6455_v17 = vld [vmem:[#allocation2 + $0x28] sm:$0xff]  ;;  %v7828_v30 = vld [vmem:[#allocation2 + $0x38] sm:$0xff] }
 0x1cc   : > { %2207 = vmatpush.bf16.msra.mxu0 %v2198_v42  ;;  %v1249_v3 = vpop.f32.mrf.mxu1  ;;  %v1871_v6 = vunpack.c.l.b16 %v1481_v16  ;;  %v1872_v26 = vunpack.c.l.b16 %v1490_v2  ;;  %6208 = vmatmul.msk.bf16.gmra.mxu3 %vm984_vm5, %v6455_v17 }
 0x1cd   : > { %v7799_v53 = vadd.f32 %v2068_v27, %v1452_v52  ;;  %v6453_v27 = vld [vmem:[#allocation2 + $0x10] sm:$0xff] }
 0x1ce   : > { %v1911_v8 = vpack.c.b16 %v1872_v26, %v1871_v6  ;;  %6179 = vmatmul.msk.bf16.gmra.mxu2 %vm984_vm5, %v6453_v27  ;;  %6078 = vmatmul.msk.bf16.gmra.mxu1 %vm984_vm5, %v7220_v20 }
 0x1d0   : > { %v1125_v15 = vpop.f32.mrf.mxu0  ;;  %v2070_v33 = vpop.f32.mrf.mxu3 }
 0x1d2   : > { %v1396_v38 = vpop.f32.mrf.mxu2 }
 0x1d4   : > { %v1252_v40 = vpop.f32.mrf.mxu1 }
 0x1d8   : > { %v1128_v42 = vpop.f32.mrf.mxu0  ;;  %v2073_v52 = vpop.f32.mrf.mxu3 }
 0x1d9   : > { %v1253_v4 = vadd.f32 %v1252_v40, %v1128_v42 }
 0x1da   : > { %v7813_v36 = vpop.f32.mrf.mxu2 }
 0x1db   : > { %9300 = vst [vmem:[#allocation19_spill] sm:$0xff] %v7813_v36  ;;  %v1454_v24 = vadd.f32 %v1396_v38, %v1253_v4  ;;  %6033 = vmatmul.msk.bf16.vlgmr.msrb.gmra.mxu0 %vm984_vm5, %v1911_v8 }
 0x1dc   : > { %3019 = vmatpush.bf16.msrb.mxu0 %v3010_v32  ;;  %v7819_v2 = vpop.f32.mrf.mxu1  ;;  %6209 = vmatmul.msk.bf16.gmra.mxu3 %vm984_vm5, %v7828_v30 }
 0x1dd   : > { %v7817_v3 = vadd.f32 %v2073_v52, %v1454_v24 }
 0x1de   : > { %6180 = vmatmul.msk.bf16.gmra.mxu2 %vm984_vm5, %v6454_v50  ;;  %6079 = vmatmul.msk.bf16.gmra.mxu1 %vm984_vm5, %v7257_v61 }
 0x1df   : > { %9301 = vst [vmem:[#allocation20_spill] sm:$0xff] %v7817_v3 }
 0x1e0   : > { %v7823_v15 = vpop.f32.mrf.mxu0  ;;  %v7825_v16 = vpop.f32.mrf.mxu3 }
 0x1e1   : > { %9302 = vst [vmem:[#allocation21_spill] sm:$0xff] %v7825_v16 }
 0x1e2   : > { %v1401_v33 = vpop.f32.mrf.mxu2 }
 0x1e4   : > { %v1257_v6 = vpop.f32.mrf.mxu1 }
 0x1e8   : > { %v1133_v26 = vpop.f32.mrf.mxu0  ;;  %v2078_v40 = vpop.f32.mrf.mxu3 }
 0x1e9   : > { %v1258_v38 = vadd.f32 %v1257_v6, %v1133_v26 }
 0x1ea   : > { %v1403_v8 = vpop.f32.mrf.mxu2 }
 0x1eb   : > { %v1456_v27 = vadd.f32 %v1401_v33, %v1258_v38  ;;  %6055 = vmatmul.msk.bf16.vlgmr.msra.gmra.mxu0 %vm984_vm5, %v7166_v63  ;;  %v7839_v33 = vld [vmem:[#allocation2 + $0x40] sm:$0xff] }
 0x1ec   : > { %v1259_v4 = vpop.f32.mrf.mxu1  ;;  %6210 = vmatmul.msk.bf16.gmra.mxu3 %vm984_vm5, %v7839_v33 }
 0x1ed   : > { %v7834_v42 = vadd.f32 %v2078_v40, %v1456_v27 }
 0x1ee   : > { %6181 = vmatmul.msk.bf16.gmra.mxu2 %vm984_vm5, %v6455_v17  ;;  %6080 = vmatmul.msk.bf16.gmra.mxu1 %vm984_vm5, %v7290_v35 }
 0x1ef   : > { %9303 = vst [vmem:[#allocation22_spill] sm:$0xff] %v7834_v42  ;;  %v7935_v42 = vld [vmem:[#allocation2 + $0x98] sm:$0xff] }
 0x1f0   : > { %v1135_v52 = vpop.f32.mrf.mxu0  ;;  %v2080_v32 = vpop.f32.mrf.mxu3 }
 0x1f2   : > { %v1406_v24 = vpop.f32.mrf.mxu2 }
 0x1f4   : > { %v1262_v50 = vpop.f32.mrf.mxu1 }
 0x1f8   : > { %v1138_v6 = vpop.f32.mrf.mxu0  ;;  %v2083_v8 = vpop.f32.mrf.mxu3 }
 0x1f9   : > { %v1263_v26 = vadd.f32 %v1262_v50, %v1138_v6 }
 0x1fa   : > { %v7841_v63 = vpop.f32.mrf.mxu2 }
 0x1fb   : > { %9304 = vst [vmem:[#allocation23_spill] sm:$0xff] %v7841_v63  ;;  %v1458_v38 = vadd.f32 %v1406_v24, %v1263_v26  ;;  %6056 = vmatmul.msk.bf16.gmra.mxu0 %vm984_vm5, %v7208_v57  ;;  %v7859_v57 = vld [vmem:[#allocation2 + $0x50] sm:$0xff] }
 0x1fc   : > { %v7849_v27 = vpop.f32.mrf.mxu1  ;;  %9309 = vst [vmem:[#allocation28_spill] sm:$0xff] %v7859_v57  ;;  %6211 = vmatmul.msk.bf16.gmra.mxu3 %vm984_vm5, %v7859_v57 }
 0x1fd   : > { %v7847_v40 = vadd.f32 %v2083_v8, %v1458_v38  ;;  %9306 = vst [vmem:[#allocation25_spill] sm:$0xff] %v7849_v27 }
 0x1fe   : > { %6182 = vmatmul.msk.bf16.gmra.mxu2 %vm984_vm5, %v7828_v30  ;;  %6081 = vmatmul.msk.bf16.gmra.mxu1 %vm984_vm5, %v7360_v49 }
 0x1ff   : > { %9305 = vst [vmem:[#allocation24_spill] sm:$0xff] %v7847_v40 }
 0x200   : > { %v7853_v4 = vpop.f32.mrf.mxu0  ;;  %v7855_v17 = vpop.f32.mrf.mxu3 }
 0x201   : > { %9307 = vst [vmem:[#allocation26_spill] sm:$0xff] %v7853_v4 }
 0x202   : > { %9308 = vst [vmem:[#allocation27_spill] sm:$0xff] %v7855_v17  ;;  %v1411_v52 = vpop.f32.mrf.mxu2 }
 0x204   : > { %v1267_v32 = vpop.f32.mrf.mxu1 }
 0x208   : > { %v1143_v24 = vpop.f32.mrf.mxu0  ;;  %v2088_v6 = vpop.f32.mrf.mxu3 }
 0x209   : > { %v1268_v50 = vadd.f32 %v1267_v32, %v1143_v24 }
 0x20a   : > { %v1413_v26 = vpop.f32.mrf.mxu2 }
 0x20b   : > { %v1460_v8 = vadd.f32 %v1411_v52, %v1268_v50  ;;  %6057 = vmatmul.msk.bf16.gmra.mxu0 %vm984_vm5, %v7245_v46  ;;  %v7871_v46 = vld [vmem:[#allocation2 + $0x58] sm:$0xff] }
 0x20c   : > { %v1269_v17 = vpop.f32.mrf.mxu1  ;;  %9311 = vst [vmem:[#allocation30_spill] sm:$0xff] %v7871_v46  ;;  %6212 = vmatmul.msk.bf16.gmra.mxu3 %vm984_vm5, %v7871_v46 }
 0x20d   : > { %v7865_v38 = vadd.f32 %v2088_v6, %v1460_v8 }
 0x20e   : > { %6183 = vmatmul.msk.bf16.gmra.mxu2 %vm984_vm5, %v7839_v33  ;;  %6082 = vmatmul.msk.bf16.gmra.mxu1 %vm984_vm5, %v7397_v39 }
 0x20f   : > { %9310 = vst [vmem:[#allocation29_spill] sm:$0xff] %v7865_v38 }
 0x210   : > { %v1145_v32 = vpop.f32.mrf.mxu0  ;;  %v2090_v24 = vpop.f32.mrf.mxu3 }
 0x212   : > { %v1416_v63 = vpop.f32.mrf.mxu2 }
 0x214   : > { %v1272_v40 = vpop.f32.mrf.mxu1 }
 0x218   : > { %v1148_v27 = vpop.f32.mrf.mxu0  ;;  %v2093_v26 = vpop.f32.mrf.mxu3 }
 0x219   : > { %v1273_v4 = vadd.f32 %v1272_v40, %v1148_v27 }
 0x21a   : > { %v7873_v52 = vpop.f32.mrf.mxu2 }
 0x21b   : > { %9312 = vst [vmem:[#allocation31_spill] sm:$0xff] %v7873_v52  ;;  %v1462_v50 = vadd.f32 %v1416_v63, %v1273_v4  ;;  %6058 = vmatmul.msk.bf16.gmra.mxu0 %vm984_vm5, %v7220_v20  ;;  %v7891_v20 = vld [vmem:[#allocation2 + $0x68] sm:$0xff] }
 0x21c   : > { %v7881_v6 = vpop.f32.mrf.mxu1  ;;  %9317 = vst [vmem:[#allocation36_spill] sm:$0xff] %v7891_v20  ;;  %6213 = vmatmul.msk.bf16.gmra.mxu3 %vm984_vm5, %v7891_v20 }
 0x21d   : > { %v7879_v17 = vadd.f32 %v2093_v26, %v1462_v50  ;;  %9314 = vst [vmem:[#allocation33_spill] sm:$0xff] %v7881_v6 }
 0x21e   : > { %6184 = vmatmul.msk.bf16.gmra.mxu2 %vm984_vm5, %v7859_v57  ;;  %6083 = vmatmul.msk.bf16.gmra.mxu1 %vm984_vm5, %v7430_v47 }
 0x21f   : > { %9313 = vst [vmem:[#allocation32_spill] sm:$0xff] %v7879_v17 }
 0x220   : > { %v7885_v40 = vpop.f32.mrf.mxu0  ;;  %v7887_v27 = vpop.f32.mrf.mxu3 }
 0x221   : > { %9315 = vst [vmem:[#allocation34_spill] sm:$0xff] %v7885_v40 }
 0x222   : > { %9316 = vst [vmem:[#allocation35_spill] sm:$0xff] %v7887_v27  ;;  %v1421_v8 = vpop.f32.mrf.mxu2 }
 0x224   : > { %v1277_v32 = vpop.f32.mrf.mxu1 }
 0x228   : > { %v1153_v63 = vpop.f32.mrf.mxu0  ;;  %v2098_v24 = vpop.f32.mrf.mxu3 }
 0x229   : > { %v1278_v4 = vadd.f32 %v1277_v32, %v1153_v63 }
 0x22a   : > { %v1423_v26 = vpop.f32.mrf.mxu2 }
 0x22b   : > { %v1464_v50 = vadd.f32 %v1421_v8, %v1278_v4  ;;  %6059 = vmatmul.msk.bf16.gmra.mxu0 %vm984_vm5, %v7257_v61  ;;  %v7903_v26 = vld [vmem:[#allocation2 + $0x70] sm:$0xff] }
 0x22c   : > { %v1279_v32 = vpop.f32.mrf.mxu1  ;;  %9319 = vst [vmem:[#allocation38_spill] sm:$0xff] %v7903_v26  ;;  %6214 = vmatmul.msk.bf16.gmra.mxu3 %vm984_vm5, %v7903_v26 }
 0x22d   : > { %v7897_v52 = vadd.f32 %v2098_v24, %v1464_v50  ;;  %v7914_v24 = vld [vmem:[#allocation2 + $0x80] sm:$0xff] }
 0x22e   : > { %6185 = vmatmul.msk.bf16.gmra.mxu2 %vm984_vm5, %v7871_v46  ;;  %6084 = vmatmul.msk.bf16.gmra.mxu1 %vm984_vm5, %v7469_v5  ;;  %9320 = vst [vmem:[#allocation39_spill] sm:$0xff] %v7914_v24 }
 0x22f   : > { %9318 = vst [vmem:[#allocation37_spill] sm:$0xff] %v7897_v52 }
 0x230   : > { %v1155_v63 = vpop.f32.mrf.mxu0  ;;  %v2100_v27 = vpop.f32.mrf.mxu3 }
 0x238   : > { %v1182_v17 = vpop.f32.mrf.mxu0  ;;  %v2855_v32 = vpop.f32.mrf.mxu3 }
 0x239   : > { %v1183_v8 = vadd.f32 %v1182_v17, %v7370_v10 }
 0x23b   : > { %6060 = vmatmul.msk.bf16.gmra.mxu0 %vm984_vm5, %v7290_v35  ;;  %v2415_v50 = vpop.f32.mrf.mxu1 }
 0x23c   : > { %6215 = vmatmul.msk.bf16.gmra.mxu3 %vm984_vm5, %v7914_v24 }
 0x23e   : > { %6186 = vmatmul.msk.bf16.gmra.mxu2 %vm984_vm5, %v7891_v20  ;;  %6085 = vmatmul.msk.bf16.gmra.mxu1 %vm984_vm5, %v7513_v62 }
 0x23f   : > { %v2689_v35 = vpop.f32.mrf.mxu2 }
 0x240   : > { %v1184_v61 = vpop.f32.mrf.mxu0  ;;  %v2857_v52 = vpop.f32.mrf.mxu3 }
 0x241   : > { %v1185_v10 = vadd.f32 %v1184_v61, %v7393_v23 }
 0x248   : > { %v1326_v4 = vpop.f32.mrf.mxu0 }
 0x249   : > { %v1426_v27 = vadd.f32 %v1326_v4, %v1183_v8  ;;  %v2417_v8 = vpop.f32.mrf.mxu1  ;;  %v2691_v4 = vpop.f32.mrf.mxu2 }
 0x24b   : > { %6061 = vmatmul.msk.bf16.gmra.mxu0 %vm984_vm5, %v7360_v49  ;;  %v7925_v49 = vld [vmem:[#allocation2 + $0x88] sm:$0xff] }
 0x24c   : > { %6216 = vmatmul.msk.bf16.gmra.mxu3 %vm984_vm5, %v7925_v49 }
 0x24e   : > { %6187 = vmatmul.msk.bf16.gmra.mxu2 %vm984_vm5, %v7903_v26  ;;  %6086 = vmatmul.msk.bf16.gmra.mxu1 %vm984_vm5, %v7490_v41 }
 0x24f   : > { %v2860_v61 = vpop.f32.mrf.mxu3 }
 0x250   : > { %v1328_v17 = vpop.f32.mrf.mxu0 }
 0x251   : > { %v1427_v63 = vadd.f32 %v1328_v17, %v1185_v10  ;;  %v2420_v38 = vpop.f32.mrf.mxu1  ;;  %v2694_v23 = vpop.f32.mrf.mxu2 }
 0x257   : > { %v2862_v20 = vpop.f32.mrf.mxu3 }
 0x258   : > { %v2003_v6 = vpop.f32.mrf.mxu0 }
 0x259   : > { %v2103_v40 = vadd.f32 %v2003_v6, %v1426_v27  ;;  %v2422_v6 = vpop.f32.mrf.mxu1  ;;  %v2696_v27 = vpop.f32.mrf.mxu2 }
 0x25b   : > { %6062 = vmatmul.msk.bf16.gmra.mxu0 %vm984_vm5, %v7397_v39 }
 0x25c   : > { %6217 = vmatmul.msk.bf16.gmra.mxu3 %vm984_vm5, %v7935_v42 }
 0x25e   : > { %6188 = vmatmul.msk.bf16.gmra.mxu2 %vm984_vm5, %v7914_v24  ;;  %6087 = vmatmul.msk.bf16.gmra.mxu1 %vm984_vm5, %v7527_v54 }
 0x25f   : > { %v2865_v20 = vpop.f32.mrf.mxu3 }
 0x260   : > { %v2005_v10 = vpop.f32.mrf.mxu0 }
 0x261   : > { %v2104_v17 = vadd.f32 %v2005_v10, %v1427_v63  ;;  %v2425_v39 = vpop.f32.mrf.mxu1  ;;  %v2699_v57 = vpop.f32.mrf.mxu2 }
 0x268   : > { %v2209_v26 = vpop.f32.mrf.mxu0 }
 0x269   : > { %v2309_v46 = vadd.f32 %v2209_v26, %v2103_v40  ;;  %v2427_v6 = vpop.f32.mrf.mxu1  ;;  %v2701_v24 = vpop.f32.mrf.mxu2 }
 0x26b   : > { %v2515_v16 = vadd.f32 %v2415_v50, %v2309_v46  ;;  %6063 = vmatmul.msk.bf16.gmra.mxu0 %vm984_vm5, %v7430_v47  ;;  %v2867_v50 = vpop.f32.mrf.mxu3 }
 0x26d   : > { %v2789_v63 = vadd.f32 %v2689_v35, %v2515_v16  ;;  %v7950_v16 = vld [vmem:[#allocation2 + $0xa0] sm:$0xff] }
 0x26e   : > { %6189 = vmatmul.msk.bf16.gmra.mxu2 %vm984_vm5, %v7925_v49  ;;  %6218 = vmatmul.msk.bf16.gmra.mxu3 %vm984_vm5, %v7950_v16 }
 0x26f   : > { %v7943_v40 = vadd.f32 %v2855_v32, %v2789_v63  ;;  %6088 = vmatmul.msk.bf16.gmra.mxu1 %vm984_vm5, %v7566_v9 }
 0x270   : > { %v2211_v26 = vpop.f32.mrf.mxu0 }
 0x271   : > { %v2310_v10 = vadd.f32 %v2211_v26, %v2104_v17  ;;  %v2430_v35 = vpop.f32.mrf.mxu1 }
 0x273   : > { %v2516_v27 = vadd.f32 %v2417_v8, %v2310_v10  ;;  %v2704_v8 = vpop.f32.mrf.mxu2 }
 0x275   : > { %v2790_v46 = vadd.f32 %v2691_v4, %v2516_v27 }
 0x277   : > { %v7945_v36 = vadd.f32 %v2857_v52, %v2790_v46  ;;  %v2870_v52 = vpop.f32.mrf.mxu3 }
 0x278   : > { %v2214_v47 = vpop.f32.mrf.mxu0 }
 0x279   : > { %v2311_v3 = vadd.f32 %v2214_v47, %v7421_v0  ;;  %v2432_v63 = vpop.f32.mrf.mxu1 }
 0x27b   : > { %v2517_v32 = vadd.f32 %v2420_v38, %v2311_v3  ;;  %6064 = vmatmul.msk.bf16.gmra.mxu0 %vm984_vm5, %v7469_v5  ;;  %v2706_v26 = vpop.f32.mrf.mxu2  ;;  %v7963_v5 = vld [vmem:[#allocation2 + $0xb0] sm:$0xff] }
 0x27d   : > { %v2791_v4 = vadd.f32 %v2694_v23, %v2517_v32 }
 0x27e   : > { %6190 = vmatmul.msk.bf16.gmra.mxu2 %vm984_vm5, %v7935_v42  ;;  %6219 = vmatmul.msk.bf16.gmra.mxu3 %vm984_vm5, %v7963_v5 }
 0x27f   : > { %v7958_v0 = vadd.f32 %v2860_v61, %v2791_v4  ;;  %v2872_v10 = vpop.f32.mrf.mxu3  ;;  %6089 = vmatmul.msk.bf16.gmra.mxu1 %vm984_vm5, %v7600_v43 }
 0x280   : > { %v2216_v17 = vpop.f32.mrf.mxu0 }
 0x281   : > { %v2435_v38 = vpop.f32.mrf.mxu1 }
 0x283   : > { %v2709_v61 = vpop.f32.mrf.mxu2 }
 0x287   : > { %v2875_v47 = vpop.f32.mrf.mxu3 }
 0x288   : > { %v2219_v27 = vpop.f32.mrf.mxu0 }
 0x289   : > { %v2313_v3 = vadd.f32 %v2219_v27, %v7461_v45  ;;  %v2437_v17 = vpop.f32.mrf.mxu1 }
 0x28b   : > { %v2519_v23 = vadd.f32 %v2425_v39, %v2313_v3  ;;  %6065 = vmatmul.msk.bf16.gmra.mxu0 %vm984_vm5, %v7513_v62  ;;  %v2711_v39 = vpop.f32.mrf.mxu2 }
 0x28d   : > { %v2793_v46 = vadd.f32 %v2699_v57, %v2519_v23  ;;  %v7979_v57 = vld [vmem:[#allocation2 + $0xb8] sm:$0xff] }
 0x28e   : > { %6191 = vmatmul.msk.bf16.gmra.mxu2 %vm984_vm5, %v7950_v16  ;;  %9321 = vst [vmem:[#allocation40_spill] sm:$0xff] %v7979_v57  ;;  %6220 = vmatmul.msk.bf16.gmra.mxu3 %vm984_vm5, %v7979_v57 }
 0x28f   : > { %v7971_v45 = vadd.f32 %v2865_v20, %v2793_v46  ;;  %v2877_v10 = vpop.f32.mrf.mxu3  ;;  %6090 = vmatmul.msk.bf16.gmra.mxu1 %vm984_vm5, %v7687_v31 }
 0x290   : > { %v2221_v32 = vpop.f32.mrf.mxu0 }
 0x291   : > { %v2314_v4 = vadd.f32 %v2221_v32, %v7480_v29  ;;  %v2440_v20 = vpop.f32.mrf.mxu1 }
 0x293   : > { %v2520_v63 = vadd.f32 %v2427_v6, %v2314_v4  ;;  %v2714_v29 = vpop.f32.mrf.mxu2 }
 0x295   : > { %v2794_v26 = vadd.f32 %v2701_v24, %v2520_v63 }
 0x297   : > { %v7974_v62 = vadd.f32 %v2867_v50, %v2794_v26  ;;  %v2880_v6 = vpop.f32.mrf.mxu3 }
 0x298   : > { %v2224_v27 = vpop.f32.mrf.mxu0 }
 0x299   : > { %v2315_v3 = vadd.f32 %v2224_v27, %v7504_v34  ;;  %v2442_v46 = vpop.f32.mrf.mxu1 }
 0x29b   : > { %v2521_v23 = vadd.f32 %v2430_v35, %v2315_v3  ;;  %6066 = vmatmul.msk.bf16.gmra.mxu0 %vm984_vm5, %v7490_v41  ;;  %v2716_v32 = vpop.f32.mrf.mxu2  ;;  %v7992_v41 = vld [vmem:[#allocation2 + $0xc8] sm:$0xff] }
 0x29c   : > { %9322 = vst [vmem:[#allocation41_spill] sm:$0xff] %v7992_v41 }
 0x29d   : > { %v2795_v24 = vadd.f32 %v2704_v8, %v2521_v23 }
 0x29e   : > { %6192 = vmatmul.msk.bf16.gmra.mxu2 %vm984_vm5, %v7963_v5  ;;  %6221 = vmatmul.msk.bf16.gmra.mxu3 %vm984_vm5, %v7992_v41 }
 0x29f   : > { %v7987_v34 = vadd.f32 %v2870_v52, %v2795_v24  ;;  %v2882_v4 = vpop.f32.mrf.mxu3  ;;  %6091 = vmatmul.msk.bf16.gmra.mxu1 %vm984_vm5, %v7717_v21 }
 0x2a0   : > { %v2226_v50 = vpop.f32.mrf.mxu0 }
 0x2a1   : > { %v2445_v26 = vpop.f32.mrf.mxu1 }
 0x2a3   : > { %v2719_v52 = vpop.f32.mrf.mxu2 }
 0x2a7   : > { %v2885_v3 = vpop.f32.mrf.mxu3 }
 0x2a8   : > { %v2229_v63 = vpop.f32.mrf.mxu0 }
 0x2a9   : > { %v2317_v35 = vadd.f32 %v2229_v63, %v7538_v19  ;;  %v2447_v50 = vpop.f32.mrf.mxu1 }
 0x2ab   : > { %v2523_v8 = vadd.f32 %v2435_v38, %v2317_v35  ;;  %6067 = vmatmul.msk.bf16.gmra.mxu0 %vm984_vm5, %v7527_v54  ;;  %v2721_v38 = vpop.f32.mrf.mxu2  ;;  %v8010_v35 = vld [vmem:[#allocation2 + $0xd0] sm:$0xff] }
 0x2ac   : > { %9325 = vst [vmem:[#allocation44_spill] sm:$0xff] %v8010_v35 }
 0x2ad   : > { %v2797_v27 = vadd.f32 %v2709_v61, %v2523_v8 }
 0x2ae   : > { %6193 = vmatmul.msk.bf16.gmra.mxu2 %vm984_vm5, %v7979_v57  ;;  %6222 = vmatmul.msk.bf16.gmra.mxu3 %vm984_vm5, %v8010_v35 }
 0x2af   : > { %v8000_v19 = vadd.f32 %v2875_v47, %v2797_v27  ;;  %v8003_v4 = vpop.f32.mrf.mxu3  ;;  %6092 = vmatmul.msk.bf16.gmra.mxu1 %vm984_vm5, %v7746_v48 }
 0x2b0   : > { %v2231_v23 = vpop.f32.mrf.mxu0 }
 0x2b1   : > { %9323 = vst [vmem:[#allocation42_spill] sm:$0xff] %v8000_v19  ;;  %v2318_v24 = vadd.f32 %v2231_v23, %v7556_v58  ;;  %v8012_v47 = vpop.f32.mrf.mxu1  ;;  %v2158_v23 = vshrl.u32 %v7613_v13, 16 }
 0x2b3   : > { %v2524_v46 = vadd.f32 %v2437_v17, %v2318_v24  ;;  %v8018_v58 = vpop.f32.mrf.mxu2  ;;  %v2144_v24 = vshrl.u32 %v7611_v60, 16  ;;  %v8036_v60 = vld [vmem:[#allocation2 + $0xe0] sm:$0xff] }
 0x2b5   : > { %v2798_v32 = vadd.f32 %v2711_v39, %v2524_v46 }
 0x2b7   : > { %v8005_v54 = vadd.f32 %v2877_v10, %v2798_v32  ;;  %v2152_v32 = vshll.u32 %v7602_v59, 16 }
 0x2b8   : > { %v2234_v63 = vpop.f32.mrf.mxu0 }
 0x2b9   : > { %9324 = vst [vmem:[#allocation43_spill] sm:$0xff] %v8005_v54  ;;  %v2319_v61 = vadd.f32 %v2234_v63, %v7576_v11  ;;  %v8022_v11 = vpop.f32.mrf.mxu3  ;;  %v2452_v27 = vpop.f32.mrf.mxu1  ;;  %v2161_v63 = vshll.u32 %v7613_v13, 16 }
 0x2bb   : > { %v2525_v8 = vadd.f32 %v2440_v20, %v2319_v61  ;;  %6068 = vmatmul.msk.bf16.gmra.mxu0 %vm984_vm5, %v7566_v9  ;;  %v2149_v20 = vshrl.u32 %v7602_v59, 16  ;;  %v2726_v9 = vpop.f32.mrf.mxu2 }
 0x2bd   : > { %v2799_v17 = vadd.f32 %v2714_v29, %v2525_v8  ;;  %v2151_v46 = vrot.slane %v2149_v20, 7  ;;  %v2160_v29 = vrot.slane %v2158_v23, 7  ;;  %v6053_v8 = vrot.slane %v2144_v24, 11 }
 0x2be   : > { %6194 = vmatmul.msk.bf16.gmra.mxu2 %vm984_vm5, %v7992_v41  ;;  %6223 = vmatmul.msk.bf16.gmra.mxu3 %vm984_vm5, %v8036_v60 }
 0x2bf   : > { %v8024_v39 = vadd.f32 %v2880_v6, %v2799_v17  ;;  %v2154_v54 = vor.u32 %v2152_v32, %v2151_v46  ;;  %v2156_v6 = vrot.slane %v2151_v46, 4  ;;  %v2163_v17 = vor.u32 %v2161_v63, %v2160_v29 }
 0x2c0   : > { %v2236_v10 = vpop.f32.mrf.mxu0 }
 0x2c1   : > { %9326 = vst [vmem:[#allocation45_spill] sm:$0xff] %v8024_v39  ;;  %v2892_v61 = vpop.f32.mrf.mxu3  ;;  %v2155_v27 = vsel %vm7091_vm8, %v6053_v8, %v2154_v54  ;;  %v9327_v39 = vld [vmem:[#allocation4_spill] sm:$0xff]  ;;  %v2164_v59 = vsel %vm7091_vm8, %v2156_v6, %v2163_v17  ;;  %v8040_v20 = vpop.f32.mrf.mxu1 }
 0x2c2   : > { %v2185_v13 = vunpack.c.l.b16 %v2155_v27  ;;  %v2186_v23 = vunpack.c.l.b16 %v2164_v59  ;;  %v9331_v6 = vld [vmem:[#allocation8_spill] sm:$0xff] }
 0x2c3   : > { %v8046_v54 = vpop.f32.mrf.mxu2  ;;  %v2176_v17 = vshrl.u32 %v9331_v6, 16 }
 0x2c8   : > { %v2239_v10 = vpop.f32.mrf.mxu0 }
 0x2c9   : > { %v2321_v19 = vadd.f32 %v2239_v10, %v9327_v39  ;;  %v8048_v39 = vpack.c.b16 %v2186_v23, %v2185_v13  ;;  %v8052_v46 = vpop.f32.mrf.mxu3  ;;  %v8057_v61 = vpop.f32.mrf.mxu1  ;;  %v2178_v13 = vrot.slane %v2176_v17, 7  ;;  %v2179_v23 = vshll.u32 %v9331_v6, 16 }
 0x2cb   : > { %v2527_v9 = vadd.f32 %v2445_v26, %v2321_v19  ;;  %6069 = vmatmul.msk.bf16.gmra.mxu0 %vm984_vm5, %v7600_v43  ;;  %6093 = vmatmul.msk.bf16.gmra.mxu1 %vm984_vm5, %v8048_v39  ;;  %v9329_v26 = vld [vmem:[#allocation5_spill] sm:$0xff]  ;;  %v9330_v43 = vld [vmem:[#allocation6_spill] sm:$0xff]  ;;  %v8061_v27 = vpop.f32.mrf.mxu2 }
 0x2cc   : > { %v2167_v8 = vshrl.u32 %v9330_v43, 16  ;;  %v2170_v59 = vshll.u32 %v9330_v43, 16  ;;  %v9333_v43 = vld [vmem:[#allocation7_spill] sm:$0xff] }
 0x2cd   : > { %v2801_v24 = vadd.f32 %v2719_v52, %v2527_v9 }
 0x2ce   : > { %v2169_v52 = vrot.slane %v2167_v8, 7  ;;  %6195 = vmatmul.msk.bf16.gmra.mxu2 %vm984_vm5, %v8010_v35  ;;  %v9340_v35 = vld [vmem:[#allocation12_spill] sm:$0xff] }
 0x2cf   : > { %v8054_v32 = vadd.f32 %v2885_v3, %v2801_v24  ;;  %v2165_v24 = vrot.slane %v2160_v29, 4 }
 0x2d0   : > { %v2241_v63 = vpop.f32.mrf.mxu0 }
 0x2d1   : > { %9328 = vst [vmem:[#allocation4_spill] sm:$0xff] %v8054_v32  ;;  %v2322_v19 = vadd.f32 %v2241_v63, %v9329_v26  ;;  %v8065_v9 = vpop.f32.mrf.mxu3  ;;  %v2172_v63 = vor.u32 %v2170_v59, %v2169_v52  ;;  %v2174_v26 = vrot.slane %v2169_v52, 4  ;;  %v2181_v32 = vor.u32 %v2179_v23, %v2178_v13  ;;  %v8079_v17 = vpop.f32.mrf.mxu1 }
 0x2d3   : > { %v2528_v10 = vadd.f32 %v2447_v50, %v2322_v19  ;;  %v2173_v50 = vsel %vm7091_vm8, %v2165_v24, %v2172_v63  ;;  %v2182_v19 = vsel %vm7091_vm8, %v2174_v26, %v2181_v32  ;;  %v9337_v26 = vld [vmem:[#allocation11_spill] sm:$0xff] }
 0x2d4   : > { %v2187_v29 = vunpack.c.l.b16 %v2173_v50  ;;  %v2188_v6 = vunpack.c.l.b16 %v2182_v19  ;;  %v2350_v50 = vshrl.u32 %v9337_v26, 16 }
 0x2d5   : > { %v2802_v3 = vadd.f32 %v2721_v38, %v2528_v10  ;;  %v8077_v38 = vld [vmem:[#allocation2 + $0xe8] sm:$0xff] }
 0x2d6   : > { %6224 = vmatmul.msk.bf16.gmra.mxu3 %vm984_vm5, %v8077_v38  ;;  %v8086_v32 = vpack.c.b16 %v2188_v6, %v2187_v29  ;;  %v6075_v6 = vrot.slane %v2350_v50, 11 }
 0x2d7   : > { %v8068_v41 = vadd.f32 %v8003_v4, %v2802_v3  ;;  %v9336_v3 = vld [vmem:[#allocation14_spill] sm:$0xff] }
 0x2d8   : > { %v2244_v57 = vpop.f32.mrf.mxu0  ;;  %v2364_v24 = vshrl.u32 %v9336_v3, 16 }
 0x2d9   : > { %9332 = vst [vmem:[#allocation5_spill] sm:$0xff] %v8068_v41  ;;  %v2323_v8 = vadd.f32 %v2244_v57, %v9333_v43  ;;  %v8088_v57 = vpop.f32.mrf.mxu2  ;;  %v8093_v52 = vpop.f32.mrf.mxu3 }
 0x2da   : > { %v2462_v13 = vpop.f32.mrf.mxu1  ;;  %v2366_v43 = vrot.slane %v2364_v24, 7 }
 0x2db   : > { %v2529_v4 = vadd.f32 %v8012_v47, %v2323_v8  ;;  %6070 = vmatmul.msk.bf16.gmra.mxu0 %vm984_vm5, %v7687_v31  ;;  %6094 = vmatmul.msk.bf16.gmra.mxu1 %vm984_vm5, %v8086_v32  ;;  %v9335_v31 = vld [vmem:[#allocation9_spill] sm:$0xff]  ;;  %v2367_v8 = vshll.u32 %v9336_v3, 16 }
 0x2dc   : > { %v2355_v23 = vshrl.u32 %v9335_v31, 16 }
 0x2dd   : > { %v2803_v10 = vadd.f32 %v8018_v58, %v2529_v4  ;;  %v2358_v58 = vshll.u32 %v9335_v31, 16  ;;  %v6472_v31 = vld [vmem:[#allocation2 + $0xf8] sm:$0xff] }
 0x2de   : > { %v2357_v19 = vrot.slane %v2355_v23, 7  ;;  %6196 = vmatmul.msk.bf16.gmra.mxu2 %vm984_vm5, %v8036_v60 }
 0x2df   : > { %v8096_v59 = vadd.f32 %v8022_v11, %v2803_v10  ;;  %v9338_v10 = vld [vmem:[#allocation15_spill] sm:$0xff] }
 0x2e0   : > { %v2246_v47 = vpop.f32.mrf.mxu0  ;;  %v2360_v4 = vor.u32 %v2358_v58, %v2357_v19  ;;  %v2362_v11 = vrot.slane %v2357_v19, 4  ;;  %v9341_v19 = vld [vmem:[#allocation10_spill] sm:$0xff] }
 0x2e1   : > { %9334 = vst [vmem:[#allocation6_spill] sm:$0xff] %v8096_v59  ;;  %v2736_v63 = vpop.f32.mrf.mxu2  ;;  %v2902_v29 = vpop.f32.mrf.mxu3  ;;  %v9339_v47 = vld [vmem:[#allocation13_spill] sm:$0xff]  ;;  %v2369_v59 = vor.u32 %v2367_v8, %v2366_v43 }
 0x2e2   : > { %v1225_v13 = vadd.f32 %v9339_v47, %v9338_v10  ;;  %v2361_v63 = vsel %vm7091_vm8, %v6075_v6, %v2360_v4  ;;  %v2465_v24 = vpop.f32.mrf.mxu1  ;;  %v2373_v47 = vshrl.u32 %v7700_v22, 16 }
 0x2e3   : > { %v2370_v23 = vsel %vm7091_vm8, %v2362_v11, %v2369_v59  ;;  %v2391_v3 = vunpack.c.l.b16 %v2361_v63  ;;  %v9342_v59 = vld [vmem:[#allocation16_spill] sm:$0xff] }
 0x2e4   : > { %v2392_v50 = vunpack.c.l.b16 %v2370_v23  ;;  %v1443_v58 = vadd.f32 %v9341_v19, %v1225_v13  ;;  %v2385_v23 = vshll.u32 %v7711_v25, 16 }
 0x2e6   : > { %6225 = vmatmul.msk.bf16.gmra.mxu3 %vm984_vm5, %v6472_v31  ;;  %v2120_v6 = vadd.f32 %v9342_v59, %v1443_v58 }
 0x2e8   : > { %v2249_v41 = vpop.f32.mrf.mxu0 }
 0x2e9   : > { %v2325_v26 = vadd.f32 %v2249_v41, %v9340_v35  ;;  %v2739_v41 = vpop.f32.mrf.mxu2  ;;  %v2395_v35 = vpack.c.b16 %v2392_v50, %v2391_v3  ;;  %v2905_v29 = vpop.f32.mrf.mxu3  ;;  %v2371_v50 = vrot.slane %v2366_v43, 4 }
 0x2eb   : > { %v2531_v8 = vadd.f32 %v8040_v20, %v2325_v26  ;;  %6071 = vmatmul.msk.bf16.gmra.mxu0 %vm984_vm5, %v7717_v21  ;;  %6095 = vmatmul.msk.bf16.gmra.mxu1 %vm984_vm5, %v2395_v35  ;;  %v2467_v20 = vpop.f32.mrf.mxu1  ;;  %v2382_v21 = vshrl.u32 %v7711_v25, 16  ;;  %v2375_v26 = vrot.slane %v2373_v47, 7  ;;  %v6473_v25 = vld [vmem:[#allocation2 + $0x100] sm:$0xff] }
 0x2ed   : > { %v2805_v60 = vadd.f32 %v8046_v54, %v2531_v8  ;;  %v2376_v54 = vshll.u32 %v7700_v22, 16  ;;  %v2384_v31 = vrot.slane %v2382_v21, 7  ;;  %v2380_v58 = vrot.slane %v2375_v26, 4 }
 0x2ee   : > { %6197 = vmatmul.msk.bf16.gmra.mxu2 %vm984_vm5, %v8077_v38 }
 0x2ef   : > { %v8121_v4 = vadd.f32 %v8052_v46, %v2805_v60  ;;  %v2378_v19 = vor.u32 %v2376_v54, %v2375_v26  ;;  %v2387_v8 = vor.u32 %v2385_v23, %v2384_v31 }
 0x2f0   : > { %v2251_v11 = vpop.f32.mrf.mxu0 }
 0x2f1   : > { %v2326_v10 = vadd.f32 %v2251_v11, %v2120_v6  ;;  %v2741_v63 = vpop.f32.mrf.mxu2  ;;  %v2907_v46 = vpop.f32.mrf.mxu3  ;;  %v2388_v22 = vsel %vm7091_vm8, %v2380_v58, %v2387_v8 }
 0x2f2   : > { %v2394_v43 = vunpack.c.l.b16 %v2388_v22 }
 0x2f3   : > { %v2532_v13 = vadd.f32 %v8057_v61, %v2326_v10  ;;  %v2379_v61 = vsel %vm7091_vm8, %v2371_v50, %v2378_v19  ;;  %v2470_v6 = vpop.f32.mrf.mxu1  ;;  %v9343_v19 = vld [vmem:[#allocation17_spill] sm:$0xff] }
 0x2f5   : > { %v2806_v3 = vadd.f32 %v8061_v27, %v2532_v13  ;;  %v2393_v27 = vunpack.c.l.b16 %v2379_v61 }
 0x2f6   : > { %6226 = vmatmul.msk.bf16.gmra.mxu3 %vm984_vm5, %v6473_v25 }
 0x2f7   : > { %v8130_v35 = vadd.f32 %v8065_v9, %v2806_v3  ;;  %v2396_v9 = vpack.c.b16 %v2394_v43, %v2393_v27 }
 0x2f8   : > { %v2254_v60 = vpop.f32.mrf.mxu0 }
 0x2f9   : > { %v2327_v59 = vadd.f32 %v2254_v60, %v7709_v51  ;;  %v2744_v10 = vpop.f32.mrf.mxu2  ;;  %v2910_v51 = vpop.f32.mrf.mxu3 }
 0x2fb   : > { %v2533_v11 = vadd.f32 %v8079_v17, %v2327_v59  ;;  %6072 = vmatmul.msk.bf16.gmra.mxu0 %vm984_vm5, %v7746_v48  ;;  %6096 = vmatmul.msk.bf16.gmra.mxu1 %vm984_vm5, %v2396_v9  ;;  %v2472_v21 = vpop.f32.mrf.mxu1  ;;  %v1235_v17 = vadd.f32 %v7739_v44, %v7742_v28 }
 0x2fd   : > { %v2807_v37 = vadd.f32 %v8088_v57, %v2533_v11  ;;  %v1447_v23 = vadd.f32 %v7729_v18, %v1235_v17 }
 0x2ff   : > { %v8146_v38 = vadd.f32 %v8093_v52, %v2807_v37  ;;  %v2124_v58 = vadd.f32 %v9343_v19, %v1447_v23 }
 0x300   : > { %v2256_v47 = vpop.f32.mrf.mxu0 }
 0x301   : > { %v2746_v13 = vpop.f32.mrf.mxu2  ;;  %v2912_v26 = vpop.f32.mrf.mxu3 }
 0x302   : > { %v9344_v26 = vld [vmem:[#allocation18_spill] sm:$0xff] }
 0x303   : > { %v2475_v31 = vpop.f32.mrf.mxu1 }
 0x308   : > { %v2259_v48 = vpop.f32.mrf.mxu0 }
 0x309   : > { %v2329_v54 = vadd.f32 %v2259_v48, %v7737_v7  ;;  %v2749_v3 = vpop.f32.mrf.mxu2  ;;  %v2915_v50 = vpop.f32.mrf.mxu3 }
 0x30b   : > { %v2535_v57 = vadd.f32 %v2465_v24, %v2329_v54  ;;  %6073 = vmatmul.msk.bf16.gmra.mxu0 %vm984_vm5, %v8048_v39  ;;  %v2477_v44 = vpop.f32.mrf.mxu1 }
 0x30d   : > { %v2809_v52 = vadd.f32 %v2739_v41, %v2535_v57 }
 0x30f   : > { %v8155_v8 = vadd.f32 %v2905_v29, %v2809_v52 }
 0x310   : > { %v2261_v60 = vpop.f32.mrf.mxu0 }
 0x311   : > { %v2330_v61 = vadd.f32 %v2261_v60, %v2124_v58  ;;  %v2751_v22 = vpop.f32.mrf.mxu2  ;;  %v2917_v59 = vpop.f32.mrf.mxu3 }
 0x313   : > { %v2536_v28 = vadd.f32 %v2467_v20, %v2330_v61  ;;  %v2480_v39 = vpop.f32.mrf.mxu1 }
 0x315   : > { %v2810_v7 = vadd.f32 %v2741_v63, %v2536_v28 }
 0x317   : > { %v8157_v25 = vadd.f32 %v2907_v46, %v2810_v7  ;;  %v1245_v46 = vadd.f32 %v7771_v56, %v7773_v14 }
 0x318   : > { %v2264_v18 = vpop.f32.mrf.mxu0 }
 0x319   : > { %v2331_v24 = vadd.f32 %v2264_v18, %v7757_v1  ;;  %v2754_v41 = vpop.f32.mrf.mxu2  ;;  %v2920_v43 = vpop.f32.mrf.mxu3 }
 0x31b   : > { %v2537_v27 = vadd.f32 %v2470_v6, %v2331_v24  ;;  %6074 = vmatmul.msk.bf16.gmra.mxu0 %vm984_vm5, %v8086_v32  ;;  %v2482_v20 = vpop.f32.mrf.mxu1  ;;  %v1451_v6 = vadd.f32 %v7765_v55, %v1245_v46  ;;  %v9345_v24 = vld [vmem:[#allocation20_spill] sm:$0xff] }
 0x31d   : > { %v2811_v29 = vadd.f32 %v2744_v10, %v2537_v27  ;;  %v2128_v17 = vadd.f32 %v9344_v26, %v1451_v6  ;;  %v9346_v27 = vld [vmem:[#allocation19_spill] sm:$0xff] }
 0x31f   : > { %v8162_v11 = vadd.f32 %v2910_v51, %v2811_v29 }
 0x320   : > { %v2266_v9 = vpop.f32.mrf.mxu0 }
 0x321   : > { %v2756_v37 = vpop.f32.mrf.mxu2  ;;  %v2922_v63 = vpop.f32.mrf.mxu3  ;;  %v9347_v9 = vld [vmem:[#allocation28_spill] sm:$0xff] }
 0x322   : > { %v9348_v37 = vld [vmem:[#allocation21_spill] sm:$0xff] }
 0x323   : > { %v2485_v21 = vpop.f32.mrf.mxu1 }
 0x328   : > { %v2269_v47 = vpop.f32.mrf.mxu0 }
 0x329   : > { %v2333_v1 = vadd.f32 %v2269_v47, %v7769_v12  ;;  %v2759_v32 = vpop.f32.mrf.mxu2  ;;  %v2925_v51 = vpop.f32.mrf.mxu3 }
 0x32b   : > { %v2539_v13 = vadd.f32 %v2475_v31, %v2333_v1  ;;  %6236 = vmatmul.msk.bf16.vlgmr.msrb.gmra.mxu0 %vm984_vm5, %v7828_v30  ;;  %v2487_v56 = vpop.f32.mrf.mxu1 }
 0x32d   : > { %v2813_v10 = vadd.f32 %v2749_v3, %v2539_v13 }
 0x32f   : > { %v8171_v48 = vadd.f32 %v2915_v50, %v2813_v10 }
 0x330   : > { %v2271_v54 = vpop.f32.mrf.mxu0 }
 0x331   : > { %v2334_v23 = vadd.f32 %v2271_v54, %v2128_v17  ;;  %v2761_v57 = vpop.f32.mrf.mxu2  ;;  %v2927_v52 = vpop.f32.mrf.mxu3  ;;  %v9349_v17 = vld [vmem:[#allocation22_spill] sm:$0xff] }
 0x333   : > { %v2540_v14 = vadd.f32 %v2477_v44, %v2334_v23  ;;  %v2490_v30 = vpop.f32.mrf.mxu1 }
 0x335   : > { %v2814_v12 = vadd.f32 %v2751_v22, %v2540_v14  ;;  %v9350_v14 = vld [vmem:[#allocation30_spill] sm:$0xff] }
 0x337   : > { %v8173_v19 = vadd.f32 %v2917_v59, %v2814_v12  ;;  %v1255_v59 = vadd.f32 %v7819_v2, %v7823_v15 }
 0x338   : > { %v2274_v55 = vpop.f32.mrf.mxu0 }
 0x339   : > { %v2335_v31 = vadd.f32 %v2274_v55, %v7799_v53  ;;  %v2764_v3 = vpop.f32.mrf.mxu2  ;;  %v2930_v60 = vpop.f32.mrf.mxu3 }
 0x33b   : > { %v2541_v58 = vadd.f32 %v2480_v39, %v2335_v31  ;;  %6237 = vmatmul.msk.bf16.gmra.mxu0 %vm984_vm5, %v7839_v33  ;;  %v2492_v44 = vpop.f32.mrf.mxu1  ;;  %v1455_v39 = vadd.f32 %v9346_v27, %v1255_v59 }
 0x33d   : > { %v2815_v50 = vadd.f32 %v2754_v41, %v2541_v58  ;;  %v2132_v63 = vadd.f32 %v9348_v37, %v1455_v39 }
 0x33f   : > { %v8178_v61 = vadd.f32 %v2920_v43, %v2815_v50 }
 0x340   : > { %v2276_v28 = vpop.f32.mrf.mxu0 }
 0x341   : > { %v2766_v7 = vpop.f32.mrf.mxu2  ;;  %v2932_v22 = vpop.f32.mrf.mxu3  ;;  %v9351_v28 = vld [vmem:[#allocation26_spill] sm:$0xff] }
 0x342   : > { %v9353_v22 = vld [vmem:[#allocation24_spill] sm:$0xff] }
 0x348   : > { %v2279_v18 = vpop.f32.mrf.mxu0  ;;  %v2495_v33 = vpop.f32.mrf.mxu1 }
 0x349   : > { %v2337_v53 = vadd.f32 %v2279_v18, %v9345_v24  ;;  %v2769_v41 = vpop.f32.mrf.mxu2  ;;  %v2935_v20 = vpop.f32.mrf.mxu3 }
 0x34b   : > { %v2543_v29 = vadd.f32 %v2485_v21, %v2337_v53  ;;  %6238 = vmatmul.msk.bf16.gmra.mxu0 %vm984_vm5, %v9347_v9  ;;  %v9355_v53 = vld [vmem:[#allocation36_spill] sm:$0xff] }
 0x34d   : > { %v2817_v43 = vadd.f32 %v2759_v32, %v2543_v29  ;;  %v9356_v29 = vld [vmem:[#allocation27_spill] sm:$0xff] }
 0x34f   : > { %v8187_v46 = vadd.f32 %v2925_v51, %v2817_v43 }
 0x350   : > { %v2281_v47 = vpop.f32.mrf.mxu0  ;;  %v2497_v15 = vpop.f32.mrf.mxu1 }
 0x351   : > { %v2338_v1 = vadd.f32 %v2281_v47, %v2132_v63  ;;  %v2771_v6 = vpop.f32.mrf.mxu2  ;;  %v2937_v10 = vpop.f32.mrf.mxu3 }
 0x353   : > { %v2544_v2 = vadd.f32 %v2487_v56, %v2338_v1 }
 0x355   : > { %v2818_v13 = vadd.f32 %v2761_v57, %v2544_v2 }
 0x357   : > { %v8189_v26 = vadd.f32 %v2927_v52, %v2818_v13  ;;  %v9352_v52 = vld [vmem:[#allocation25_spill] sm:$0xff] }
 0x358   : > { %v2284_v21 = vpop.f32.mrf.mxu0  ;;  %v2500_v32 = vpop.f32.mrf.mxu1  ;;  %v1265_v44 = vadd.f32 %v9352_v52, %v9351_v28  ;;  %v9359_v52 = vld [vmem:[#allocation34_spill] sm:$0xff] }
 0x359   : > { %v2339_v54 = vadd.f32 %v2284_v21, %v9349_v17  ;;  %v2774_v12 = vpop.f32.mrf.mxu2  ;;  %v2940_v55 = vpop.f32.mrf.mxu3 }
 0x35b   : > { %v2545_v23 = vadd.f32 %v2490_v30, %v2339_v54  ;;  %6239 = vmatmul.msk.bf16.gmra.mxu0 %vm984_vm5, %v9350_v14  ;;  %v9354_v30 = vld [vmem:[#allocation23_spill] sm:$0xff]  ;;  %v9357_v54 = vld [vmem:[#allocation29_spill] sm:$0xff] }
 0x35c   : > { %v1459_v18 = vadd.f32 %v9354_v30, %v1265_v44 }
 0x35d   : > { %v2819_v51 = vadd.f32 %v2764_v3, %v2545_v23 }
 0x35e   : > { %v2136_v9 = vadd.f32 %v9356_v29, %v1459_v18 }
 0x35f   : > { %v8194_v31 = vadd.f32 %v2930_v60, %v2819_v51  ;;  %v9358_v51 = vld [vmem:[#allocation38_spill] sm:$0xff] }
 0x360   : > { %v2286_v56 = vpop.f32.mrf.mxu0  ;;  %v2502_v58 = vpop.f32.mrf.mxu1 }
 0x361   : > { %v2776_v50 = vpop.f32.mrf.mxu2  ;;  %v2942_v57 = vpop.f32.mrf.mxu3 }
 0x368   : > { %v2289_v7 = vpop.f32.mrf.mxu0  ;;  %v2505_v3 = vpop.f32.mrf.mxu1 }
 0x369   : > { %v2341_v59 = vadd.f32 %v2289_v7, %v9353_v22  ;;  %v2779_v27 = vpop.f32.mrf.mxu2  ;;  %v2945_v39 = vpop.f32.mrf.mxu3  ;;  %v9361_v22 = vld [vmem:[#allocation32_spill] sm:$0xff] }
 0x36b   : > { %v2547_v24 = vadd.f32 %v2495_v33, %v2341_v59  ;;  %6240 = vmatmul.msk.bf16.gmra.mxu0 %vm984_vm5, %v9355_v53  ;;  %v9364_v53 = vld [vmem:[#allocation35_spill] sm:$0xff] }
 0x36d   : > { %v2821_v60 = vadd.f32 %v2769_v41, %v2547_v24  ;;  %v9363_v24 = vld [vmem:[#allocation39_spill] sm:$0xff] }
 0x36f   : > { %v8203_v43 = vadd.f32 %v2935_v20, %v2821_v60 }
 0x370   : > { %v2291_v37 = vpop.f32.mrf.mxu0  ;;  %v2507_v1 = vpop.f32.mrf.mxu1 }
 0x371   : > { %v2342_v63 = vadd.f32 %v2291_v37, %v2136_v9  ;;  %v2781_v2 = vpop.f32.mrf.mxu2  ;;  %v2947_v21 = vpop.f32.mrf.mxu3 }
 0x373   : > { %v2548_v47 = vadd.f32 %v2497_v15, %v2342_v63 }
 0x375   : > { %v2822_v13 = vadd.f32 %v2771_v6, %v2548_v47 }
 0x377   : > { %v8205_v17 = vadd.f32 %v2937_v10, %v2822_v13  ;;  %v9360_v10 = vld [vmem:[#allocation33_spill] sm:$0xff] }
 0x378   : > { %v2294_v33 = vpop.f32.mrf.mxu0  ;;  %v2510_v41 = vpop.f32.mrf.mxu1  ;;  %v1275_v44 = vadd.f32 %v9360_v10, %v9359_v52 }
 0x379   : > { %v2343_v23 = vadd.f32 %v2294_v33, %v9357_v54  ;;  %v2784_v56 = vpop.f32.mrf.mxu2  ;;  %v2950_v58 = vpop.f32.mrf.mxu3  ;;  %v9365_v33 = vld [vmem:[#allocation37_spill] sm:$0xff] }
 0x37b   : > { %v2549_v14 = vadd.f32 %v2500_v32, %v2343_v23  ;;  %6241 = vmatmul.msk.bf16.gmra.mxu0 %vm984_vm5, %v9358_v51  ;;  %v9362_v32 = vld [vmem:[#allocation31_spill] sm:$0xff] }
 0x37c   : > { %v1463_v30 = vadd.f32 %v9362_v32, %v1275_v44 }
 0x37d   : > { %v2823_v20 = vadd.f32 %v2774_v12, %v2549_v14 }
 0x37f   : > { %v8210_v50 = vadd.f32 %v2940_v55, %v2823_v20  ;;  %v2140_v55 = vadd.f32 %v9364_v53, %v1463_v30  ;;  %v4049_v30 = vlaneseq }
 0x380   : > { %v2296_v15 = vpop.f32.mrf.mxu0  ;;  %v2512_v57 = vpop.f32.mrf.mxu1 }
 0x381   : > { %v2786_v28 = vpop.f32.mrf.mxu2  ;;  %v2952_v6 = vpop.f32.mrf.mxu3  ;;  %v8257_v53 = vshrl.u32 %v4049_v30, 7 }
 0x383   : > { %vm4054_vm14 = vcmp.ge.s32.totalorder %v8257_v53, 1 }
 0x388   : > { %v2299_v7 = vpop.f32.mrf.mxu0 }
 0x389   : > { %v2345_v59 = vadd.f32 %v2299_v7, %v9361_v22 }
 0x38b   : > { %v2551_v18 = vadd.f32 %v2505_v3, %v2345_v59  ;;  %6242 = vmatmul.msk.bf16.gmra.mxu0 %vm984_vm5, %v9363_v24 }
 0x38d   : > { %v2825_v12 = vadd.f32 %v2779_v27, %v2551_v18 }
 0x38f   : > { %v8219_v60 = vadd.f32 %v2945_v39, %v2825_v12  ;;  %v8231_v39 = vld [vmem:[%s9254_s4] ss:$0 sm:$0xff] }
 0x390   : > { %v2301_v29 = vpop.f32.mrf.mxu0 }
 0x391   : > { %v2346_v9 = vadd.f32 %v2301_v29, %v2140_v55 }
 0x393   : > { %v2552_v37 = vadd.f32 %v2507_v1, %v2346_v9 }
 0x395   : > { %v2826_v63 = vadd.f32 %v2781_v2, %v2552_v37 }
 0x397   : > { %v8221_v47 = vadd.f32 %v2947_v21, %v2826_v63  ;;  %v8237_v21 = vld [vmem:[%s9255_s5] ss:$0 sm:$0xff] }
 0x398   : > { %v2304_v13 = vpop.f32.mrf.mxu0 }
 0x399   : > { %v2347_v54 = vadd.f32 %v2304_v13, %v9365_v33 }
 0x39b   : > { %v2553_v23 = vadd.f32 %v2510_v41, %v2347_v54  ;;  %6243 = vmatmul.msk.bf16.gmra.mxu0 %vm984_vm5, %v7925_v49 }
 0x39d   : > { %v2827_v3 = vadd.f32 %v2784_v56, %v2553_v23 }
 0x39f   : > { %v8226_v14 = vadd.f32 %v2950_v58, %v2827_v3 }
 0x3a0   : > { %v2306_v27 = vpop.f32.mrf.mxu0 }
 0x3a8   : > { %v3021_v1 = vpop.f32.mrf.mxu0 }
 0x3a9   : > { %v3121_v2 = vadd.f32 %v3021_v1, %v7943_v40 }
 0x3ab   : > { %v3165_v51 = vmul.f32 %v8231_v39, %v3121_v2  ;;  %6244 = vmatmul.msk.bf16.gmra.mxu0 %vm984_vm5, %v7935_v42 }
 0x3ad   : > { %v3209_v49 = vadd.f32 %v8237_v21, %v3165_v51 }
 0x3af   : > { %v6256_v41 = vmul.f32 -1.442695, %v3209_v49 }
 0x3b0   : > { %v3023_v56 = vpop.f32.mrf.mxu0 }
 0x3b1   : > { %6537 = vpow2.f32 %v6256_v41  ;;  %v3122_v20 = vadd.f32 %v3023_v56, %v7945_v36 }
 0x3b3   : > { %v3166_v40 = vmul.f32 %v8231_v39, %v3122_v20 }
 0x3b5   : > { %v8246_v58 = vadd.f32 %v8237_v21, %v3166_v40 }
 0x3b7   : > { %v6538_v15 = vpop.eup %6537  ;;  %v6257_v57 = vmul.f32 -1.442695, %v8246_v58 }
 0x3b8   : > { %v3369_v28 = vadd.f32 1.0, %v6538_v15  ;;  %v3026_v6 = vpop.f32.mrf.mxu0 }
 0x3b9   : > { %6539 = vpow2.f32 %v6257_v57  ;;  %v3123_v42 = vadd.f32 %v3026_v6, %v7958_v0 }
 0x3ba   : > { %6541 = vrcp.f32 %v3369_v28  ;;  %v3420_v18 = vand.u32 2147483648, %v3369_v28  ;;  %v3418_v12 = vand.u32 2147483647, %v3369_v28  ;;  %vm3414_vm11 = vweird.f32 %v3369_v28 }
 0x3bb   : > { %v3167_v52 = vmul.f32 %v8231_v39, %v3123_v42  ;;  %6245 = vmatmul.msk.bf16.gmra.mxu0 %vm984_vm5, %v7950_v16 }
 0x3bc   : > { %v3421_v9 = vor.u32 1.1754944e-38, %v3420_v18  ;;  %vm3419_vm13 = vcmp.eq.f32.partialorder %v3418_v12, 8.507059e+37 }
 0x3bd   : > { %v8254_v36 = vadd.f32 %v8237_v21, %v3167_v52 }
 0x3bf   : > { %v6540_v10 = vpop.eup %6539  ;;  %v6258_v44 = vmul.f32 -1.442695, %v8254_v36 }
 0x3c0   : > { %v6542_v7 = vpop.eup %6541  ;;  %v3370_v22 = vadd.f32 1.0, %v6540_v10  ;;  %v3028_v59 = vpop.f32.mrf.mxu0 }
 0x3c1   : > { %v3410_v32 = vmul.f32 %v6542_v7, %v3369_v28  ;;  %6543 = vpow2.f32 %v6258_v44  ;;  %vm3415_vm10 = vweird.f32 %v6542_v7 }
 0x3c2   : > { %6545 = vrcp.f32 %v3370_v22  ;;  %vm3416_vm12 = vmor %vm3414_vm11, %vm3415_vm10  ;;  %v3433_v2 = vand.u32 2147483647, %v3370_v22  ;;  %v3435_v51 = vand.u32 2147483648, %v3370_v22  ;;  %vm3429_vm0 = vweird.f32 %v3370_v22 }
 0x3c3   : > { %v3411_v0 = vsub.f32 1.0, %v3410_v32 }
 0x3c4   : > { %vm3434_vm3 = vcmp.eq.f32.partialorder %v3433_v2, 8.507059e+37 }
 0x3c5   : > { %v3412_v24 = vmul.f32 %v6542_v7, %v3411_v0  ;;  %v8275_v0 = vadd.s32 16, %v8257_v53 }
 0x3c7   : > { %v6544_v16 = vpop.eup %6543  ;;  %v3413_v55 = vadd.f32 %v6542_v7, %v3412_v24  ;;  %vm4060_vm10 = vcmp.le.s32.totalorder %v8275_v0, 16 }
 0x3c8   : > { %v6546_v29 = vpop.eup %6545  ;;  %v3371_v37 = vadd.f32 1.0, %v6544_v16  ;;  %v3031_v63 = vpop.f32.mrf.mxu0 }
 0x3c9   : > { %v3417_v13 = vsel %vm3416_vm12, %v6542_v7, %v3413_v55  ;;  %v3425_v33 = vmul.f32 %v6546_v29, %v3370_v22  ;;  %v3125_v54 = vadd.f32 %v3031_v63, %v7971_v45  ;;  %vm3430_vm15 = vweird.f32 %v6546_v29 }
 0x3ca   : > { %v3422_v23 = vsel %vm3419_vm13, %v3421_v9, %v3417_v13  ;;  %6547 = vrcp.f32 %v3371_v37  ;;  %vm3431_vm1 = vmor %vm3429_vm0, %vm3430_vm15  ;;  %v3450_v7 = vand.u32 2147483648, %v3371_v37  ;;  %v3448_v30 = vand.u32 2147483647, %v3371_v37 }
 0x3cb   : > { %v4009_v3 = vmul.f32 %v3422_v23, %v3209_v49  ;;  %v3426_v27 = vsub.f32 1.0, %v3425_v33  ;;  %v3169_v1 = vmul.f32 %v8231_v39, %v3125_v54  ;;  %6246 = vmatmul.msk.bf16.gmra.mxu0 %vm984_vm5, %v7963_v5  ;;  %v3436_v5 = vor.u32 1.1754944e-38, %v3435_v51 }
 0x3cc   : > { %vm3444_vm6 = vweird.f32 %v3371_v37  ;;  %vm3449_vm8 = vcmp.eq.f32.partialorder %v3448_v30, 8.507059e+37 }
 0x3cd   : > { %v4074_v41 = vsel %vm4054_vm14, %v4009_v3, 0.0  ;;  %v3427_v56 = vmul.f32 %v6546_v29, %v3426_v27  ;;  %v8267_v45 = vadd.f32 %v8237_v21, %v3169_v1 }
 0x3ce   : > { %v4114_v20 = vpack.c.bf16 %v4074_v41, %v4074_v41 }
 0x3cf   : > { %v3428_v40 = vadd.f32 %v6546_v29, %v3427_v56  ;;  %v6260_v49 = vmul.f32 -1.442695, %v8267_v45 }
 0x3d0   : > { %v6548_v15 = vpop.eup %6547  ;;  %4155 = vst.msk [vmem:[#allocation3] sm:$0xf] %vm4154_vm9, %v4114_v20  ;;  %v3033_v57 = vpop.f32.mrf.mxu0 }
 0x3d1   : > { %v3432_v28 = vsel %vm3431_vm1, %v6546_v29, %v3428_v40  ;;  %v3440_v6 = vmul.f32 %v6548_v15, %v3371_v37  ;;  %6549 = vpow2.f32 %v6260_v49  ;;  %v3126_v52 = vadd.f32 %v3033_v57, %v7974_v62  ;;  %v9366_v37 = vld [vmem:[#allocation40_spill] sm:$0xff] }
 0x3d2   : > { %v3437_v42 = vsel %vm3434_vm3, %v3436_v5, %v3432_v28  ;;  %vm3445_vm4 = vweird.f32 %v6548_v15 }
 0x3d3   : > { %v4010_v10 = vmul.f32 %v3437_v42, %v8246_v58  ;;  %v3441_v44 = vsub.f32 1.0, %v3440_v6  ;;  %v3170_v22 = vmul.f32 %v8231_v39, %v3126_v52  ;;  %vm3446_vm7 = vmor %vm3444_vm6, %vm3445_vm4  ;;  %v3451_v58 = vor.u32 1.1754944e-38, %v3450_v7  ;;  %v9367_v42 = vld [vmem:[#allocation42_spill] sm:$0xff] }
 0x3d5   : > { %v4115_v59 = vpack.c.bf16 %v4010_v10, %v4010_v10  ;;  %v3442_v32 = vmul.f32 %v6548_v15, %v3441_v44  ;;  %v8278_v18 = vadd.f32 %v8237_v21, %v3170_v22 }
 0x3d7   : > { %v6550_v24 = vpop.eup %6549  ;;  %4156 = vst.msk [vmem:[#allocation3 + $0x4] sm:$0xf] %vm4154_vm9, %v4115_v59  ;;  %v3443_v62 = vadd.f32 %v6548_v15, %v3442_v32  ;;  %v6261_v16 = vmul.f32 -1.442695, %v8278_v18  ;;  %v9368_v59 = vld [vmem:[#allocation41_spill] sm:$0xff] }
 0x3d8   : > { %v3373_v12 = vadd.f32 1.0, %v6550_v24  ;;  %v3036_v55 = vpop.f32.mrf.mxu0 }
 0x3d9   : > { %v3447_v29 = vsel %vm3446_vm7, %v6548_v15, %v3443_v62  ;;  %v3127_v9 = vadd.f32 %v3036_v55, %v7987_v34 }
 0x3da   : > { %v3452_v63 = vsel %vm3449_vm8, %v3451_v58, %v3447_v29  ;;  %6551 = vrcp.f32 %v3373_v12  ;;  %v3480_v56 = vand.u32 2147483648, %v3373_v12  ;;  %v3478_v40 = vand.u32 2147483647, %v3373_v12 }
 0x3db   : > { %v4011_v13 = vmul.f32 %v3452_v63, %v8254_v36  ;;  %6553 = vpow2.f32 %v6261_v16  ;;  %v3171_v33 = vmul.f32 %v8231_v39, %v3127_v9  ;;  %6247 = vmatmul.msk.bf16.gmra.mxu0 %vm984_vm5, %v9366_v37  ;;  %vm3474_vm12 = vweird.f32 %v3373_v12 }
 0x3dc   : > { %v3481_v5 = vor.u32 1.1754944e-38, %v3480_v56  ;;  %vm3479_vm15 = vcmp.eq.f32.partialorder %v3478_v40, 8.507059e+37 }
 0x3dd   : > { %v4076_v54 = vsel %vm4060_vm10, %v4011_v13, 0.0  ;;  %v8291_v23 = vadd.f32 %v8237_v21, %v3171_v33  ;;  %v9369_v33 = vld [vmem:[#allocation43_spill] sm:$0xff] }
 0x3de   : > { %v4116_v3 = vpack.c.bf16 %v4076_v54, %v4076_v54 }
 0x3df   : > { %v6262_v34 = vmul.f32 -1.442695, %v8291_v23 }
 0x3e0   : > { %v6552_v27 = vpop.eup %6551  ;;  %4157 = vst.msk [vmem:[#allocation3 + $0x8] sm:$0xf] %vm4154_vm9, %v4116_v3  ;;  %v3038_v1 = vpop.f32.mrf.mxu0 }
 0x3e1   : > { %v6554_v36 = vpop.eup %6553  ;;  %v3470_v2 = vmul.f32 %v6552_v27, %v3373_v12  ;;  %6555 = vpow2.f32 %v6262_v34  ;;  %vm3475_vm11 = vweird.f32 %v6552_v27 }
 0x3e2   : > { %v3374_v51 = vadd.f32 1.0, %v6554_v36  ;;  %vm3476_vm13 = vmor %vm3474_vm12, %vm3475_vm11 }
 0x3e3   : > { %v3471_v41 = vsub.f32 1.0, %v3470_v2 }
 0x3e4   : > { %6557 = vrcp.f32 %v3374_v51  ;;  %v3495_v58 = vand.u32 2147483648, %v3374_v51  ;;  %v3493_v55 = vand.u32 2147483647, %v3374_v51  ;;  %vm3489_vm1 = vweird.f32 %v3374_v51 }
 0x3e5   : > { %v3472_v20 = vmul.f32 %v6552_v27, %v3471_v41 }
 0x3e6   : > { %v3496_v54 = vor.u32 1.1754944e-38, %v3495_v58  ;;  %vm3494_vm4 = vcmp.eq.f32.partialorder %v3493_v55, 8.507059e+37 }
 0x3e7   : > { %v6556_v49 = vpop.eup %6555  ;;  %v3473_v15 = vadd.f32 %v6552_v27, %v3472_v20 }
 0x3e8   : > { %v3375_v57 = vadd.f32 1.0, %v6556_v49  ;;  %v3041_v28 = vpop.f32.mrf.mxu0 }
 0x3e9   : > { %v3477_v6 = vsel %vm3476_vm13, %v6552_v27, %v3473_v15  ;;  %v3129_v52 = vadd.f32 %v3041_v28, %v9367_v42 }
 0x3ea   : > { %v6558_v10 = vpop.eup %6557  ;;  %v3482_v44 = vsel %vm3479_vm15, %v3481_v5, %v3477_v6  ;;  %6559 = vrcp.f32 %v3375_v57  ;;  %v3508_v36 = vand.u32 2147483647, %v3375_v57  ;;  %v3510_v2 = vand.u32 2147483648, %v3375_v57 }
 0x3eb   : > { %v4013_v7 = vmul.f32 %v3482_v44, %v8267_v45  ;;  %v3485_v22 = vmul.f32 %v6558_v10, %v3374_v51  ;;  %6248 = vmatmul.msk.bf16.gmra.mxu0 %vm984_vm5, %v9368_v59  ;;  %v3173_v32 = vmul.f32 %v8231_v39, %v3129_v52  ;;  %vm3490_vm0 = vweird.f32 %v6558_v10 }
 0x3ec   : > { %vm3491_vm3 = vmor %vm3489_vm1, %vm3490_vm0  ;;  %vm3504_vm7 = vweird.f32 %v3375_v57  ;;  %vm3509_vm11 = vcmp.eq.f32.partialorder %v3508_v36, 8.507059e+37  ;;  %v3511_v5 = vor.u32 1.1754944e-38, %v3510_v2 }
 0x3ed   : > { %v4078_v30 = vsel %vm4054_vm14, %v4013_v7, 0.0  ;;  %v3486_v24 = vsub.f32 1.0, %v3485_v22  ;;  %v8303_v12 = vadd.f32 %v8237_v21, %v3173_v32  ;;  %v9371_v7 = vld [vmem:[#allocation44_spill] sm:$0xff] }
 0x3ee   : > { %v4118_v62 = vpack.c.bf16 %v4078_v30, %v4078_v30 }
 0x3ef   : > { %v3487_v16 = vmul.f32 %v6558_v10, %v3486_v24  ;;  %v6264_v45 = vmul.f32 -1.442695, %v8303_v12 }
 0x3f0   : > { %v6560_v29 = vpop.eup %6559  ;;  %4159 = vst.msk [vmem:[#allocation3 + $0x10] sm:$0xf] %vm4154_vm9, %v4118_v62  ;;  %v3043_v9 = vpop.f32.mrf.mxu0 }
 0x3f1   : > { %v3488_v63 = vadd.f32 %v6558_v10, %v3487_v16  ;;  %v3500_v13 = vmul.f32 %v6560_v29, %v3375_v57  ;;  %v3130_v37 = vadd.f32 %v3043_v9, %v9369_v33  ;;  %6561 = vpow2.f32 %v6264_v45 }
 0x3f2   : > { %vm3505_vm6 = vweird.f32 %v6560_v29 }
 0x3f3   : > { %v3492_v3 = vsel %vm3491_vm3, %v6558_v10, %v3488_v63  ;;  %v3501_v34 = vsub.f32 1.0, %v3500_v13  ;;  %v3174_v27 = vmul.f32 %v8231_v39, %v3130_v37  ;;  %vm3506_vm8 = vmor %vm3504_vm7, %vm3505_vm6 }
 0x3f4   : > { %v3497_v1 = vsel %vm3494_vm4, %v3496_v54, %v3492_v3 }
 0x3f5   : > { %v4014_v41 = vmul.f32 %v3497_v1, %v8278_v18  ;;  %v3502_v56 = vmul.f32 %v6560_v29, %v3501_v34  ;;  %v8311_v51 = vadd.f32 %v8237_v21, %v3174_v27  ;;  %v9370_v18 = vld [vmem:[#allocation45_spill] sm:$0xff]  ;;  %v9372_v34 = vld [vmem:[#allocation4_spill] sm:$0xff] }
 0x3f7   : > { %v4119_v20 = vpack.c.bf16 %v4014_v41, %v4014_v41  ;;  %v3503_v40 = vadd.f32 %v6560_v29, %v3502_v56  ;;  %v6265_v49 = vmul.f32 -1.442695, %v8311_v51  ;;  %v6562_v15 = vpop.eup %6561 }
 0x3f8   : > { %v3046_v28 = vpop.f32.mrf.mxu0  ;;  %v3377_v42 = vadd.f32 1.0, %v6562_v15 }
 0x3f9   : > { %4160 = vst.msk [vmem:[#allocation3 + $0x14] sm:$0xf] %vm4154_vm9, %v4119_v20  ;;  %v3507_v6 = vsel %vm3506_vm8, %v6560_v29, %v3503_v40  ;;  %6563 = vpow2.f32 %v6265_v49  ;;  %v3131_v52 = vadd.f32 %v3046_v28, %v9370_v18  ;;  %v6657_v20 = vld [vmem:[#allocation2 + $0xe0] sm:$0xff] }
 0x3fa   : > { %v3512_v10 = vsel %vm3509_vm11, %v3511_v5, %v3507_v6  ;;  %6565 = vrcp.f32 %v3377_v42  ;;  %v3540_v29 = vand.u32 2147483648, %v3377_v42  ;;  %v3538_v9 = vand.u32 2147483647, %v3377_v42 }
 0x3fb   : > { %v4015_v44 = vmul.f32 %v3512_v10, %v8291_v23  ;;  %6249 = vmatmul.msk.bf16.gmra.mxu0 %vm984_vm5, %v9371_v7  ;;  %v3175_v57 = vmul.f32 %v8231_v39, %v3131_v52  ;;  %vm3534_vm13 = vweird.f32 %v3377_v42  ;;  %v9373_v7 = vld [vmem:[#allocation5_spill] sm:$0xff] }
 0x3fc   : > { %v3541_v54 = vor.u32 1.1754944e-38, %v3540_v29  ;;  %vm3539_vm0 = vcmp.eq.f32.partialorder %v3538_v9, 8.507059e+37 }
 0x3fd   : > { %v4080_v22 = vsel %vm4060_vm10, %v4015_v44, 0.0  ;;  %v8323_v32 = vadd.f32 %v8237_v21, %v3175_v57 }
 0x3fe   : > { %v4120_v59 = vpack.c.bf16 %v4080_v22, %v4080_v22 }
 0x3ff   : > { %v6564_v30 = vpop.eup %6563  ;;  %v6266_v62 = vmul.f32 -1.442695, %v8323_v32 }
 0x400   : > { %4161 = vst.msk [vmem:[#allocation3 + $0x18] sm:$0xf] %vm4154_vm9, %v4120_v59  ;;  %v3378_v24 = vadd.f32 1.0, %v6564_v30  ;;  %v3048_v23 = vpop.f32.mrf.mxu0  ;;  %v6566_v58 = vpop.eup %6565 }
 0x401   : > { %v3530_v16 = vmul.f32 %v6566_v58, %v3377_v42  ;;  %vm3535_vm12 = vweird.f32 %v6566_v58 }
 0x402   : > { %6567 = vrcp.f32 %v3378_v24  ;;  %vm3536_vm15 = vmor %vm3534_vm13, %vm3535_vm12  ;;  %v3555_v49 = vand.u32 2147483648, %v3378_v24  ;;  %v3553_v5 = vand.u32 2147483647, %v3378_v24  ;;  %vm3549_vm3 = vweird.f32 %v3378_v24 }
 0x403   : > { %6569 = vpow2.f32 %v6266_v62  ;;  %v3531_v55 = vsub.f32 1.0, %v3530_v16 }
 0x404   : > { %v3556_v10 = vor.u32 1.1754944e-38, %v3555_v49  ;;  %vm3554_vm6 = vcmp.eq.f32.partialorder %v3553_v5, 8.507059e+37 }
 0x405   : > { %v3532_v45 = vmul.f32 %v6566_v58, %v3531_v55 }
 0x407   : > { %v3533_v13 = vadd.f32 %v6566_v58, %v3532_v45 }
 0x408   : > { %v6568_v63 = vpop.eup %6567  ;;  %v3051_v33 = vpop.f32.mrf.mxu0 }
 0x409   : > { %v6570_v37 = vpop.eup %6569  ;;  %v3545_v3 = vmul.f32 %v6568_v63, %v3378_v24  ;;  %v3133_v27 = vadd.f32 %v3051_v33, %v9372_v34  ;;  %v3537_v1 = vsel %vm3536_vm15, %v6566_v58, %v3533_v13  ;;  %vm3550_vm1 = vweird.f32 %v6568_v63 }
 0x40a   : > { %v3379_v36 = vadd.f32 1.0, %v6570_v37  ;;  %v3542_v2 = vsel %vm3539_vm0, %v3541_v54, %v3537_v1  ;;  %vm3551_vm4 = vmor %vm3549_vm3, %vm3550_vm1  ;;  %v9374_v37 = vld [vmem:[#allocation6_spill] sm:$0xff]  ;;  %v6658_v1 = vld [vmem:[#allocation2 + $0xe8] sm:$0xff] }
 0x40b   : > { %v3546_v41 = vsub.f32 1.0, %v3545_v3  ;;  %v3177_v56 = vmul.f32 %v8231_v39, %v3133_v27  ;;  %6250 = vmatmul.msk.bf16.gmra.mxu0 %vm984_vm5, %v6657_v20  ;;  %v4017_v40 = vmul.f32 %v3542_v2, %v8303_v12 }
 0x40c   : > { %6571 = vrcp.f32 %v3379_v36  ;;  %v3570_v55 = vand.u32 2147483648, %v3379_v36  ;;  %v3568_v9 = vand.u32 2147483647, %v3379_v36  ;;  %vm3564_vm8 = vweird.f32 %v3379_v36 }
 0x40d   : > { %v3547_v15 = vmul.f32 %v6568_v63, %v3546_v41  ;;  %v8332_v28 = vadd.f32 %v8237_v21, %v3177_v56  ;;  %v4082_v6 = vsel %vm4054_vm14, %v4017_v40, 0.0 }
 0x40e   : > { %v4122_v42 = vpack.c.bf16 %v4082_v6, %v4082_v6  ;;  %v3571_v3 = vor.u32 1.1754944e-38, %v3570_v55  ;;  %vm3569_vm12 = vcmp.eq.f32.partialorder %v3568_v9, 8.507059e+37 }
 0x40f   : > { %v3548_v18 = vadd.f32 %v6568_v63, %v3547_v15  ;;  %v6268_v52 = vmul.f32 -1.442695, %v8332_v28 }
 0x410   : > { %v3053_v44 = vpop.f32.mrf.mxu0  ;;  %4163 = vst.msk [vmem:[#allocation3 + $0x20] sm:$0xf] %vm4154_vm9, %v4122_v42 }
 0x411   : > { %v3552_v12 = vsel %vm3551_vm4, %v6568_v63, %v3548_v18  ;;  %6573 = vpow2.f32 %v6268_v52  ;;  %v3134_v57 = vadd.f32 %v3053_v44, %v9373_v7 }
 0x412   : > { %v6572_v22 = vpop.eup %6571  ;;  %v3557_v59 = vsel %vm3554_vm6, %v3556_v10, %v3552_v12 }
 0x413   : > { %v4018_v30 = vmul.f32 %v3557_v59, %v8311_v51  ;;  %v3560_v62 = vmul.f32 %v6572_v22, %v3379_v36  ;;  %v3178_v23 = vmul.f32 %v8231_v39, %v3134_v57  ;;  %vm3565_vm7 = vweird.f32 %v6572_v22 }
 0x414   : > { %vm3566_vm11 = vmor %vm3564_vm8, %vm3565_vm7 }
 0x415   : > { %v4123_v24 = vpack.c.bf16 %v4018_v30, %v4018_v30  ;;  %v3561_v58 = vsub.f32 1.0, %v3560_v62  ;;  %v8342_v16 = vadd.f32 %v8237_v21, %v3178_v23 }
 0x417   : > { %v6574_v29 = vpop.eup %6573  ;;  %4164 = vst.msk [vmem:[#allocation3 + $0x24] sm:$0xf] %vm4154_vm9, %v4123_v24  ;;  %v3562_v45 = vmul.f32 %v6572_v22, %v3561_v58  ;;  %v6269_v63 = vmul.f32 -1.442695, %v8342_v16 }
 0x418   : > { %v3381_v13 = vadd.f32 1.0, %v6574_v29  ;;  %v3056_v33 = vpop.f32.mrf.mxu0 }
 0x419   : > { %v3563_v51 = vadd.f32 %v6572_v22, %v3562_v45  ;;  %6575 = vpow2.f32 %v6269_v63  ;;  %v3135_v54 = vadd.f32 %v3056_v33, %v9374_v37  ;;  %v6659_v45 = vld [vmem:[#allocation2 + $0xf8] sm:$0xff] }
 0x41a   : > { %6577 = vrcp.f32 %v3381_v13  ;;  %v3598_v10 = vand.u32 2147483647, %v3381_v13  ;;  %vm3594_vm15 = vweird.f32 %v3381_v13 }
 0x41b   : > { %v3567_v34 = vsel %vm3566_vm11, %v6572_v22, %v3563_v51  ;;  %v3179_v27 = vmul.f32 %v8231_v39, %v3135_v54  ;;  %6251 = vmatmul.msk.bf16.gmra.mxu0 %vm984_vm5, %v6658_v1 }
 0x41c   : > { %v3572_v2 = vsel %vm3569_vm12, %v3571_v3, %v3567_v34  ;;  %vm3599_vm1 = vcmp.eq.f32.partialorder %v3598_v10, 8.507059e+37 }
 0x41d   : > { %v4019_v41 = vmul.f32 %v3572_v2, %v8323_v32  ;;  %v8351_v56 = vadd.f32 %v8237_v21, %v3179_v27  ;;  %v3600_v32 = vand.u32 2147483648, %v3381_v13 }
 0x41f   : > { %v6576_v36 = vpop.eup %6575  ;;  %v4084_v20 = vsel %vm4060_vm10, %v4019_v41, 0.0  ;;  %v6270_v40 = vmul.f32 -1.442695, %v8351_v56  ;;  %v3601_v57 = vor.u32 1.1754944e-38, %v3600_v32 }
 0x420   : > { %v6578_v49 = vpop.eup %6577  ;;  %v4124_v15 = vpack.c.bf16 %v4084_v20, %v4084_v20  ;;  %v3382_v5 = vadd.f32 1.0, %v6576_v36  ;;  %v3058_v6 = vpop.f32.mrf.mxu0 }
 0x421   : > { %v3590_v42 = vmul.f32 %v6578_v49, %v3381_v13  ;;  %6579 = vpow2.f32 %v6270_v40  ;;  %vm3595_vm13 = vweird.f32 %v6578_v49 }
 0x422   : > { %4165 = vst.msk [vmem:[#allocation3 + $0x28] sm:$0xf] %vm4154_vm9, %v4124_v15  ;;  %6581 = vrcp.f32 %v3382_v5  ;;  %vm3596_vm0 = vmor %vm3594_vm15, %vm3595_vm13  ;;  %v3613_v9 = vand.u32 2147483647, %v3382_v5  ;;  %v3615_v63 = vand.u32 2147483648, %v3382_v5  ;;  %vm3609_vm4 = vweird.f32 %v3382_v5 }
 0x423   : > { %v3591_v18 = vsub.f32 1.0, %v3590_v42 }
 0x424   : > { %v3616_v3 = vor.u32 1.1754944e-38, %v3615_v63  ;;  %vm3614_vm7 = vcmp.eq.f32.partialorder %v3613_v9, 8.507059e+37 }
 0x425   : > { %v3592_v52 = vmul.f32 %v6578_v49, %v3591_v18 }
 0x427   : > { %v6580_v44 = vpop.eup %6579  ;;  %v3593_v12 = vadd.f32 %v6578_v49, %v3592_v52 }
 0x428   : > { %v6582_v7 = vpop.eup %6581  ;;  %v3383_v22 = vadd.f32 1.0, %v6580_v44  ;;  %v3061_v59 = vpop.f32.mrf.mxu0 }
 0x429   : > { %v3597_v30 = vsel %vm3596_vm0, %v6578_v49, %v3593_v12  ;;  %v3605_v62 = vmul.f32 %v6582_v7, %v3382_v5  ;;  %v3137_v23 = vadd.f32 %v3061_v59, %v8121_v4  ;;  %vm3610_vm3 = vweird.f32 %v6582_v7 }
 0x42a   : > { %v3602_v24 = vsel %vm3599_vm1, %v3601_v57, %v3597_v30  ;;  %6583 = vrcp.f32 %v3383_v22  ;;  %vm3611_vm6 = vmor %vm3609_vm4, %vm3610_vm3  ;;  %v3630_v40 = vand.u32 2147483648, %v3383_v22  ;;  %v3628_v6 = vand.u32 2147483647, %v3383_v22  ;;  %v6660_v30 = vld [vmem:[#allocation2 + $0x100] sm:$0xff] }
 0x42b   : > { %v4021_v58 = vmul.f32 %v3602_v24, %v8332_v28  ;;  %v3606_v55 = vsub.f32 1.0, %v3605_v62  ;;  %v3181_v29 = vmul.f32 %v8231_v39, %v3137_v23  ;;  %6252 = vmatmul.msk.bf16.gmra.mxu0 %vm984_vm5, %v6659_v45  ;;  %vm3624_vm11 = vweird.f32 %v3383_v22 }
 0x42c   : > { %vm3629_vm13 = vcmp.eq.f32.partialorder %v3628_v6, 8.507059e+37 }
 0x42d   : > { %v4086_v13 = vsel %vm4054_vm14, %v4021_v58, 0.0  ;;  %v3607_v33 = vmul.f32 %v6582_v7, %v3606_v55  ;;  %v8364_v51 = vadd.f32 %v8237_v21, %v3181_v29 }
 0x42e   : > { %v4126_v4 = vpack.c.bf16 %v4086_v13, %v4086_v13 }
 0x42f   : > { %v3608_v37 = vadd.f32 %v6582_v7, %v3607_v33  ;;  %v6272_v28 = vmul.f32 -1.442695, %v8364_v51 }
 0x430   : > { %v6584_v54 = vpop.eup %6583  ;;  %4167 = vst.msk [vmem:[#allocation3 + $0x30] sm:$0xf] %vm4154_vm9, %v4126_v4  ;;  %v3063_v34 = vpop.f32.mrf.mxu0 }
 0x431   : > { %v3612_v27 = vsel %vm3611_vm6, %v6582_v7, %v3608_v37  ;;  %v3620_v1 = vmul.f32 %v6584_v54, %v3383_v22  ;;  %6585 = vpow2.f32 %v6272_v28  ;;  %v3138_v41 = vadd.f32 %v3063_v34, %v8130_v35  ;;  %v6474_v37 = vld [vmem:[#allocation2 + $0x110] sm:$0xff] }
 0x432   : > { %v3617_v2 = vsel %vm3614_vm7, %v3616_v3, %v3612_v27  ;;  %vm3625_vm8 = vweird.f32 %v6584_v54  ;;  %v3631_v35 = vor.u32 1.1754944e-38, %v3630_v40 }
 0x433   : > { %v4022_v36 = vmul.f32 %v3617_v2, %v8342_v16  ;;  %v3621_v20 = vsub.f32 1.0, %v3620_v1  ;;  %v3182_v49 = vmul.f32 %v8231_v39, %v3138_v41  ;;  %vm3626_vm12 = vmor %vm3624_vm11, %vm3625_vm8 }
 0x435   : > { %v4127_v15 = vpack.c.bf16 %v4022_v36, %v4022_v36  ;;  %v3622_v5 = vmul.f32 %v6584_v54, %v3621_v20  ;;  %v8372_v42 = vadd.f32 %v8237_v21, %v3182_v49 }
 0x437   : > { %v6586_v18 = vpop.eup %6585  ;;  %4168 = vst.msk [vmem:[#allocation3 + $0x34] sm:$0xf] %vm4154_vm9, %v4127_v15  ;;  %v3623_v32 = vadd.f32 %v6584_v54, %v3622_v5  ;;  %v6273_v16 = vmul.f32 -1.442695, %v8372_v42 }
 0x438   : > { %v3385_v52 = vadd.f32 1.0, %v6586_v18  ;;  %v3066_v10 = vpop.f32.mrf.mxu0 }
 0x439   : > { %v3627_v44 = vsel %vm3626_vm12, %v6584_v54, %v3623_v32  ;;  %v3139_v12 = vadd.f32 %v3066_v10, %v8146_v38 }
 0x43a   : > { %v3632_v7 = vsel %vm3629_vm13, %v3631_v35, %v3627_v44  ;;  %6587 = vrcp.f32 %v3385_v52  ;;  %v3660_v9 = vand.u32 2147483648, %v3385_v52  ;;  %v3658_v13 = vand.u32 2147483647, %v3385_v52 }
 0x43b   : > { %v4023_v57 = vmul.f32 %v3632_v7, %v8351_v56  ;;  %6589 = vpow2.f32 %v6273_v16  ;;  %v3183_v59 = vmul.f32 %v8231_v39, %v3139_v12  ;;  %6253 = vmatmul.msk.bf16.gmra.mxu0 %vm984_vm5, %v6660_v30  ;;  %vm3654_vm0 = vweird.f32 %v3385_v52 }
 0x43c   : > { %v3661_v28 = vor.u32 1.1754944e-38, %v3660_v9  ;;  %vm3659_vm3 = vcmp.eq.f32.partialorder %v3658_v13, 8.507059e+37 }
 0x43d   : > { %v4088_v22 = vsel %vm4060_vm10, %v4023_v57, 0.0  ;;  %v8383_v62 = vadd.f32 %v8237_v21, %v3183_v59 }
 0x43e   : > { %v4128_v23 = vpack.c.bf16 %v4088_v22, %v4088_v22 }
 0x43f   : > { %v6274_v24 = vmul.f32 -1.442695, %v8383_v62 }
 0x440   : > { %v6588_v38 = vpop.eup %6587  ;;  %4169 = vst.msk [vmem:[#allocation3 + $0x38] sm:$0xf] %vm4154_vm9, %v4128_v23  ;;  %v3068_v58 = vpop.f32.mrf.mxu0 }
 0x441   : > { %v6590_v56 = vpop.eup %6589  ;;  %v3650_v55 = vmul.f32 %v6588_v38, %v3385_v52  ;;  %6591 = vpow2.f32 %v6274_v24  ;;  %vm3655_vm15 = vweird.f32 %v6588_v38 }
 0x442   : > { %v3386_v29 = vadd.f32 1.0, %v6590_v56  ;;  %vm3656_vm1 = vmor %vm3654_vm0, %vm3655_vm15 }
 0x443   : > { %v3651_v45 = vsub.f32 1.0, %v3650_v55  ;;  %v6475_v55 = vld [vmem:[#allocation2 + $0x118] sm:$0xff] }
 0x444   : > { %6593 = vrcp.f32 %v3386_v29  ;;  %v3675_v5 = vand.u32 2147483648, %v3386_v29  ;;  %v3673_v18 = vand.u32 2147483647, %v3386_v29  ;;  %vm3669_vm6 = vweird.f32 %v3386_v29 }
 0x445   : > { %v3652_v63 = vmul.f32 %v6588_v38, %v3651_v45 }
 0x446   : > { %v3676_v44 = vor.u32 1.1754944e-38, %v3675_v5  ;;  %vm3674_vm8 = vcmp.eq.f32.partialorder %v3673_v18, 8.507059e+37 }
 0x447   : > { %v6592_v33 = vpop.eup %6591  ;;  %v3653_v4 = vadd.f32 %v6588_v38, %v3652_v63 }
 0x448   : > { %v3387_v54 = vadd.f32 1.0, %v6592_v33  ;;  %v3071_v3 = vpop.f32.mrf.mxu0 }
 0x449   : > { %v3657_v34 = vsel %vm3656_vm1, %v6588_v38, %v3653_v4  ;;  %v3141_v27 = vadd.f32 %v3071_v3, %v8155_v8 }
 0x44a   : > { %v6594_v1 = vpop.eup %6593  ;;  %v3662_v2 = vsel %vm3659_vm3, %v3661_v28, %v3657_v34  ;;  %6595 = vrcp.f32 %v3387_v54  ;;  %v3688_v30 = vand.u32 2147483647, %v3387_v54  ;;  %v3690_v22 = vand.u32 2147483648, %v3387_v54 }
 0x44b   : > { %v4025_v41 = vmul.f32 %v3662_v2, %v8364_v51  ;;  %v3665_v36 = vmul.f32 %v6594_v1, %v3386_v29  ;;  %6254 = vmatmul.msk.bf16.gmra.mxu0 %vm984_vm5, %v6474_v37  ;;  %v3185_v20 = vmul.f32 %v8231_v39, %v3141_v27  ;;  %vm3670_vm4 = vweird.f32 %v6594_v1 }
 0x44c   : > { %vm3671_vm7 = vmor %vm3669_vm6, %vm3670_vm4  ;;  %vm3684_vm12 = vweird.f32 %v3387_v54  ;;  %vm3689_vm15 = vcmp.eq.f32.partialorder %v3688_v30, 8.507059e+37  ;;  %v3691_v45 = vor.u32 1.1754944e-38, %v3690_v22 }
 0x44d   : > { %v4090_v40 = vsel %vm4054_vm14, %v4025_v41, 0.0  ;;  %v3666_v49 = vsub.f32 1.0, %v3665_v36  ;;  %v8394_v6 = vadd.f32 %v8237_v21, %v3185_v20 }
 0x44e   : > { %v4130_v15 = vpack.c.bf16 %v4090_v40, %v4090_v40 }
 0x44f   : > { %v3667_v8 = vmul.f32 %v6594_v1, %v3666_v49  ;;  %v6276_v51 = vmul.f32 -1.442695, %v8394_v6 }
 0x450   : > { %v6596_v32 = vpop.eup %6595  ;;  %4171 = vst.msk [vmem:[#allocation3 + $0x40] sm:$0xf] %vm4154_vm9, %v4130_v15  ;;  %v3073_v35 = vpop.f32.mrf.mxu0 }
 0x451   : > { %v3668_v52 = vadd.f32 %v6594_v1, %v3667_v8  ;;  %v3680_v16 = vmul.f32 %v6596_v32, %v3387_v54  ;;  %v3142_v10 = vadd.f32 %v3073_v35, %v8157_v25  ;;  %6597 = vpow2.f32 %v6276_v51 }
 0x452   : > { %vm3685_vm11 = vweird.f32 %v6596_v32 }
 0x453   : > { %v3672_v12 = vsel %vm3671_vm7, %v6594_v1, %v3668_v52  ;;  %v3681_v7 = vsub.f32 1.0, %v3680_v16  ;;  %v3186_v57 = vmul.f32 %v8231_v39, %v3142_v10  ;;  %vm3686_vm13 = vmor %vm3684_vm12, %vm3685_vm11 }
 0x454   : > { %v3677_v59 = vsel %vm3674_vm8, %v3676_v44, %v3672_v12 }
 0x455   : > { %v4026_v23 = vmul.f32 %v3677_v59, %v8372_v42  ;;  %v3682_v24 = vmul.f32 %v6596_v32, %v3681_v7  ;;  %v8402_v38 = vadd.f32 %v8237_v21, %v3186_v57 }
 0x457   : > { %v4131_v58 = vpack.c.bf16 %v4026_v23, %v4026_v23  ;;  %v3683_v25 = vadd.f32 %v6596_v32, %v3682_v24  ;;  %v6277_v56 = vmul.f32 -1.442695, %v8402_v38  ;;  %v6598_v29 = vpop.eup %6597 }
 0x458   : > { %v3076_v9 = vpop.f32.mrf.mxu0  ;;  %v3389_v42 = vadd.f32 1.0, %v6598_v29 }
 0x459   : > { %4172 = vst.msk [vmem:[#allocation3 + $0x44] sm:$0xf] %vm4154_vm9, %v4131_v58  ;;  %v3687_v63 = vsel %vm3686_vm13, %v6596_v32, %v3683_v25  ;;  %6599 = vpow2.f32 %v6277_v56  ;;  %v3143_v13 = vadd.f32 %v3076_v9, %v8162_v11 }
 0x45a   : > { %v3692_v33 = vsel %vm3689_vm15, %v3691_v45, %v3687_v63  ;;  %6601 = vrcp.f32 %v3389_v42  ;;  %v3720_v36 = vand.u32 2147483648, %v3389_v42  ;;  %v3718_v40 = vand.u32 2147483647, %v3389_v42 }
 0x45b   : > { %v4027_v4 = vmul.f32 %v3692_v33, %v8383_v62  ;;  %6255 = vmatmul.msk.bf16.gmra.mxu0 %vm984_vm5, %v6475_v55  ;;  %v3187_v37 = vmul.f32 %v8231_v39, %v3143_v13  ;;  %vm3714_vm1 = vweird.f32 %v3389_v42 }
 0x45c   : > { %v3721_v18 = vor.u32 1.1754944e-38, %v3720_v36  ;;  %vm3719_vm4 = vcmp.eq.f32.partialorder %v3718_v40, 8.507059e+37  ;;  %v8446_v36 = vld [vmem:[%s9255_s5] ss:$0 sm:$0xff] }
 0x45d   : > { %v4092_v28 = vsel %vm4060_vm10, %v4027_v4, 0.0  ;;  %v8413_v3 = vadd.f32 %v8237_v21, %v3187_v37 }
 0x45e   : > { %v4132_v54 = vpack.c.bf16 %v4092_v28, %v4092_v28 }
 0x45f   : > { %v6600_v34 = vpop.eup %6599  ;;  %v6278_v11 = vmul.f32 -1.442695, %v8413_v3 }
 0x460   : > { %4173 = vst.msk [vmem:[#allocation3 + $0x48] sm:$0xf] %vm4154_vm9, %v4132_v54  ;;  %v3390_v27 = vadd.f32 1.0, %v6600_v34  ;;  %v3078_v1 = vpop.f32.mrf.mxu0  ;;  %v6602_v62 = vpop.eup %6601 }
 0x461   : > { %v3710_v2 = vmul.f32 %v6602_v62, %v3389_v42  ;;  %vm3715_vm0 = vweird.f32 %v6602_v62  ;;  %v8439_v1 = vld [vmem:[%s9254_s4] ss:$0 sm:$0xff] }
 0x462   : > { %6603 = vrcp.f32 %v3390_v27  ;;  %vm3716_vm3 = vmor %vm3714_vm1, %vm3715_vm0  ;;  %v3735_v7 = vand.u32 2147483648, %v3390_v27  ;;  %v3733_v59 = vand.u32 2147483647, %v3390_v27  ;;  %vm3729_vm7 = vweird.f32 %v3390_v27 }
 0x463   : > { %6605 = vpow2.f32 %v6278_v11  ;;  %v3711_v41 = vsub.f32 1.0, %v3710_v2 }
 0x464   : > { %v3736_v58 = vor.u32 1.1754944e-38, %v3735_v7  ;;  %vm3734_vm11 = vcmp.eq.f32.partialorder %v3733_v59, 8.507059e+37 }
 0x465   : > { %v3712_v20 = vmul.f32 %v6602_v62, %v3711_v41 }
 0x467   : > { %v3713_v15 = vadd.f32 %v6602_v62, %v3712_v20 }
 0x468   : > { %v6604_v49 = vpop.eup %6603  ;;  %v3081_v5 = vpop.f32.mrf.mxu0 }
 0x469   : > { %v6606_v8 = vpop.eup %6605  ;;  %v3725_v32 = vmul.f32 %v6604_v49, %v3390_v27  ;;  %v3145_v51 = vadd.f32 %v3081_v5, %v8171_v48  ;;  %v3717_v35 = vsel %vm3716_vm3, %v6602_v62, %v3713_v15  ;;  %vm3730_vm6 = vweird.f32 %v6604_v49 }
 0x46a   : > { %v3391_v52 = vadd.f32 1.0, %v6606_v8  ;;  %v3722_v16 = vsel %vm3719_vm4, %v3721_v18, %v3717_v35  ;;  %vm3731_vm8 = vmor %vm3729_vm7, %vm3730_vm6 }
 0x46b   : > { %v3726_v10 = vsub.f32 1.0, %v3725_v32  ;;  %v3189_v44 = vmul.f32 %v8231_v39, %v3145_v51  ;;  %v4029_v12 = vmul.f32 %v3722_v16, %v8394_v6 }
 0x46c   : > { %6607 = vrcp.f32 %v3391_v52  ;;  %v3750_v4 = vand.u32 2147483648, %v3391_v52  ;;  %v3748_v54 = vand.u32 2147483647, %v3391_v52  ;;  %vm3744_vm13 = vweird.f32 %v3391_v52 }
 0x46d   : > { %v3727_v57 = vmul.f32 %v6604_v49, %v3726_v10  ;;  %v8421_v30 = vadd.f32 %v8237_v21, %v3189_v44  ;;  %v4094_v48 = vsel %vm4054_vm14, %v4029_v12, 0.0 }
 0x46e   : > { %v4134_v22 = vpack.c.bf16 %v4094_v48, %v4094_v48  ;;  %v3751_v11 = vor.u32 1.1754944e-38, %v3750_v4  ;;  %vm3749_vm0 = vcmp.eq.f32.partialorder %v3748_v54, 8.507059e+37 }
 0x46f   : > { %v3728_v23 = vadd.f32 %v6604_v49, %v3727_v57  ;;  %v6280_v24 = vmul.f32 -1.442695, %v8421_v30 }
 0x470   : > { %v3083_v25 = vpop.f32.mrf.mxu0  ;;  %4175 = vst.msk [vmem:[#allocation3 + $0x50] sm:$0xf] %vm4154_vm9, %v4134_v22 }
 0x471   : > { %v3732_v6 = vsel %vm3731_vm8, %v6604_v49, %v3728_v23  ;;  %6609 = vpow2.f32 %v6280_v24  ;;  %v3146_v56 = vadd.f32 %v3083_v25, %v8173_v19 }
 0x472   : > { %v6608_v55 = vpop.eup %6607  ;;  %v3737_v29 = vsel %vm3734_vm11, %v3736_v58, %v3732_v6 }
 0x473   : > { %v4030_v45 = vmul.f32 %v3737_v29, %v8402_v38  ;;  %v3740_v9 = vmul.f32 %v6608_v55, %v3391_v52  ;;  %v3190_v63 = vmul.f32 %v8231_v39, %v3146_v56  ;;  %vm3745_vm12 = vweird.f32 %v6608_v55 }
 0x474   : > { %vm3746_vm15 = vmor %vm3744_vm13, %vm3745_vm12 }
 0x475   : > { %v4135_v42 = vpack.c.bf16 %v4030_v45, %v4030_v45  ;;  %v3741_v13 = vsub.f32 1.0, %v3740_v9  ;;  %v8431_v33 = vadd.f32 %v8237_v21, %v3190_v63 }
 0x477   : > { %v6610_v37 = vpop.eup %6609  ;;  %4176 = vst.msk [vmem:[#allocation3 + $0x54] sm:$0xf] %vm4154_vm9, %v4135_v42  ;;  %v3742_v28 = vmul.f32 %v6608_v55, %v3741_v13  ;;  %v6281_v19 = vmul.f32 -1.442695, %v8431_v33 }
 0x478   : > { %v3393_v34 = vadd.f32 1.0, %v6610_v37  ;;  %v3086_v27 = vpop.f32.mrf.mxu0 }
 0x479   : > { %v3743_v38 = vadd.f32 %v6608_v55, %v3742_v28  ;;  %6611 = vpow2.f32 %v6281_v19  ;;  %v3147_v39 = vadd.f32 %v3086_v27, %v8178_v61 }
 0x47a   : > { %6613 = vrcp.f32 %v3393_v34  ;;  %v3780_v51 = vand.u32 2147483648, %v3393_v34  ;;  %v3778_v52 = vand.u32 2147483647, %v3393_v34  ;;  %vm3774_vm3 = vweird.f32 %v3393_v34 }
 0x47b   : > { %v3747_v21 = vsel %vm3746_vm15, %v6608_v55, %v3743_v38  ;;  %v3191_v62 = vmul.f32 %v8439_v1, %v3147_v39 }
 0x47c   : > { %v3752_v2 = vsel %vm3749_vm0, %v3751_v11, %v3747_v21  ;;  %v3781_v12 = vor.u32 1.1754944e-38, %v3780_v51  ;;  %vm3779_vm6 = vcmp.eq.f32.partialorder %v3778_v52, 8.507059e+37 }
 0x47d   : > { %v4031_v41 = vmul.f32 %v3752_v2, %v8413_v3  ;;  %v8449_v61 = vadd.f32 %v8446_v36, %v3191_v62 }
 0x47f   : > { %v6612_v20 = vpop.eup %6611  ;;  %v4096_v40 = vsel %vm4060_vm10, %v4031_v41, 0.0  ;;  %v6282_v49 = vmul.f32 -1.442695, %v8449_v61 }
 0x480   : > { %v6614_v15 = vpop.eup %6613  ;;  %v4136_v5 = vpack.c.bf16 %v4096_v40, %v4096_v40  ;;  %v3394_v8 = vadd.f32 1.0, %v6612_v20  ;;  %v3088_v18 = vpop.f32.mrf.mxu0 }
 0x481   : > { %v3770_v32 = vmul.f32 %v6614_v15, %v3393_v34  ;;  %6615 = vpow2.f32 %v6282_v49  ;;  %vm3775_vm1 = vweird.f32 %v6614_v15 }
 0x482   : > { %4177 = vst.msk [vmem:[#allocation3 + $0x58] sm:$0xf] %vm4154_vm9, %v4136_v5  ;;  %6617 = vrcp.f32 %v3394_v8  ;;  %vm3776_vm4 = vmor %vm3774_vm3, %vm3775_vm1  ;;  %v3793_v6 = vand.u32 2147483647, %v3394_v8  ;;  %v3795_v56 = vand.u32 2147483648, %v3394_v8  ;;  %vm3789_vm8 = vweird.f32 %v3394_v8 }
 0x483   : > { %v3771_v3 = vsub.f32 1.0, %v3770_v32 }
 0x484   : > { %vm3794_vm12 = vcmp.eq.f32.partialorder %v3793_v6, 8.507059e+37 }
 0x485   : > { %v3772_v35 = vmul.f32 %v6614_v15, %v3771_v3 }
 0x487   : > { %v6616_v16 = vpop.eup %6615  ;;  %v3773_v10 = vadd.f32 %v6614_v15, %v3772_v35 }
 0x488   : > { %v6618_v44 = vpop.eup %6617  ;;  %v3395_v7 = vadd.f32 1.0, %v6616_v16  ;;  %v3091_v57 = vpop.f32.mrf.mxu0 }
 0x489   : > { %v3777_v59 = vsel %vm3776_vm4, %v6614_v15, %v3773_v10  ;;  %v3785_v48 = vmul.f32 %v6618_v44, %v3394_v8  ;;  %v3149_v22 = vadd.f32 %v3091_v57, %v8187_v46  ;;  %vm3790_vm7 = vweird.f32 %v6618_v44 }
 0x48a   : > { %v3782_v23 = vsel %vm3779_vm6, %v3781_v12, %v3777_v59  ;;  %6619 = vrcp.f32 %v3395_v7  ;;  %vm3791_vm11 = vmor %vm3789_vm8, %vm3790_vm7  ;;  %v3810_v27 = vand.u32 2147483648, %v3395_v7  ;;  %v3808_v21 = vand.u32 2147483647, %v3395_v7 }
 0x48b   : > { %v4033_v24 = vmul.f32 %v3782_v23, %v8421_v30  ;;  %v3786_v58 = vsub.f32 1.0, %v3785_v48  ;;  %v3193_v25 = vmul.f32 %v8439_v1, %v3149_v22  ;;  %v3796_v30 = vor.u32 1.1754944e-38, %v3795_v56 }
 0x48c   : > { %vm3804_vm15 = vweird.f32 %v3395_v7  ;;  %vm3809_vm1 = vcmp.eq.f32.partialorder %v3808_v21, 8.507059e+37 }
 0x48d   : > { %v4098_v55 = vsel %vm4054_vm14, %v4033_v24, 0.0  ;;  %v3787_v29 = vmul.f32 %v6618_v44, %v3786_v58  ;;  %v8461_v45 = vadd.f32 %v8446_v36, %v3193_v25 }
 0x48e   : > { %v4138_v9 = vpack.c.bf16 %v4098_v55, %v4098_v55 }
 0x48f   : > { %v3788_v63 = vadd.f32 %v6618_v44, %v3787_v29  ;;  %v6284_v46 = vmul.f32 -1.442695, %v8461_v45 }
 0x490   : > { %v6620_v42 = vpop.eup %6619  ;;  %4179 = vst.msk [vmem:[#allocation3 + $0x60] sm:$0xf] %vm4154_vm9, %v4138_v9  ;;  %v3093_v13 = vpop.f32.mrf.mxu0 }
 0x491   : > { %v3792_v4 = vsel %vm3791_vm11, %v6618_v44, %v3788_v63  ;;  %v3800_v37 = vmul.f32 %v6620_v42, %v3395_v7  ;;  %6621 = vpow2.f32 %v6284_v46  ;;  %v3150_v54 = vadd.f32 %v3093_v13, %v8189_v26 }
 0x492   : > { %v3797_v28 = vsel %vm3794_vm12, %v3796_v30, %v3792_v4  ;;  %vm3805_vm13 = vweird.f32 %v6620_v42  ;;  %v3811_v26 = vor.u32 1.1754944e-38, %v3810_v27 }
 0x493   : > { %v4034_v19 = vmul.f32 %v3797_v28, %v8431_v33  ;;  %v3801_v34 = vsub.f32 1.0, %v3800_v37  ;;  %v3194_v38 = vmul.f32 %v8439_v1, %v3150_v54  ;;  %vm3806_vm0 = vmor %vm3804_vm15, %vm3805_vm13 }
 0x495   : > { %v4139_v39 = vpack.c.bf16 %v4034_v19, %v4034_v19  ;;  %v3802_v11 = vmul.f32 %v6620_v42, %v3801_v34  ;;  %v8469_v62 = vadd.f32 %v8446_v36, %v3194_v38 }
 0x497   : > { %v6622_v2 = vpop.eup %6621  ;;  %4180 = vst.msk [vmem:[#allocation3 + $0x64] sm:$0xf] %vm4154_vm9, %v4139_v39  ;;  %v3803_v41 = vadd.f32 %v6620_v42, %v3802_v11  ;;  %v6285_v33 = vmul.f32 -1.442695, %v8469_v62 }
 0x498   : > { %v3397_v20 = vadd.f32 1.0, %v6622_v2  ;;  %v3096_v40 = vpop.f32.mrf.mxu0 }
 0x499   : > { %v3807_v49 = vsel %vm3806_vm0, %v6620_v42, %v3803_v41  ;;  %v3151_v15 = vadd.f32 %v3096_v40, %v8194_v31 }
 0x49a   : > { %v3812_v5 = vsel %vm3809_vm1, %v3811_v26, %v3807_v49  ;;  %6623 = vrcp.f32 %v3397_v20  ;;  %v3840_v12 = vand.u32 2147483648, %v3397_v20  ;;  %v3838_v57 = vand.u32 2147483647, %v3397_v20 }
 0x49b   : > { %v4035_v8 = vmul.f32 %v3812_v5, %v8449_v61  ;;  %6625 = vpow2.f32 %v6285_v33  ;;  %v3195_v18 = vmul.f32 %v8439_v1, %v3151_v15  ;;  %vm3834_vm4 = vweird.f32 %v3397_v20 }
 0x49c   : > { %v3841_v22 = vor.u32 1.1754944e-38, %v3840_v12  ;;  %vm3839_vm7 = vcmp.eq.f32.partialorder %v3838_v57, 8.507059e+37 }
 0x49d   : > { %v4100_v32 = vsel %vm4060_vm10, %v4035_v8, 0.0  ;;  %v8479_v3 = vadd.f32 %v8446_v36, %v3195_v18 }
 0x49e   : > { %v4140_v51 = vpack.c.bf16 %v4100_v32, %v4100_v32 }
 0x49f   : > { %v6286_v35 = vmul.f32 -1.442695, %v8479_v3 }
 0x4a0   : > { %v6624_v52 = vpop.eup %6623  ;;  %4181 = vst.msk [vmem:[#allocation3 + $0x68] sm:$0xf] %vm4154_vm9, %v4140_v51  ;;  %v3098_v31 = vpop.f32.mrf.mxu0 }
 0x4a1   : > { %v6626_v16 = vpop.eup %6625  ;;  %v3830_v10 = vmul.f32 %v6624_v52, %v3397_v20  ;;  %6627 = vpow2.f32 %v6286_v35  ;;  %vm3835_vm3 = vweird.f32 %v6624_v52 }
 0x4a2   : > { %v3398_v61 = vadd.f32 1.0, %v6626_v16  ;;  %vm3836_vm6 = vmor %vm3834_vm4, %vm3835_vm3 }
 0x4a3   : > { %v3831_v44 = vsub.f32 1.0, %v3830_v10 }
 0x4a4   : > { %6629 = vrcp.f32 %v3398_v61  ;;  %v3855_v30 = vand.u32 2147483648, %v3398_v61  ;;  %vm3849_vm11 = vweird.f32 %v3398_v61 }
 0x4a5   : > { %v3832_v7 = vmul.f32 %v6624_v52, %v3831_v44 }
 0x4a6   : > { %v3856_v27 = vor.u32 1.1754944e-38, %v3855_v30 }
 0x4a7   : > { %v6628_v59 = vpop.eup %6627  ;;  %v3833_v48 = vadd.f32 %v6624_v52, %v3832_v7 }
 0x4a8   : > { %v3399_v23 = vadd.f32 1.0, %v6628_v59  ;;  %v3101_v24 = vpop.f32.mrf.mxu0 }
 0x4a9   : > { %v3837_v58 = vsel %vm3836_vm6, %v6624_v52, %v3833_v48  ;;  %v3153_v25 = vadd.f32 %v3101_v24, %v8203_v43  ;;  %v3853_v43 = vand.u32 2147483647, %v3398_v61 }
 0x4aa   : > { %v6630_v6 = vpop.eup %6629  ;;  %v3842_v56 = vsel %vm3839_vm7, %v3841_v22, %v3837_v58  ;;  %6631 = vrcp.f32 %v3399_v23  ;;  %v3868_v2 = vand.u32 2147483647, %v3399_v23  ;;  %v3870_v41 = vand.u32 2147483648, %v3399_v23 }
 0x4ab   : > { %v4037_v55 = vmul.f32 %v3842_v56, %v8461_v45  ;;  %v3845_v29 = vmul.f32 %v6630_v6, %v3398_v61  ;;  %v3197_v9 = vmul.f32 %v8439_v1, %v3153_v25  ;;  %vm3850_vm8 = vweird.f32 %v6630_v6 }
 0x4ac   : > { %vm3851_vm12 = vmor %vm3849_vm11, %vm3850_vm8  ;;  %vm3854_vm13 = vcmp.eq.f32.partialorder %v3853_v43, 8.507059e+37  ;;  %vm3864_vm0 = vweird.f32 %v3399_v23  ;;  %vm3869_vm3 = vcmp.eq.f32.partialorder %v3868_v2, 8.507059e+37  ;;  %v3871_v5 = vor.u32 1.1754944e-38, %v3870_v41 }
 0x4ad   : > { %v4102_v63 = vsel %vm4054_vm14, %v4037_v55, 0.0  ;;  %v3846_v46 = vsub.f32 1.0, %v3845_v29  ;;  %v8489_v13 = vadd.f32 %v8446_v36, %v3197_v9 }
 0x4ae   : > { %v4142_v42 = vpack.c.bf16 %v4102_v63, %v4102_v63 }
 0x4af   : > { %v3847_v4 = vmul.f32 %v6630_v6, %v3846_v46  ;;  %v6288_v45 = vmul.f32 -1.442695, %v8489_v13 }
 0x4b0   : > { %v6632_v37 = vpop.eup %6631  ;;  %4183 = vst.msk [vmem:[#allocation3 + $0x70] sm:$0xf] %vm4154_vm9, %v4142_v42  ;;  %v3103_v28 = vpop.f32.mrf.mxu0 }
 0x4b1   : > { %v3848_v54 = vadd.f32 %v6630_v6, %v3847_v4  ;;  %v3860_v19 = vmul.f32 %v6632_v37, %v3399_v23  ;;  %v3154_v34 = vadd.f32 %v3103_v28, %v8205_v17  ;;  %6633 = vpow2.f32 %v6288_v45 }
 0x4b2   : > { %vm3865_vm15 = vweird.f32 %v6632_v37 }
 0x4b3   : > { %v3852_v38 = vsel %vm3851_vm12, %v6630_v6, %v3848_v54  ;;  %v3861_v39 = vsub.f32 1.0, %v3860_v19  ;;  %v3198_v11 = vmul.f32 %v8439_v1, %v3154_v34  ;;  %vm3866_vm1 = vmor %vm3864_vm0, %vm3865_vm15 }
 0x4b4   : > { %v3857_v21 = vsel %vm3854_vm13, %v3856_v27, %v3852_v38 }
 0x4b5   : > { %v4038_v26 = vmul.f32 %v3857_v21, %v8469_v62  ;;  %v3862_v20 = vmul.f32 %v6632_v37, %v3861_v39  ;;  %v8497_v33 = vadd.f32 %v8446_v36, %v3198_v11 }
 0x4b7   : > { %v4143_v40 = vpack.c.bf16 %v4038_v26, %v4038_v26  ;;  %v3863_v17 = vadd.f32 %v6632_v37, %v3862_v20  ;;  %v6289_v49 = vmul.f32 -1.442695, %v8497_v33  ;;  %v6634_v15 = vpop.eup %6633 }
 0x4b8   : > { %v3106_v8 = vpop.f32.mrf.mxu0  ;;  %v3401_v32 = vadd.f32 1.0, %v6634_v15 }
 0x4b9   : > { %4184 = vst.msk [vmem:[#allocation3 + $0x74] sm:$0xf] %vm4154_vm9, %v4143_v40  ;;  %v3867_v18 = vsel %vm3866_vm1, %v6632_v37, %v3863_v17  ;;  %6635 = vpow2.f32 %v6289_v49  ;;  %v3155_v62 = vadd.f32 %v3106_v8, %v8210_v50 }
 0x4ba   : > { %v3872_v51 = vsel %vm3869_vm3, %v3871_v5, %v3867_v18  ;;  %6637 = vrcp.f32 %v3401_v32  ;;  %v3900_v59 = vand.u32 2147483648, %v3401_v32  ;;  %v3898_v22 = vand.u32 2147483647, %v3401_v32 }
 0x4bb   : > { %v4039_v35 = vmul.f32 %v3872_v51, %v8479_v3  ;;  %v3199_v52 = vmul.f32 %v8439_v1, %v3155_v62  ;;  %vm3894_vm6 = vweird.f32 %v3401_v32 }
 0x4bc   : > { %v3901_v6 = vor.u32 1.1754944e-38, %v3900_v59  ;;  %vm3899_vm8 = vcmp.eq.f32.partialorder %v3898_v22, 8.507059e+37 }
 0x4bd   : > { %v4104_v31 = vsel %vm4060_vm10, %v4039_v35, 0.0  ;;  %v8507_v10 = vadd.f32 %v8446_v36, %v3199_v52 }
 0x4be   : > { %v4144_v16 = vpack.c.bf16 %v4104_v31, %v4104_v31 }
 0x4bf   : > { %v6636_v61 = vpop.eup %6635  ;;  %v6290_v12 = vmul.f32 -1.442695, %v8507_v10 }
 0x4c0   : > { %4185 = vst.msk [vmem:[#allocation3 + $0x78] sm:$0xf] %vm4154_vm9, %v4144_v16  ;;  %v3402_v44 = vadd.f32 1.0, %v6636_v61  ;;  %v3108_v50 = vpop.f32.mrf.mxu0  ;;  %v6638_v7 = vpop.eup %6637 }
 0x4c1   : > { %v3890_v57 = vmul.f32 %v6638_v7, %v3401_v32  ;;  %vm3895_vm4 = vweird.f32 %v6638_v7 }
 0x4c2   : > { %6639 = vrcp.f32 %v3402_v44  ;;  %vm3896_vm7 = vmor %vm3894_vm6, %vm3895_vm4  ;;  %v3915_v4 = vand.u32 2147483648, %v3402_v44  ;;  %v3913_v37 = vand.u32 2147483647, %v3402_v44  ;;  %vm3909_vm12 = vweird.f32 %v3402_v44 }
 0x4c3   : > { %6641 = vpow2.f32 %v6290_v12  ;;  %v3891_v3 = vsub.f32 1.0, %v3890_v57 }
 0x4c4   : > { %v3916_v34 = vor.u32 1.1754944e-38, %v3915_v4  ;;  %vm3914_vm15 = vcmp.eq.f32.partialorder %v3913_v37, 8.507059e+37 }
 0x4c5   : > { %v3892_v48 = vmul.f32 %v6638_v7, %v3891_v3 }
 0x4c7   : > { %v3893_v24 = vadd.f32 %v6638_v7, %v3892_v48 }
 0x4c8   : > { %v6640_v23 = vpop.eup %6639  ;;  %v3111_v58 = vpop.f32.mrf.mxu0 }
 0x4c9   : > { %v6642_v25 = vpop.eup %6641  ;;  %v3905_v56 = vmul.f32 %v6640_v23, %v3402_v44  ;;  %v3157_v55 = vadd.f32 %v3111_v58, %v8219_v60  ;;  %v3897_v29 = vsel %vm3896_vm7, %v6638_v7, %v3893_v24  ;;  %vm3910_vm11 = vweird.f32 %v6640_v23 }
 0x4ca   : > { %v3403_v9 = vadd.f32 1.0, %v6642_v25  ;;  %v3902_v63 = vsel %vm3899_vm8, %v3901_v6, %v3897_v29  ;;  %vm3911_vm13 = vmor %vm3909_vm12, %vm3910_vm11 }
 0x4cb   : > { %v3906_v46 = vsub.f32 1.0, %v3905_v56  ;;  %v3201_v42 = vmul.f32 %v8439_v1, %v3157_v55  ;;  %v4041_v30 = vmul.f32 %v3902_v63, %v8489_v13 }
 0x4cc   : > { %6643 = vrcp.f32 %v3403_v9  ;;  %v3930_v17 = vand.u32 2147483648, %v3403_v9  ;;  %v3928_v5 = vand.u32 2147483647, %v3403_v9  ;;  %vm3924_vm1 = vweird.f32 %v3403_v9 }
 0x4cd   : > { %v3907_v43 = vmul.f32 %v6640_v23, %v3906_v46  ;;  %v8515_v45 = vadd.f32 %v8446_v36, %v3201_v42  ;;  %v4106_v60 = vsel %vm4054_vm14, %v4041_v30, 0.0 }
 0x4ce   : > { %v4146_v28 = vpack.c.bf16 %v4106_v60, %v4106_v60  ;;  %v3931_v62 = vor.u32 1.1754944e-38, %v3930_v17  ;;  %vm3929_vm4 = vcmp.eq.f32.partialorder %v3928_v5, 8.507059e+37 }
 0x4cf   : > { %v3908_v54 = vadd.f32 %v6640_v23, %v3907_v43  ;;  %v6292_v19 = vmul.f32 -1.442695, %v8515_v45 }
 0x4d0   : > { %v3113_v27 = vpop.f32.mrf.mxu0  ;;  %4187 = vst.msk [vmem:[#allocation3 + $0x80] sm:$0xf] %vm4154_vm9, %v4146_v28 }
 0x4d1   : > { %v3912_v13 = vsel %vm3911_vm13, %v6640_v23, %v3908_v54  ;;  %6645 = vpow2.f32 %v6292_v19  ;;  %v3158_v38 = vadd.f32 %v3113_v27, %v8221_v47 }
 0x4d2   : > { %v6644_v39 = vpop.eup %6643  ;;  %v3917_v11 = vsel %vm3914_vm15, %v3916_v34, %v3912_v13 }
 0x4d3   : > { %v4042_v21 = vmul.f32 %v3917_v11, %v8497_v33  ;;  %v3920_v2 = vmul.f32 %v6644_v39, %v3403_v9  ;;  %v3202_v41 = vmul.f32 %v8439_v1, %v3158_v38  ;;  %vm3925_vm0 = vweird.f32 %v6644_v39 }
 0x4d4   : > { %vm3926_vm3 = vmor %vm3924_vm1, %vm3925_vm0 }
 0x4d5   : > { %v4147_v26 = vpack.c.bf16 %v4042_v21, %v4042_v21  ;;  %v3921_v20 = vsub.f32 1.0, %v3920_v2  ;;  %v8525_v40 = vadd.f32 %v8446_v36, %v3202_v41 }
 0x4d7   : > { %v6646_v49 = vpop.eup %6645  ;;  %4188 = vst.msk [vmem:[#allocation3 + $0x84] sm:$0xf] %vm4154_vm9, %v4147_v26  ;;  %v3922_v15 = vmul.f32 %v6644_v39, %v3921_v20  ;;  %v6293_v47 = vmul.f32 -1.442695, %v8525_v40 }
 0x4d8   : > { %v3405_v8 = vadd.f32 1.0, %v6646_v49  ;;  %v3116_v18 = vpop.f32.mrf.mxu0 }
 0x4d9   : > { %v3923_v33 = vadd.f32 %v6644_v39, %v3922_v15  ;;  %6647 = vpow2.f32 %v6293_v47  ;;  %v3159_v32 = vadd.f32 %v3116_v18, %v8226_v14 }
 0x4da   : > { %6649 = vrcp.f32 %v3405_v8  ;;  %vm3954_vm7 = vweird.f32 %v3405_v8 }
 0x4db   : > { %v3927_v51 = vsel %vm3926_vm3, %v6644_v39, %v3923_v33  ;;  %v3203_v35 = vmul.f32 %v8439_v1, %v3159_v32 }
 0x4dc   : > { %v3932_v52 = vsel %vm3929_vm4, %v3931_v62, %v3927_v51 }
 0x4dd   : > { %v4043_v31 = vmul.f32 %v3932_v52, %v8507_v10  ;;  %v8533_v16 = vadd.f32 %v8446_v36, %v3203_v35  ;;  %v3960_v10 = vand.u32 2147483648, %v3405_v8  ;;  %v3958_v36 = vand.u32 2147483647, %v3405_v8 }
 0x4df   : > { %v6648_v61 = vpop.eup %6647  ;;  %v4108_v44 = vsel %vm4060_vm10, %v4043_v31, 0.0  ;;  %v6294_v12 = vmul.f32 -1.442695, %v8533_v16  ;;  %v3961_v24 = vor.u32 1.1754944e-38, %v3960_v10  ;;  %vm3959_vm11 = vcmp.eq.f32.partialorder %v3958_v36, 8.507059e+37 }
 0x4e0   : > { %v6650_v14 = vpop.eup %6649  ;;  %v4148_v50 = vpack.c.bf16 %v4108_v44, %v4108_v44  ;;  %v3406_v7 = vadd.f32 1.0, %v6648_v61  ;;  %v3118_v57 = vpop.f32.mrf.mxu0 }
 0x4e1   : > { %v3950_v3 = vmul.f32 %v6650_v14, %v3405_v8  ;;  %6651 = vpow2.f32 %v6294_v12  ;;  %vm3955_vm6 = vweird.f32 %v6650_v14 }
 0x4e2   : > { %4189 = vst.msk [vmem:[#allocation3 + $0x88] sm:$0xf] %vm4154_vm9, %v4148_v50  ;;  %6653 = vrcp.f32 %v3406_v7  ;;  %vm3956_vm8 = vmor %vm3954_vm7, %vm3955_vm6  ;;  %v3975_v9 = vand.u32 2147483648, %v3406_v7  ;;  %v3973_v42 = vand.u32 2147483647, %v3406_v7  ;;  %vm3969_vm13 = vweird.f32 %v3406_v7 }
 0x4e3   : > { %v3951_v1 = vsub.f32 1.0, %v3950_v3 }
 0x4e4   : > { %v3976_v37 = vor.u32 1.1754944e-38, %v3975_v9  ;;  %vm3974_vm0 = vcmp.eq.f32.partialorder %v3973_v42, 8.507059e+37 }
 0x4e5   : > { %v3952_v59 = vmul.f32 %v6650_v14, %v3951_v1 }
 0x4e7   : > { %v6652_v48 = vpop.eup %6651  ;;  %v3953_v22 = vadd.f32 %v6650_v14, %v3952_v59 }
 0x4e8   : > { %v6654_v23 = vpop.eup %6653  ;;  %v3407_v58 = vadd.f32 1.0, %v6652_v48 }
 0x4e9   : > { %v3957_v25 = vsel %vm3956_vm8, %v6650_v14, %v3953_v22  ;;  %v3965_v6 = vmul.f32 %v6654_v23, %v3406_v7  ;;  %vm3970_vm12 = vweird.f32 %v6654_v23 }
 0x4ea   : > { %v3962_v56 = vsel %vm3959_vm11, %v3961_v24, %v3957_v25  ;;  %6655 = vrcp.f32 %v3407_v58  ;;  %vm3971_vm15 = vmor %vm3969_vm13, %vm3970_vm12  ;;  %v3990_v53 = vand.u32 2147483648, %v3407_v58  ;;  %v3988_v13 = vand.u32 2147483647, %v3407_v58 }
 0x4eb   : > { %v4045_v55 = vmul.f32 %v3962_v56, %v8515_v45  ;;  %v3966_v29 = vsub.f32 1.0, %v3965_v6  ;;  %vm3984_vm1 = vweird.f32 %v3407_v58 }
 0x4ec   : > { %v3991_v39 = vor.u32 1.1754944e-38, %v3990_v53  ;;  %vm3989_vm4 = vcmp.eq.f32.partialorder %v3988_v13, 8.507059e+37 }
 0x4ed   : > { %v4110_v63 = vsel %vm4054_vm14, %v4045_v55, 0.0  ;;  %v3967_v46 = vmul.f32 %v6654_v23, %v3966_v29 }
 0x4ee   : > { %v4150_v30 = vpack.c.bf16 %v4110_v63, %v4110_v63 }
 0x4ef   : > { %v3968_v4 = vadd.f32 %v6654_v23, %v3967_v46 }
 0x4f0   : > { %v6656_v43 = vpop.eup %6655  ;;  %4191 = vst.msk [vmem:[#allocation3 + $0x90] sm:$0xf] %vm4154_vm9, %v4150_v30 }
 0x4f1   : > { %v3972_v60 = vsel %vm3971_vm15, %v6654_v23, %v3968_v4  ;;  %v3980_v28 = vmul.f32 %v6656_v43, %v3407_v58  ;;  %vm3985_vm14 = vweird.f32 %v6656_v43 }
 0x4f2   : > { %v3977_v45 = vsel %vm3974_vm0, %v3976_v37, %v3972_v60  ;;  %vm3986_vm3 = vmor %vm3984_vm1, %vm3985_vm14 }
 0x4f3   : > { %v4046_v54 = vmul.f32 %v3977_v45, %v8525_v40  ;;  %v3981_v19 = vsub.f32 1.0, %v3980_v28 }
 0x4f5   : > { %v4151_v34 = vpack.c.bf16 %v4046_v54, %v4046_v54  ;;  %v3982_v27 = vmul.f32 %v6656_v43, %v3981_v19 }
 0x4f7   : > { %4192 = vst.msk [vmem:[#allocation3 + $0x94] sm:$0xf] %vm4154_vm9, %v4151_v34  ;;  %v3983_v38 = vadd.f32 %v6656_v43, %v3982_v27 }
 0x4f9   : > { %v3987_v11 = vsel %vm3986_vm3, %v6656_v43, %v3983_v38 }
 0x4fa   : > { %v3992_v21 = vsel %vm3989_vm4, %v3991_v39, %v3987_v11 }
 0x4fb   : > { %v4047_v2 = vmul.f32 %v3992_v21, %v8533_v16 }
 0x4fc   : > { %4197 = sbr.rel (%p5944_p11) target bundleno = 1285 (0x505), region = 76 }
 0x4fd   : > { %v4112_v41 = vsel %vm4060_vm10, %v4047_v2, 0.0 }
 0x4fe   : > { %v4152_v26 = vpack.c.bf16 %v4112_v41, %v4112_v41 }
 0x500   : > { %4193 = vst.msk [vmem:[#allocation3 + $0x98] sm:$0xf] %vm4154_vm9, %v4152_v26 }
 0x501   : > { %v6772_v20 = vmov 0  }
 0x502   : > { %4198 = vst.msk [vmem:[#allocation3] sm:$0xf] %vm4154_vm9, %v6772_v20 }
 0x503   : > { %4199 = vst.msk [vmem:[#allocation3 + $0x4] sm:$0xf] %vm4154_vm9, %v6772_v20 }
 0x504   : > { %4200 = vst.msk [vmem:[#allocation3 + $0x8] sm:$0xf] %vm4154_vm9, %v6772_v20 }
 0x505 PF: > { %4204 = sbr.rel (%p5946_p13) target bundleno = 1294 (0x50e), region = 80 }
 0x50a   : > { %v6773_v40 = vmov 0  }
 0x50b   : > { %4206 = vst.msk [vmem:[#allocation3 + $0x90] sm:$0xf] %vm4154_vm9, %v6773_v40 }
 0x50c   : > { %4207 = vst.msk [vmem:[#allocation3 + $0x94] sm:$0xf] %vm4154_vm9, %v6773_v40 }
 0x50d   : > { %4208 = vst.msk [vmem:[#allocation3 + $0x98] sm:$0xf] %vm4154_vm9, %v6773_v40 }
 0x50e PF: > { %v6298_v0 = vld [vmem:[%s9256_s6 + $0x3] sm:$0x1]  ;;  %v4240_v17 = vld [vmem:[%s9256_s6] sm:$0x1]  ;;  %v6351_v49 = vld [vmem:[%s9256_s6 + $0x6] sm:$0x1] }
 0x50f   : > { %v4310_v15 = vsel %vm770_vm2, %v6298_v0, 0  ;;  %v4370_v5 = vsel %vm770_vm2, %v4240_v17, 0  ;;  %v4432_v47 = vsel %vm770_vm2, %v6351_v49, 0  ;;  %v6477_v8 = vld [vmem:[#allocation3 + $0x10] sm:$0xff]  ;;  %v6476_v18 = vld [vmem:[#allocation3] sm:$0xff]  ;;  %vm4283_vm9 = vcmask 15360  }
 0x510   : > { %4319 = vmatpush.bf16.msra.mxu1 %v4310_v15  ;;  %4379 = vmatpush.bf16.msra.mxu2 %v4370_v5  ;;  %v6478_v33 = vld [vmem:[#allocation3 + $0x20] sm:$0xff]  ;;  %v6479_v16 = vld [vmem:[#allocation3 + $0x30] sm:$0xff]  ;;  %v6419_v58 = vld [vmem:[%s9256_s6 + $0x8] sm:$0x1]  ;;  %vm4500_vm10 = vsmask.f32 7440 }
 0x511   : > { %v6373_v32 = vld [vmem:[%s9256_s6 + $0x4] sm:$0x1]  ;;  %v6382_v62 = vld [vmem:[%s9256_s6 + $0x7] sm:$0x1]  ;;  %4441 = vmatpush.bf16.msra.mxu3 %v4432_v47  ;;  %v6364_v52 = vld [vmem:[%s9256_s6 + $0x1] sm:$0x1] }
 0x512   : > { %v4845_v51 = vsel %vm770_vm2, %v6373_v32, 0  ;;  %v4945_v35 = vsel %vm770_vm2, %v6382_v62, 0  ;;  %v4745_v31 = vsel %vm770_vm2, %v6364_v52, 0  ;;  %v6480_v61 = vld [vmem:[#allocation3 + $0x40] sm:$0xff]  ;;  %v6481_v44 = vld [vmem:[#allocation3 + $0x50] sm:$0xff]  ;;  %v5298_v4 = vsel %vm770_vm2, %v6419_v58, 0 }
 0x513   : > { %6331 = vmatmul.msk.bf16.vlgmr.msra.gmra.mxu1 %vm4283_vm9, %v6477_v8  ;;  %6343 = vmatmul.msk.bf16.vlgmr.msra.gmra.mxu2 %vm4283_vm9, %v6476_v18  ;;  %v6482_v12 = vld [vmem:[#allocation3 + $0x60] sm:$0xff]  ;;  %v8598_v14 = vld [vmem:[#allocation3 + $0x70] sm:$0xff]  ;;  %v8647_v27 = vld [vmem:[#allocation3 + $0x8] sm:$0xf]  ;;  %vm5020_vm7 = vcmask 1042432   ;;  %vm5021_vm8 = vcmask 1046532  }
 0x514   : > { %4854 = vmatpush.bf16.msrb.mxu2 %v4845_v51  ;;  %6356 = vmatmul.msk.bf16.vlgmr.msra.gmra.mxu3 %vm4283_vm9, %v6478_v33  ;;  %v8604_v50 = vld [vmem:[#allocation3 + $0x80] sm:$0xff]  ;;  %v8610_v3 = vld [vmem:[#allocation3 + $0x10] sm:$0xf]  ;;  %v8617_v59 = vld [vmem:[#allocation3 + $0x14] sm:$0xf]  ;;  %v4522_v26 = vshll.u32 %v8647_v27, 16 }
 0x515   : > { %4954 = vmatpush.bf16.msrb.mxu3 %v4945_v35  ;;  %4754 = vmatpush.bf16.msrb.mxu1 %v4745_v31  ;;  %v8606_v7 = vld [vmem:[#allocation3] sm:$0xf]  ;;  %v8608_v57 = vld [vmem:[#allocation3 + $0x4] sm:$0xf]  ;;  %v4527_v22 = vshrl.u32 %v8610_v3, 16  ;;  %v4530_v24 = vshll.u32 %v8610_v3, 16  ;;  %vm8854_vm11 = vmor %vm5020_vm7, %vm5021_vm8 }
 0x516   : > { %v4503_v1 = vshrl.u32 %v8606_v7, 16  ;;  %v4506_v10 = vshll.u32 %v8606_v7, 16  ;;  %v4512_v36 = vshll.u32 %v8608_v57, 16  ;;  %v4516_v48 = vshrl.u32 %v8608_v57, 16  ;;  %v6409_v23 = vld [vmem:[%s9256_s6 + $0x5] sm:$0x1] }
 0x517   : > { %v4536_v25 = vshll.u32 %v8617_v59, 16  ;;  %v4540_v6 = vshrl.u32 %v8617_v59, 16  ;;  %v8633_v56 = vld [vmem:[#allocation3 + $0x20] sm:$0xf]  ;;  %v8635_v55 = vld [vmem:[#allocation3 + $0x24] sm:$0xf] }
 0x518   : > { %v4505_v29 = vrot.slane %v4503_v1, 4  ;;  %v4508_v9 = vrot.slane %v4506_v10, 5  ;;  %v5214_v63 = vsel %vm770_vm2, %v6409_v23, 0  ;;  %v4514_v46 = vrot.slane %v4512_v36, 5  ;;  %v6399_v45 = vld [vmem:[%s9256_s6 + $0x2] sm:$0x1] }
 0x519   : > { %v4518_v42 = vrot.slane %v4516_v48, 4  ;;  %v4529_v30 = vrot.slane %v4527_v22, 4  ;;  %5223 = vmatpush.bf16.msra.mxu2 %v5214_v63  ;;  %v4551_v43 = vshrl.u32 %v8633_v56, 16  ;;  %v4554_v37 = vshll.u32 %v8633_v56, 16  ;;  %5307 = vmatpush.bf16.msra.mxu3 %v5298_v4  ;;  %v8649_v13 = vld [vmem:[#allocation3 + $0x18] sm:$0xf] }
 0x51a   : > { %v4560_v60 = vshll.u32 %v8635_v55, 16  ;;  %v4564_v28 = vshrl.u32 %v8635_v55, 16  ;;  %v4532_v54 = vrot.slane %v4530_v24, 5  ;;  %v4538_v19 = vrot.slane %v4536_v25, 5  ;;  %v8653_v17 = vld [vmem:[#allocation3 + $0x28] sm:$0xf] }
 0x51b   : > { %v4542_v53 = vrot.slane %v4540_v6, 4  ;;  %v5130_v34 = vsel %vm770_vm2, %v6399_v45, 0  ;;  %v4509_v38 = vor.u32 %v4508_v9, %v4505_v29  ;;  %v4519_v39 = vor.u32 %v4518_v42, %v4514_v46  ;;  %v6485_v49 = vld [vmem:[#allocation3 + $0x90] sm:$0xff] }
 0x51c   : > { %5139 = vmatpush.bf16.msra.mxu1 %v5130_v34  ;;  %v4553_v11 = vrot.slane %v4551_v43, 4  ;;  %v4556_v21 = vrot.slane %v4554_v37, 5  ;;  %v4562_v2 = vrot.slane %v4560_v60, 5  ;;  %v4566_v41 = vrot.slane %v4564_v28, 4  ;;  %v8665_v52 = vld [vmem:[#allocation3 + $0x30] sm:$0xf] }
 0x51d   : > { %v4533_v20 = vor.u32 %v4532_v54, %v4529_v30  ;;  %v4543_v40 = vor.u32 %v4542_v53, %v4538_v19  ;;  %v4546_v0 = vshll.u32 %v8649_v13, 16  ;;  %vm4499_vm2 = vsmask.f32 3328  ;;  %v8667_v31 = vld [vmem:[#allocation3 + $0x34] sm:$0xf] }
 0x51e   : > { %v4510_v15 = vrot.slane %v4509_v38, 4  ;;  %v4520_v5 = vrot.slane %v4519_v39, 4  ;;  %v4557_v47 = vor.u32 %v4556_v21, %v4553_v11  ;;  %v4570_v18 = vshll.u32 %v8653_v17, 16  ;;  %vm8660_vm6 = vmor %vm4499_vm2, %vm4500_vm10  ;;  %v8685_v43 = vld [vmem:[#allocation3 + $0x38] sm:$0xf] }
 0x51f   : > { %v4534_v32 = vrot.slane %v4533_v20, 4  ;;  %v4544_v62 = vrot.slane %v4543_v40, 4  ;;  %v4548_v51 = vrot.slane %v4546_v0, 5  ;;  %v4575_v10 = vshrl.u32 %v8665_v52, 16  ;;  %v8694_v11 = vld [vmem:[#allocation3 + $0x40] sm:$0xf] }
 0x520   : > { %v4578_v36 = vshll.u32 %v8665_v52, 16  ;;  %v4584_v48 = vshll.u32 %v8667_v31, 16  ;;  %v4588_v22 = vshrl.u32 %v8667_v31, 16  ;;  %v4594_v54 = vshll.u32 %v8685_v43, 16  ;;  %v8696_v21 = vld [vmem:[#allocation3 + $0x44] sm:$0xf] }
 0x521   : > { %v4549_v1 = vsel %vm8660_vm6, %v4544_v62, %v4548_v51  ;;  %v4577_v9 = vrot.slane %v4575_v10, 4 }
 0x522   : > { %v4699_v29 = vunpack.c.l.b16 %v4549_v1  ;;  %v4580_v63 = vrot.slane %v4578_v36, 5  ;;  %v4590_v42 = vrot.slane %v4588_v22, 4  ;;  %v4596_v39 = vrot.slane %v4594_v54, 5 }
 0x523   : > { %6332 = vmatmul.msk.bf16.gmra.mxu1 %vm4283_vm9, %v6478_v33  ;;  %6344 = vmatmul.msk.bf16.gmra.mxu2 %vm4283_vm9, %v6477_v8  ;;  %v4567_v8 = vor.u32 %v4566_v41, %v4562_v2 }
 0x524   : > { %6357 = vmatmul.msk.bf16.gmra.mxu3 %vm4283_vm9, %v6479_v16  ;;  %v4581_v28 = vor.u32 %v4580_v63, %v4577_v9 }
 0x526   : > { %v4582_v34 = vrot.slane %v4581_v28, 4 }
 0x533   : > { %6333 = vmatmul.msk.bf16.gmra.mxu1 %vm4283_vm9, %v6479_v16  ;;  %6345 = vmatmul.msk.bf16.gmra.mxu2 %vm4283_vm9, %v6478_v33  ;;  %v4524_v33 = vrot.slane %v4522_v26, 5 }
 0x534   : > { %6358 = vmatmul.msk.bf16.gmra.mxu3 %vm4283_vm9, %v6480_v61 }
 0x543   : > { %6334 = vmatmul.msk.bf16.gmra.mxu1 %vm4283_vm9, %v6480_v61  ;;  %6346 = vmatmul.msk.bf16.gmra.mxu2 %vm4283_vm9, %v6479_v16  ;;  %v4558_v16 = vrot.slane %v4557_v47, 4  ;;  %v4612_v47 = vshrl.u32 %v8696_v21, 16 }
 0x544   : > { %6359 = vmatmul.msk.bf16.gmra.mxu3 %vm4283_vm9, %v6481_v44 }
 0x545   : > { %v4563_v23 = vsel %vm8660_vm6, %v4558_v16, %v4562_v2  ;;  %v4614_v16 = vrot.slane %v4612_v47, 4 }
 0x546   : > { %v4700_v30 = vunpack.c.l.b16 %v4563_v23 }
 0x553   : > { %6335 = vmatmul.msk.bf16.gmra.mxu1 %vm4283_vm9, %v6481_v44  ;;  %6347 = vmatmul.msk.bf16.gmra.mxu2 %vm4283_vm9, %v6480_v61  ;;  %v4568_v61 = vrot.slane %v4567_v8, 4 }
 0x554   : > { %6360 = vmatmul.msk.bf16.gmra.mxu3 %vm4283_vm9, %v6482_v12 }
 0x563   : > { %6336 = vmatmul.msk.bf16.gmra.mxu1 %vm4283_vm9, %v6482_v12  ;;  %6348 = vmatmul.msk.bf16.gmra.mxu2 %vm4283_vm9, %v6481_v44  ;;  %v4572_v44 = vrot.slane %v4570_v18, 5 }
 0x564   : > { %6361 = vmatmul.msk.bf16.gmra.mxu3 %vm4283_vm9, %v8598_v14 }
 0x565   : > { %v4573_v24 = vsel %vm8660_vm6, %v4568_v61, %v4572_v44  ;;  %v8708_v61 = vld [vmem:[#allocation3 + $0x48] sm:$0xf] }
 0x566   : > { %v4701_v4 = vunpack.c.l.b16 %v4573_v24 }
 0x568   : > { %v8688_v53 = vpack.c.b16 %v4701_v4, %v4700_v30 }
 0x573   : > { %6337 = vmatmul.msk.bf16.gmra.mxu1 %vm4283_vm9, %v8598_v14  ;;  %6349 = vmatmul.msk.bf16.gmra.mxu2 %vm4283_vm9, %v6482_v12  ;;  %v4515_v12 = vsel %vm8660_vm6, %v4510_v15, %v4514_v46  ;;  %v4586_v46 = vrot.slane %v4584_v48, 5  ;;  %v4602_v15 = vshll.u32 %v8694_v11, 16  ;;  %v4618_v48 = vshll.u32 %v8708_v61, 16 }
 0x574   : > { %6362 = vmatmul.msk.bf16.gmra.mxu3 %vm4283_vm9, %v8604_v50  ;;  %v4696_v58 = vunpack.c.l.b16 %v4515_v12 }
 0x575   : > { %v4591_v45 = vor.u32 %v4590_v42, %v4586_v46  ;;  %v4587_v20 = vsel %vm8660_vm6, %v4582_v34, %v4586_v46  ;;  %v4604_v62 = vrot.slane %v4602_v15, 5 }
 0x576   : > { %v4702_v18 = vunpack.c.l.b16 %v4587_v20 }
 0x577   : > { %v4592_v38 = vrot.slane %v4591_v45, 4 }
 0x579   : > { %v4597_v40 = vsel %vm8660_vm6, %v4592_v38, %v4596_v39 }
 0x583   : > { %6338 = vmatmul.msk.bf16.gmra.mxu1 %vm4283_vm9, %v8604_v50  ;;  %6350 = vmatmul.msk.bf16.gmra.mxu2 %vm4283_vm9, %v8598_v14  ;;  %v4525_v50 = vsel %vm8660_vm6, %v4520_v5, %v4524_v33  ;;  %v4539_v14 = vsel %vm8660_vm6, %v4534_v32, %v4538_v19  ;;  %v4608_v5 = vshll.u32 %v8696_v21, 16  ;;  %v4703_v33 = vunpack.c.l.b16 %v4597_v40 }
 0x584   : > { %6363 = vmatmul.msk.bf16.gmra.mxu3 %vm4283_vm9, %v6485_v49  ;;  %v4697_v25 = vunpack.c.l.b16 %v4525_v50  ;;  %v4698_v6 = vunpack.c.l.b16 %v4539_v14  ;;  %v4599_v49 = vshrl.u32 %v8694_v11, 16 }
 0x585   : > { %v4610_v51 = vrot.slane %v4608_v5, 5  ;;  %v8710_v1 = vpack.c.b16 %v4703_v33, %v4702_v18  ;;  %v8745_v33 = vld [vmem:[#allocation3 + $0x60] sm:$0xf] }
 0x586   : > { %v4712_v37 = vpack.c.b16 %v4697_v25, %v4696_v58  ;;  %v4713_v60 = vpack.c.b16 %v4699_v29, %v4698_v6  ;;  %v4601_v32 = vrot.slane %v4599_v49, 4  ;;  %v4620_v58 = vrot.slane %v4618_v48, 5  ;;  %v8720_v25 = vld [vmem:[#allocation3 + $0x50] sm:$0xf]  ;;  %v8722_v29 = vld [vmem:[#allocation3 + $0x54] sm:$0xf] }
 0x587   : > { %v4615_v36 = vor.u32 %v4614_v16, %v4610_v51  ;;  %v4623_v4 = vshrl.u32 %v8720_v25, 16  ;;  %v4632_v28 = vshll.u32 %v8722_v29, 16  ;;  %v4636_v45 = vshrl.u32 %v8722_v29, 16 }
 0x588   : > { %v4605_v10 = vor.u32 %v4604_v62, %v4601_v32  ;;  %v8749_v32 = vld [vmem:[#allocation3 + $0x64] sm:$0xf] }
 0x589   : > { %v4616_v24 = vrot.slane %v4615_v36, 4  ;;  %v4625_v34 = vrot.slane %v4623_v4, 4  ;;  %v4634_v39 = vrot.slane %v4632_v28, 5  ;;  %v4660_v36 = vshrl.u32 %v8749_v32, 16  ;;  %v8761_v4 = vld [vmem:[#allocation3 + $0x68] sm:$0xf] }
 0x58a   : > { %v4606_v23 = vrot.slane %v4605_v10, 4  ;;  %v4656_v10 = vshll.u32 %v8749_v32, 16 }
 0x58b   : > { %v4621_v30 = vsel %vm8660_vm6, %v4616_v24, %v4620_v58 }
 0x58c   : > { %v4611_v42 = vsel %vm8660_vm6, %v4606_v23, %v4610_v51 }
 0x58d   : > { %v4704_v54 = vunpack.c.l.b16 %v4611_v42 }
 0x590   : > { %v4321_v19 = vpop.f32.mrf.mxu1 }
 0x593   : > { %6365 = vmatmul.msk.bf16.vlgmr.msrb.gmra.mxu1 %vm4283_vm9, %v4712_v37  ;;  %6374 = vmatmul.msk.bf16.vlgmr.msrb.gmra.mxu2 %vm4283_vm9, %v4713_v60 }
 0x594   : > { %6383 = vmatmul.msk.bf16.vlgmr.msrb.gmra.mxu3 %vm4283_vm9, %v8688_v53 }
 0x596   : > { %v4381_v2 = vpop.f32.mrf.mxu2 }
 0x597   : > { %v4382_v41 = vadd.f32 %v4381_v2, %v4321_v19  ;;  %v4443_v26 = vpop.f32.mrf.mxu3  ;;  %v4705_v19 = vunpack.c.l.b16 %v4621_v30  ;;  %v4638_v2 = vrot.slane %v4636_v45, 4 }
 0x598   : > { %v4323_v0 = vpop.f32.mrf.mxu1 }
 0x599   : > { %v8706_v8 = vadd.f32 %v4443_v26, %v4382_v41  ;;  %v8734_v26 = vld [vmem:[#allocation3 + $0x58] sm:$0xf]  ;;  %v8736_v49 = vpack.c.b16 %v4705_v19, %v4704_v54  ;;  %v4639_v47 = vor.u32 %v4638_v2, %v4634_v39 }
 0x59a   : > { %v4642_v18 = vshll.u32 %v8734_v26, 16 }
 0x59b   : > { %v4640_v51 = vrot.slane %v4639_v47, 4 }
 0x59c   : > { %v4644_v16 = vrot.slane %v4642_v18, 5 }
 0x59e   : > { %v4383_v44 = vpop.f32.mrf.mxu2  ;;  %v4645_v58 = vsel %vm8660_vm6, %v4640_v51, %v4644_v16 }
 0x59f   : > { %v4384_v12 = vadd.f32 %v4383_v44, %v4323_v0  ;;  %v4445_v50 = vpop.f32.mrf.mxu3  ;;  %v4707_v30 = vunpack.c.l.b16 %v4645_v58 }
 0x5a0   : > { %v4326_v14 = vpop.f32.mrf.mxu1 }
 0x5a1   : > { %v8713_v22 = vadd.f32 %v4445_v50, %v4384_v12  ;;  %v4647_v12 = vshrl.u32 %v8745_v33, 16 }
 0x5a3   : > { %6366 = vmatmul.msk.bf16.gmra.mxu1 %vm4283_vm9, %v4713_v60  ;;  %6375 = vmatmul.msk.bf16.gmra.mxu2 %vm4283_vm9, %v8688_v53  ;;  %v4626_v60 = vshll.u32 %v8720_v25, 16 }
 0x5a4   : > { %6384 = vmatmul.msk.bf16.gmra.mxu3 %vm4283_vm9, %v8710_v1 }
 0x5a5   : > { %v4628_v38 = vrot.slane %v4626_v60, 5 }
 0x5a6   : > { %v4386_v6 = vpop.f32.mrf.mxu2 }
 0x5a7   : > { %v4387_v9 = vadd.f32 %v4386_v6, %v4326_v14  ;;  %v4448_v63 = vpop.f32.mrf.mxu3  ;;  %v4629_v5 = vor.u32 %v4628_v38, %v4625_v34  ;;  %v4649_v6 = vrot.slane %v4647_v12, 4  ;;  %v4666_v34 = vshll.u32 %v8761_v4, 16 }
 0x5a8   : > { %v4328_v46 = vpop.f32.mrf.mxu1 }
 0x5a9   : > { %v8729_v37 = vadd.f32 %v4448_v63, %v4387_v9  ;;  %v4630_v62 = vrot.slane %v4629_v5, 4  ;;  %v4658_v63 = vrot.slane %v4656_v10, 5  ;;  %v8776_v5 = vld [vmem:[#allocation3 + $0x74] sm:$0xf] }
 0x5ab   : > { %v4635_v24 = vsel %vm8660_vm6, %v4630_v62, %v4634_v39 }
 0x5ac   : > { %v4706_v42 = vunpack.c.l.b16 %v4635_v24 }
 0x5ae   : > { %v4388_v41 = vpop.f32.mrf.mxu2  ;;  %v8764_v39 = vpack.c.b16 %v4707_v30, %v4706_v42 }
 0x5af   : > { %v4389_v20 = vadd.f32 %v4388_v41, %v4328_v46  ;;  %v4450_v40 = vpop.f32.mrf.mxu3  ;;  %v4662_v46 = vrot.slane %v4660_v36, 4 }
 0x5b0   : > { %v4331_v0 = vpop.f32.mrf.mxu1 }
 0x5b1   : > { %v8738_v15 = vadd.f32 %v4450_v40, %v4389_v20  ;;  %v4663_v19 = vor.u32 %v4662_v46, %v4658_v63  ;;  %v4668_v40 = vrot.slane %v4666_v34, 5  ;;  %v8795_v34 = vld [vmem:[#allocation3 + $0x80] sm:$0xf] }
 0x5b3   : > { %6367 = vmatmul.msk.bf16.gmra.mxu1 %vm4283_vm9, %v8688_v53  ;;  %6376 = vmatmul.msk.bf16.gmra.mxu2 %vm4283_vm9, %v8710_v1  ;;  %v4650_v53 = vshll.u32 %v8745_v33, 16  ;;  %v4664_v20 = vrot.slane %v4663_v19, 4 }
 0x5b4   : > { %6385 = vmatmul.msk.bf16.gmra.mxu3 %vm4283_vm9, %v8736_v49 }
 0x5b5   : > { %v4652_v9 = vrot.slane %v4650_v53, 5 }
 0x5b6   : > { %v4391_v44 = vpop.f32.mrf.mxu2 }
 0x5b7   : > { %v4392_v50 = vadd.f32 %v4391_v44, %v4331_v0  ;;  %v4453_v14 = vpop.f32.mrf.mxu3  ;;  %v4653_v54 = vor.u32 %v4652_v9, %v4649_v6  ;;  %v8774_v0 = vld [vmem:[#allocation3 + $0x70] sm:$0xf]  ;;  %v8788_v9 = vld [vmem:[#allocation3 + $0x78] sm:$0xf] }
 0x5b8   : > { %v4333_v48 = vpop.f32.mrf.mxu1  ;;  %v4671_v44 = vshrl.u32 %v8774_v0, 16  ;;  %v4674_v12 = vshll.u32 %v8774_v0, 16 }
 0x5b9   : > { %v8755_v23 = vadd.f32 %v4453_v14, %v4392_v50  ;;  %v4654_v41 = vrot.slane %v4653_v54, 4  ;;  %v4680_v50 = vshll.u32 %v8776_v5, 16  ;;  %v4684_v14 = vshrl.u32 %v8776_v5, 16 }
 0x5ba   : > { %v4676_v24 = vrot.slane %v4674_v12, 5  ;;  %v4690_v54 = vshll.u32 %v8788_v9, 16 }
 0x5bb   : > { %v4659_v51 = vsel %vm8660_vm6, %v4654_v41, %v4658_v63  ;;  %v4682_v58 = vrot.slane %v4680_v50, 5  ;;  %v4686_v6 = vrot.slane %v4684_v14, 4 }
 0x5bc   : > { %v4708_v10 = vunpack.c.l.b16 %v4659_v51 }
 0x5be   : > { %v4393_v60 = vpop.f32.mrf.mxu2 }
 0x5bf   : > { %v4394_v28 = vadd.f32 %v4393_v60, %v4333_v48  ;;  %v4455_v45 = vpop.f32.mrf.mxu3  ;;  %v4673_v48 = vrot.slane %v4671_v44, 4 }
 0x5c0   : > { %v4336_v38 = vpop.f32.mrf.mxu1 }
 0x5c1   : > { %v8766_v2 = vadd.f32 %v4455_v45, %v4394_v28  ;;  %v4677_v28 = vor.u32 %v4676_v24, %v4673_v48  ;;  %v4687_v45 = vor.u32 %v4686_v6, %v4682_v58  ;;  %v8815_v6 = vld [vmem:[#allocation3 + $0x88] sm:$0xf] }
 0x5c3   : > { %6368 = vmatmul.msk.bf16.gmra.mxu1 %vm4283_vm9, %v8710_v1  ;;  %6377 = vmatmul.msk.bf16.gmra.mxu2 %vm4283_vm9, %v8736_v49  ;;  %v4669_v1 = vsel %vm8660_vm6, %v4664_v20, %v4668_v40  ;;  %v4678_v41 = vrot.slane %v4677_v28, 4  ;;  %v4688_v20 = vrot.slane %v4687_v45, 4  ;;  %v4692_v40 = vrot.slane %v4690_v54, 5 }
 0x5c4   : > { %6386 = vmatmul.msk.bf16.gmra.mxu3 %vm4283_vm9, %v8764_v39  ;;  %v4709_v36 = vunpack.c.l.b16 %v4669_v1  ;;  %v4832_v28 = vshll.u32 %v8815_v6, 16 }
 0x5c5   : > { %v4683_v12 = vsel %vm8660_vm6, %v4678_v41, %v4682_v58  ;;  %v4693_v50 = vsel %vm8660_vm6, %v4688_v20, %v4692_v40 }
 0x5c6   : > { %v4396_v47 = vpop.f32.mrf.mxu2  ;;  %v8790_v60 = vpack.c.b16 %v4709_v36, %v4708_v10 }
 0x5c7   : > { %v4397_v18 = vadd.f32 %v4396_v47, %v4336_v38  ;;  %v4458_v62 = vpop.f32.mrf.mxu3  ;;  %v8797_v38 = vld [vmem:[#allocation3 + $0x84] sm:$0xf]  ;;  %v4813_v47 = vshrl.u32 %v8795_v34, 16 }
 0x5c8   : > { %v4338_v16 = vpop.f32.mrf.mxu1  ;;  %v4826_v51 = vshrl.u32 %v8797_v38, 16 }
 0x5c9   : > { %v8786_v53 = vadd.f32 %v4458_v62, %v4397_v18  ;;  %v4816_v18 = vshll.u32 %v8795_v34, 16  ;;  %v4822_v62 = vshll.u32 %v8797_v38, 16  ;;  %v4815_v14 = vrot.slane %v4813_v47, 4 }
 0x5ca   : > { %v4828_v24 = vrot.slane %v4826_v51, 4  ;;  %v8828_v51 = vld [vmem:[#allocation3 + $0x94] sm:$0xf] }
 0x5cb   : > { %v4818_v36 = vrot.slane %v4816_v18, 5  ;;  %v4824_v48 = vrot.slane %v4822_v62, 5  ;;  %v4834_v18 = vrot.slane %v4832_v28, 5  ;;  %v8826_v62 = vld [vmem:[#allocation3 + $0x90] sm:$0xf] }
 0x5cc   : > { %9377 = vst [vmem:[#allocation8_spill] sm:$0xff] %v8826_v62 }
 0x5ce   : > { %v4398_v63 = vpop.f32.mrf.mxu2 }
 0x5cf   : > { %v4399_v46 = vadd.f32 %v4398_v63, %v4338_v16  ;;  %v4460_v42 = vpop.f32.mrf.mxu3  ;;  %v4710_v63 = vunpack.c.l.b16 %v4683_v12  ;;  %v4913_v12 = vshrl.u32 %v8826_v62, 16 }
 0x5d0   : > { %v4341_v30 = vpop.f32.mrf.mxu1 }
 0x5d1   : > { %v8793_v19 = vadd.f32 %v4460_v42, %v4399_v46  ;;  %v4711_v46 = vunpack.c.l.b16 %v4693_v50  ;;  %v4819_v42 = vor.u32 %v4818_v36, %v4815_v14  ;;  %v4922_v50 = vshll.u32 %v8828_v51, 16 }
 0x5d2   : > { %v4926_v14 = vshrl.u32 %v8828_v51, 16  ;;  %v5025_v36 = vrot.slane %v8608_v57, 5  ;;  %v5028_v57 = vrot.slane %v8647_v27, 5 }
 0x5d3   : > { %6369 = vmatmul.msk.bf16.gmra.mxu1 %vm4283_vm9, %v8736_v49  ;;  %6378 = vmatmul.msk.bf16.gmra.mxu2 %vm4283_vm9, %v8764_v39  ;;  %v4820_v40 = vrot.slane %v4819_v42, 4 }
 0x5d4   : > { %6387 = vmatmul.msk.bf16.gmra.mxu3 %vm4283_vm9, %v8790_v60 }
 0x5d6   : > { %v4401_v1 = vpop.f32.mrf.mxu2 }
 0x5d7   : > { %v4402_v16 = vadd.f32 %v4401_v1, %v4341_v30  ;;  %v4463_v49 = vpop.f32.mrf.mxu3  ;;  %v4829_v30 = vor.u32 %v4828_v24, %v4824_v48  ;;  %v8818_v1 = vpack.c.b16 %v4711_v46, %v4710_v63  ;;  %v5032_v46 = vrot.slane %v8617_v59, 5 }
 0x5d8   : > { %v4343_v44 = vpop.f32.mrf.mxu1 }
 0x5d9   : > { %v8813_v10 = vadd.f32 %v4463_v49, %v4402_v16  ;;  %v4830_v47 = vrot.slane %v4829_v30, 4  ;;  %v4825_v16 = vsel %vm8660_vm6, %v4820_v40, %v4824_v48  ;;  %v5039_v48 = vrot.slane %v8635_v55, 5 }
 0x5da   : > { %v4838_v28 = vunpack.c.l.b16 %v4825_v16  ;;  %v4924_v40 = vrot.slane %v4922_v50, 5  ;;  %v5034_v59 = vrot.slane %v5032_v46, 4  ;;  %v5035_v55 = vrot.slane %v8649_v13, 5 }
 0x5db   : > { %v4835_v49 = vsel %vm8660_vm6, %v4830_v47, %v4834_v18  ;;  %v4928_v47 = vrot.slane %v4926_v14, 4  ;;  %v6391_v18 = vrot.slane %v8606_v7, 9  ;;  %v5041_v16 = vrot.slane %v5039_v48, 4 }
 0x5dd   : > { %v4929_v50 = vor.u32 %v4928_v47, %v4924_v40 }
 0x5de   : > { %v4403_v45 = vpop.f32.mrf.mxu2 }
 0x5df   : > { %v4404_v54 = vadd.f32 %v4403_v45, %v4343_v44  ;;  %v4465_v58 = vpop.f32.mrf.mxu3  ;;  %v4839_v45 = vunpack.c.l.b16 %v4835_v49  ;;  %v5042_v49 = vrot.slane %v8653_v17, 5 }
 0x5e0   : > { %v4346_v41 = vpop.f32.mrf.mxu1 }
 0x5e1   : > { %v8820_v20 = vadd.f32 %v4465_v58, %v4404_v54  ;;  %v4915_v54 = vrot.slane %v4913_v12, 4 }
 0x5e3   : > { %6370 = vmatmul.msk.bf16.gmra.mxu1 %vm4283_vm9, %v8764_v39  ;;  %6379 = vmatmul.msk.bf16.gmra.mxu2 %vm4283_vm9, %v8790_v60  ;;  %v4916_v39 = vshll.u32 %v8826_v62, 16  ;;  %v5027_v62 = vrot.slane %v5025_v36, 4 }
 0x5e4   : > { %6388 = vmatmul.msk.bf16.gmra.mxu3 %vm4283_vm9, %v8818_v1 }
 0x5e5   : > { %v4918_v58 = vrot.slane %v4916_v39, 5  ;;  %v4840_v39 = vpack.c.b16 %v4839_v45, %v4838_v28  ;;  %v5029_v13 = vsel %vm8854_vm11, %v5027_v62, %v5028_v57 }
 0x5e6   : > { %v4406_v44 = vpop.f32.mrf.mxu2 }
 0x5e7   : > { %v4407_v24 = vadd.f32 %v4406_v44, %v4346_v41  ;;  %v4468_v63 = vpop.f32.mrf.mxu3  ;;  %v6392_v41 = vrot.slane %v8610_v3, 9  ;;  %v8848_v44 = vld [vmem:[#allocation3 + $0x98] sm:$0xf]  ;;  %v4919_v7 = vor.u32 %v4918_v58, %v4915_v54  ;;  %v5082_v54 = vunpack.c.l.b16 %v5029_v13 }
 0x5e8   : > { %v4348_v42 = vpop.f32.mrf.mxu1  ;;  %9378 = vst [vmem:[#allocation7_spill] sm:$0xff] %v8848_v44  ;;  %v4932_v27 = vshll.u32 %v8848_v44, 16  ;;  %v5036_v58 = vsel %vm8854_vm11, %v5034_v59, %v5035_v55  ;;  %v4930_v55 = vrot.slane %v4929_v50, 4 }
 0x5e9   : > { %v8843_v30 = vadd.f32 %v4468_v63, %v4407_v24  ;;  %v6393_v24 = vrot.slane %v8633_v56, 9  ;;  %v5026_v56 = vsel %vm8854_vm11, %v6391_v18, %v5025_v36  ;;  %v5033_v17 = vsel %vm8854_vm11, %v6392_v41, %v5032_v46 }
 0x5ea   : > { %v5081_v45 = vunpack.c.l.b16 %v5026_v56  ;;  %v5083_v47 = vunpack.c.l.b16 %v5033_v17  ;;  %v5043_v36 = vsel %vm8854_vm11, %v5041_v16, %v5042_v49  ;;  %v4920_v59 = vrot.slane %v4919_v7, 4 }
 0x5eb   : > { %v5086_v57 = vunpack.c.l.b16 %v5043_v36 }
 0x5ec   : > { %v5097_v62 = vpack.c.b16 %v5082_v54, %v5081_v45 }
 0x5ee   : > { %v4408_v12 = vpop.f32.mrf.mxu2 }
 0x5ef   : > { %v4409_v14 = vadd.f32 %v4408_v12, %v4348_v42  ;;  %v4470_v63 = vpop.f32.mrf.mxu3  ;;  %v5084_v42 = vunpack.c.l.b16 %v5036_v58  ;;  %v5040_v12 = vsel %vm8854_vm11, %v6393_v24, %v5039_v48  ;;  %v4934_v48 = vrot.slane %v4932_v27, 5 }
 0x5f0   : > { %v4351_v28 = vpop.f32.mrf.mxu1  ;;  %v5085_v18 = vunpack.c.l.b16 %v5040_v12 }
 0x5f1   : > { %v8866_v44 = vadd.f32 %v4470_v63, %v4409_v14  ;;  %v5098_v46 = vpack.c.b16 %v5084_v42, %v5083_v47  ;;  %v4935_v56 = vsel %vm8660_vm6, %v4930_v55, %v4934_v48  ;;  %v6394_v48 = vrot.slane %v8665_v52, 9 }
 0x5f2   : > { %v8877_v41 = vpack.c.b16 %v5086_v57, %v5085_v18  ;;  %v4939_v17 = vunpack.c.l.b16 %v4935_v56 }
 0x5f3   : > { %6371 = vmatmul.msk.bf16.gmra.mxu1 %vm4283_vm9, %v8790_v60  ;;  %6380 = vmatmul.msk.bf16.gmra.mxu2 %vm4283_vm9, %v8818_v1  ;;  %v4925_v60 = vsel %vm8660_vm6, %v4920_v59, %v4924_v40 }
 0x5f4   : > { %6389 = vmatmul.msk.bf16.gmra.mxu3 %vm4283_vm9, %v4840_v39  ;;  %v4938_v13 = vunpack.c.l.b16 %v4925_v60 }
 0x5f6   : > { %v4411_v24 = vpop.f32.mrf.mxu2  ;;  %v4940_v50 = vpack.c.b16 %v4939_v17, %v4938_v13 }
 0x5f7   : > { %v4412_v14 = vadd.f32 %v4411_v24, %v4351_v28  ;;  %v4473_v16 = vpop.f32.mrf.mxu3 }
 0x5f8   : > { %v4353_v49 = vpop.f32.mrf.mxu1 }
 0x5f9   : > { %v8879_v63 = vadd.f32 %v4473_v16, %v4412_v14 }
 0x5fe   : > { %v4413_v45 = vpop.f32.mrf.mxu2 }
 0x5ff   : > { %v4414_v54 = vadd.f32 %v4413_v45, %v4353_v49  ;;  %v4475_v58 = vpop.f32.mrf.mxu3 }
 0x600   : > { %v4356_v7 = vpop.f32.mrf.mxu1 }
 0x601   : > { %v8885_v27 = vadd.f32 %v4475_v58, %v4414_v54 }
 0x603   : > { %6372 = vmatmul.msk.bf16.gmra.mxu1 %vm4283_vm9, %v8818_v1  ;;  %6381 = vmatmul.msk.bf16.gmra.mxu2 %vm4283_vm9, %v4840_v39  ;;  %v5046_v1 = vrot.slane %v8667_v31, 5  ;;  %v5049_v39 = vrot.slane %v8685_v43, 5 }
 0x604   : > { %6390 = vmatmul.msk.bf16.gmra.mxu3 %vm4283_vm9, %v4940_v50 }
 0x605   : > { %v5048_v24 = vrot.slane %v5046_v1, 4 }
 0x606   : > { %v4416_v40 = vpop.f32.mrf.mxu2 }
 0x607   : > { %v4417_v28 = vadd.f32 %v4416_v40, %v4356_v7  ;;  %v4478_v35 = vpop.f32.mrf.mxu3  ;;  %v5053_v40 = vrot.slane %v8696_v21, 5 }
 0x608   : > { %v4358_v47 = vpop.f32.mrf.mxu1 }
 0x609   : > { %v8891_v42 = vadd.f32 %v4478_v35, %v4417_v28  ;;  %v6395_v28 = vrot.slane %v8694_v11, 9  ;;  %v5055_v35 = vrot.slane %v5053_v40, 4 }
 0x60e   : > { %v4418_v12 = vpop.f32.mrf.mxu2 }
 0x60f   : > { %v4419_v36 = vadd.f32 %v4418_v12, %v4358_v47  ;;  %v4480_v18 = vpop.f32.mrf.mxu3 }
 0x610   : > { %v4756_v57 = vpop.f32.mrf.mxu1 }
 0x611   : > { %v8893_v59 = vadd.f32 %v4480_v18, %v4419_v36  ;;  %v4796_v55 = vadd.f32 %v4756_v57, %v8706_v8  ;;  %v5047_v8 = vsel %vm8854_vm11, %v6394_v48, %v5046_v1 }
 0x612   : > { %v5087_v13 = vunpack.c.l.b16 %v5047_v8 }
 0x613   : > { %6400 = vmatmul.msk.bf16.vlgmr.msra.gmra.mxu1 %vm4283_vm9, %v5097_v62  ;;  %6410 = vmatmul.msk.bf16.vlgmr.msra.gmra.mxu2 %vm4283_vm9, %v5098_v46  ;;  %v5050_v62 = vsel %vm8854_vm11, %v5048_v24, %v5049_v39 }
 0x614   : > { %6420 = vmatmul.msk.bf16.vlgmr.msra.gmra.mxu3 %vm4283_vm9, %v8877_v41  ;;  %v5088_v17 = vunpack.c.l.b16 %v5050_v62 }
 0x616   : > { %v4856_v14 = vpop.f32.mrf.mxu2  ;;  %v5100_v58 = vpack.c.b16 %v5088_v17, %v5087_v13 }
 0x617   : > { %v4896_v16 = vadd.f32 %v4856_v14, %v4796_v55  ;;  %v4956_v49 = vpop.f32.mrf.mxu3 }
 0x618   : > { %v4758_v60 = vpop.f32.mrf.mxu1 }
 0x619   : > { %v8903_v56 = vadd.f32 %v4956_v49, %v4896_v16  ;;  %v4797_v31 = vadd.f32 %v4758_v60, %v8713_v22  ;;  %v5056_v22 = vrot.slane %v8708_v61, 5  ;;  %v5060_v49 = vrot.slane %v8722_v29, 5 }
 0x61a   : > { %v6396_v60 = vrot.slane %v8720_v25, 9 }
 0x61e   : > { %v4858_v43 = vpop.f32.mrf.mxu2 }
 0x61f   : > { %v4897_v45 = vadd.f32 %v4858_v43, %v4797_v31  ;;  %v4958_v52 = vpop.f32.mrf.mxu3  ;;  %v5062_v31 = vrot.slane %v5060_v49, 4 }
 0x620   : > { %v4761_v54 = vpop.f32.mrf.mxu1 }
 0x621   : > { %v8910_v7 = vadd.f32 %v4958_v52, %v4897_v45  ;;  %v4798_v50 = vadd.f32 %v4761_v54, %v8729_v37  ;;  %v5054_v37 = vsel %vm8854_vm11, %v6395_v28, %v5053_v40 }
 0x622   : > { %v5089_v55 = vunpack.c.l.b16 %v5054_v37 }
 0x623   : > { %6401 = vmatmul.msk.bf16.gmra.mxu1 %vm4283_vm9, %v5098_v46  ;;  %6411 = vmatmul.msk.bf16.gmra.mxu2 %vm4283_vm9, %v8877_v41  ;;  %v5057_v46 = vsel %vm8854_vm11, %v5055_v35, %v5056_v22  ;;  %v5067_v35 = vrot.slane %v8749_v32, 5 }
 0x624   : > { %6421 = vmatmul.msk.bf16.gmra.mxu3 %vm4283_vm9, %v5100_v58  ;;  %v5090_v1 = vunpack.c.l.b16 %v5057_v46 }
 0x626   : > { %v4861_v47 = vpop.f32.mrf.mxu2  ;;  %v5101_v24 = vpack.c.b16 %v5090_v1, %v5089_v55 }
 0x627   : > { %v4898_v12 = vadd.f32 %v4861_v47, %v4798_v50  ;;  %v4961_v36 = vpop.f32.mrf.mxu3  ;;  %v5069_v47 = vrot.slane %v5067_v35, 4 }
 0x628   : > { %v4763_v18 = vpop.f32.mrf.mxu1 }
 0x629   : > { %v8920_v57 = vadd.f32 %v4961_v36, %v4898_v12  ;;  %v4799_v21 = vadd.f32 %v4763_v18, %v8738_v15  ;;  %v5063_v15 = vrot.slane %v8734_v26, 5  ;;  %v5070_v12 = vrot.slane %v8761_v4, 5 }
 0x62e   : > { %v4863_v61 = vpop.f32.mrf.mxu2 }
 0x62f   : > { %v4899_v39 = vadd.f32 %v4863_v61, %v4799_v21  ;;  %v4963_v11 = vpop.f32.mrf.mxu3 }
 0x630   : > { %v4766_v48 = vpop.f32.mrf.mxu1 }
 0x631   : > { %v8927_v14 = vadd.f32 %v4963_v11, %v4899_v39  ;;  %v4800_v16 = vadd.f32 %v4766_v48, %v8755_v23  ;;  %v5061_v23 = vsel %vm8854_vm11, %v6396_v60, %v5060_v49  ;;  %v5074_v49 = vrot.slane %v8776_v5, 5 }
 0x632   : > { %v5091_v45 = vunpack.c.l.b16 %v5061_v23  ;;  %v5077_v60 = vrot.slane %v8788_v9, 5 }
 0x633   : > { %6402 = vmatmul.msk.bf16.gmra.mxu1 %vm4283_vm9, %v8877_v41  ;;  %6412 = vmatmul.msk.bf16.gmra.mxu2 %vm4283_vm9, %v5100_v58  ;;  %v5064_v41 = vsel %vm8854_vm11, %v5062_v31, %v5063_v15  ;;  %v5076_v15 = vrot.slane %v5074_v49, 4 }
 0x634   : > { %6422 = vmatmul.msk.bf16.gmra.mxu3 %vm4283_vm9, %v5101_v24  ;;  %v5092_v52 = vunpack.c.l.b16 %v5064_v41 }
 0x636   : > { %v4866_v8 = vpop.f32.mrf.mxu2  ;;  %v5102_v40 = vpack.c.b16 %v5092_v52, %v5091_v45 }
 0x637   : > { %v4900_v62 = vadd.f32 %v4866_v8, %v4800_v16  ;;  %v4966_v13 = vpop.f32.mrf.mxu3 }
 0x638   : > { %v4768_v17 = vpop.f32.mrf.mxu1 }
 0x639   : > { %v8937_v43 = vadd.f32 %v4966_v13, %v4900_v62  ;;  %v4801_v29 = vadd.f32 %v4768_v17, %v8766_v2  ;;  %v6397_v2 = vrot.slane %v8745_v33, 9 }
 0x63b   : > { %v5068_v32 = vsel %vm8854_vm11, %v6397_v2, %v5067_v35 }
 0x63c   : > { %v5093_v55 = vunpack.c.l.b16 %v5068_v32 }
 0x63e   : > { %v4868_v26 = vpop.f32.mrf.mxu2 }
 0x63f   : > { %v4901_v54 = vadd.f32 %v4868_v26, %v4801_v29  ;;  %v4968_v25 = vpop.f32.mrf.mxu3 }
 0x640   : > { %v4771_v50 = vpop.f32.mrf.mxu1 }
 0x641   : > { %v8944_v22 = vadd.f32 %v4968_v25, %v4901_v54  ;;  %v4802_v28 = vadd.f32 %v4771_v50, %v8786_v53  ;;  %v5200_v25 = vrot.slane %v8797_v38, 5 }
 0x643   : > { %6403 = vmatmul.msk.bf16.gmra.mxu1 %vm4283_vm9, %v5100_v58  ;;  %6413 = vmatmul.msk.bf16.gmra.mxu2 %vm4283_vm9, %v5101_v24  ;;  %v5071_v58 = vsel %vm8854_vm11, %v5069_v47, %v5070_v12  ;;  %v5202_v50 = vrot.slane %v5200_v25, 4 }
 0x644   : > { %6423 = vmatmul.msk.bf16.gmra.mxu3 %vm4283_vm9, %v5102_v40  ;;  %v5094_v1 = vunpack.c.l.b16 %v5071_v58 }
 0x646   : > { %v4871_v36 = vpop.f32.mrf.mxu2  ;;  %v5103_v11 = vpack.c.b16 %v5094_v1, %v5093_v55  ;;  %v5284_v1 = vrot.slane %v8828_v51, 5 }
 0x647   : > { %v4902_v18 = vadd.f32 %v4871_v36, %v4802_v28  ;;  %v4971_v21 = vpop.f32.mrf.mxu3  ;;  %v5203_v28 = vrot.slane %v8815_v6, 5 }
 0x648   : > { %v4773_v37 = vpop.f32.mrf.mxu1 }
 0x649   : > { %v8953_v46 = vadd.f32 %v4971_v21, %v4902_v18  ;;  %v4803_v53 = vadd.f32 %v4773_v37, %v8793_v19  ;;  %v6398_v19 = vrot.slane %v8774_v0, 9 }
 0x64b   : > { %v5075_v5 = vsel %vm8854_vm11, %v6398_v19, %v5074_v49 }
 0x64c   : > { %v5095_v29 = vunpack.c.l.b16 %v5075_v5 }
 0x64e   : > { %v4873_v33 = vpop.f32.mrf.mxu2 }
 0x64f   : > { %v4903_v61 = vadd.f32 %v4873_v33, %v4803_v53  ;;  %v4973_v39 = vpop.f32.mrf.mxu3 }
 0x650   : > { %v4776_v4 = vpop.f32.mrf.mxu1 }
 0x651   : > { %v8960_v48 = vadd.f32 %v4973_v39, %v4903_v61  ;;  %v4804_v16 = vadd.f32 %v4776_v4, %v8813_v10  ;;  %v5286_v61 = vrot.slane %v5284_v1, 4  ;;  %v9382_v39 = vld [vmem:[#allocation7_spill] sm:$0xff] }
 0x652   : > { %v5287_v4 = vrot.slane %v9382_v39, 5 }
 0x653   : > { %6404 = vmatmul.msk.bf16.gmra.mxu1 %vm4283_vm9, %v5101_v24  ;;  %6414 = vmatmul.msk.bf16.gmra.mxu2 %vm4283_vm9, %v5102_v40  ;;  %v5078_v24 = vsel %vm8854_vm11, %v5076_v15, %v5077_v60 }
 0x654   : > { %6424 = vmatmul.msk.bf16.gmra.mxu3 %vm4283_vm9, %v5103_v11  ;;  %v5096_v23 = vunpack.c.l.b16 %v5078_v24 }
 0x656   : > { %v4876_v31 = vpop.f32.mrf.mxu2  ;;  %v5104_v52 = vpack.c.b16 %v5096_v23, %v5095_v29 }
 0x657   : > { %v4904_v8 = vadd.f32 %v4876_v31, %v4804_v16  ;;  %v4976_v62 = vpop.f32.mrf.mxu3 }
 0x658   : > { %v4778_v13 = vpop.f32.mrf.mxu1 }
 0x659   : > { %v8969_v17 = vadd.f32 %v4976_v62, %v4904_v8  ;;  %v4805_v10 = vadd.f32 %v4778_v13, %v8820_v20  ;;  %v6408_v20 = vrot.slane %v8795_v34, 9 }
 0x65b   : > { %v5201_v38 = vsel %vm8854_vm11, %v6408_v20, %v5200_v25 }
 0x65c   : > { %v5207_v18 = vunpack.c.l.b16 %v5201_v38 }
 0x65e   : > { %v4878_v0 = vpop.f32.mrf.mxu2 }
 0x65f   : > { %v4905_v41 = vadd.f32 %v4878_v0, %v4805_v10  ;;  %v4978_v45 = vpop.f32.mrf.mxu3 }
 0x660   : > { %v4781_v9 = vpop.f32.mrf.mxu1 }
 0x661   : > { %v8976_v26 = vadd.f32 %v4978_v45, %v4905_v41  ;;  %v4806_v54 = vadd.f32 %v4781_v9, %v8843_v30 }
 0x663   : > { %6405 = vmatmul.msk.bf16.gmra.mxu1 %vm4283_vm9, %v5102_v40  ;;  %6415 = vmatmul.msk.bf16.gmra.mxu2 %vm4283_vm9, %v5103_v11  ;;  %v5204_v40 = vsel %vm8854_vm11, %v5202_v50, %v5203_v28 }
 0x664   : > { %6425 = vmatmul.msk.bf16.gmra.mxu3 %vm4283_vm9, %v5104_v52  ;;  %v5208_v21 = vunpack.c.l.b16 %v5204_v40 }
 0x666   : > { %v4881_v35 = vpop.f32.mrf.mxu2  ;;  %v5209_v32 = vpack.c.b16 %v5208_v21, %v5207_v18 }
 0x667   : > { %v4906_v2 = vadd.f32 %v4881_v35, %v4806_v54  ;;  %v4981_v47 = vpop.f32.mrf.mxu3 }
 0x668   : > { %v4783_v12 = vpop.f32.mrf.mxu1 }
 0x669   : > { %v8985_v36 = vadd.f32 %v4981_v47, %v4906_v2  ;;  %v4807_v30 = vadd.f32 %v4783_v12, %v8866_v44  ;;  %v9381_v44 = vld [vmem:[#allocation8_spill] sm:$0xff] }
 0x66a   : > { %v6418_v33 = vrot.slane %v9381_v44, 9  ;;  %v9023_v47 = vld [vmem:[%s9257_s7] ss:$0 sm:$0xff] }
 0x66c   : > { %v5285_v51 = vsel %vm8854_vm11, %v6418_v33, %v5284_v1 }
 0x66d   : > { %v5291_v31 = vunpack.c.l.b16 %v5285_v51 }
 0x66e   : > { %v4883_v34 = vpop.f32.mrf.mxu2 }
 0x66f   : > { %v4907_v37 = vadd.f32 %v4883_v34, %v4807_v30  ;;  %v4983_v53 = vpop.f32.mrf.mxu3 }
 0x670   : > { %v4786_v6 = vpop.f32.mrf.mxu1 }
 0x671   : > { %v8992_v58 = vadd.f32 %v4983_v53, %v4907_v37  ;;  %v4808_v55 = vadd.f32 %v4786_v6, %v8879_v63 }
 0x673   : > { %6406 = vmatmul.msk.bf16.gmra.mxu1 %vm4283_vm9, %v5103_v11  ;;  %6416 = vmatmul.msk.bf16.gmra.mxu2 %vm4283_vm9, %v5104_v52  ;;  %v5288_v11 = vsel %vm8854_vm11, %v5286_v61, %v5287_v4 }
 0x674   : > { %6426 = vmatmul.msk.bf16.gmra.mxu3 %vm4283_vm9, %v5209_v32  ;;  %v5292_v8 = vunpack.c.l.b16 %v5288_v11 }
 0x676   : > { %v4886_v16 = vpop.f32.mrf.mxu2  ;;  %v5293_v24 = vpack.c.b16 %v5292_v8, %v5291_v31 }
 0x677   : > { %v4908_v49 = vadd.f32 %v4886_v16, %v4808_v55  ;;  %v4986_v19 = vpop.f32.mrf.mxu3 }
 0x678   : > { %v4788_v15 = vpop.f32.mrf.mxu1 }
 0x679   : > { %v9001_v60 = vadd.f32 %v4986_v19, %v4908_v49  ;;  %v4809_v63 = vadd.f32 %v4788_v15, %v8885_v27 }
 0x67e   : > { %v4888_v62 = vpop.f32.mrf.mxu2 }
 0x67f   : > { %v4909_v13 = vadd.f32 %v4888_v62, %v4809_v63  ;;  %v4988_v10 = vpop.f32.mrf.mxu3 }
 0x680   : > { %v4791_v5 = vpop.f32.mrf.mxu1 }
 0x681   : > { %v9008_v29 = vadd.f32 %v4988_v10, %v4909_v13  ;;  %v4810_v23 = vadd.f32 %v4791_v5, %v8891_v42 }
 0x683   : > { %6407 = vmatmul.msk.bf16.gmra.mxu1 %vm4283_vm9, %v5104_v52  ;;  %6417 = vmatmul.msk.bf16.gmra.mxu2 %vm4283_vm9, %v5209_v32 }
 0x684   : > { %6427 = vmatmul.msk.bf16.gmra.mxu3 %vm4283_vm9, %v5293_v24 }
 0x686   : > { %v4891_v27 = vpop.f32.mrf.mxu2 }
 0x687   : > { %v4910_v3 = vadd.f32 %v4891_v27, %v4810_v23  ;;  %v4991_v0 = vpop.f32.mrf.mxu3 }
 0x688   : > { %v4793_v41 = vpop.f32.mrf.mxu1 }
 0x689   : > { %v9014_v45 = vadd.f32 %v4991_v0, %v4910_v3  ;;  %v4811_v9 = vadd.f32 %v4793_v41, %v8893_v59  ;;  %v9028_v59 = vld [vmem:[%s9258_s8] ss:$0 sm:$0xff] }
 0x68e   : > { %v4893_v54 = vpop.f32.mrf.mxu2 }
 0x68f   : > { %v4911_v25 = vadd.f32 %v4893_v54, %v4811_v9  ;;  %v4993_v20 = vpop.f32.mrf.mxu3 }
 0x690   : > { %v5141_v50 = vpop.f32.mrf.mxu1 }
 0x691   : > { %v9017_v28 = vadd.f32 %v4993_v20, %v4911_v25  ;;  %v5181_v42 = vadd.f32 %v5141_v50, %v8903_v56 }
 0x696   : > { %v5225_v52 = vpop.f32.mrf.mxu2 }
 0x697   : > { %v5265_v35 = vadd.f32 %v5225_v52, %v5181_v42  ;;  %v5309_v2 = vpop.f32.mrf.mxu3 }
 0x698   : > { %v5143_v12 = vpop.f32.mrf.mxu1 }
 0x699   : > { %v5349_v30 = vadd.f32 %v5309_v2, %v5265_v35  ;;  %v5182_v56 = vadd.f32 %v5143_v12, %v8910_v7 }
 0x69b   : > { %v5369_v38 = vmul.f32 %v9023_v47, %v5349_v30 }
 0x69d   : > { %v9032_v40 = vadd.f32 %v9028_v59, %v5369_v38 }
 0x69e   : > { %v5227_v18 = vpop.f32.mrf.mxu2 }
 0x69f   : > { %v6428_v21 = vmul.f32 -1.442695, %v9032_v40  ;;  %v5266_v34 = vadd.f32 %v5227_v18, %v5182_v56  ;;  %v5311_v37 = vpop.f32.mrf.mxu3  ;;  %v5725_v18 = vld [vmem:[%s6937_s16] sm:$0xff] }
 0x6a0   : > { %v5146_v53 = vpop.f32.mrf.mxu1 }
 0x6a1   : > { %6665 = vpow2.f32 %v6428_v21  ;;  %v5350_v6 = vadd.f32 %v5311_v37, %v5266_v34  ;;  %v5183_v1 = vadd.f32 %v5146_v53, %v8920_v57 }
 0x6a3   : > { %v5370_v32 = vmul.f32 %v9023_v47, %v5350_v6 }
 0x6a5   : > { %v9038_v55 = vadd.f32 %v9028_v59, %v5370_v32 }
 0x6a6   : > { %v5230_v44 = vpop.f32.mrf.mxu2 }
 0x6a7   : > { %v6666_v33 = vpop.eup %6665  ;;  %v6429_v61 = vmul.f32 -1.442695, %v9038_v55  ;;  %v5267_v7 = vadd.f32 %v5230_v44, %v5183_v1  ;;  %v5314_v39 = vpop.f32.mrf.mxu3 }
 0x6a8   : > { %v5453_v4 = vadd.f32 1.0, %v6666_v33  ;;  %v5148_v16 = vpop.f32.mrf.mxu1 }
 0x6a9   : > { %6667 = vpow2.f32 %v6429_v61  ;;  %v5351_v49 = vadd.f32 %v5314_v39, %v5267_v7  ;;  %v5184_v63 = vadd.f32 %v5148_v16, %v8927_v14 }
 0x6aa   : > { %6669 = vrcp.f32 %v5453_v4  ;;  %v5478_v3 = vand.u32 2147483647, %v5453_v4  ;;  %v5480_v0 = vand.u32 2147483648, %v5453_v4  ;;  %vm5474_vm13 = vweird.f32 %v5453_v4 }
 0x6ab   : > { %v5371_v19 = vmul.f32 %v9023_v47, %v5351_v49 }
 0x6ac   : > { %v5481_v2 = vor.u32 1.1754944e-38, %v5480_v0  ;;  %vm5479_vm0 = vcmp.eq.f32.partialorder %v5478_v3, 8.507059e+37 }
 0x6ad   : > { %v9044_v15 = vadd.f32 %v9028_v59, %v5371_v19 }
 0x6ae   : > { %v5232_v51 = vpop.f32.mrf.mxu2 }
 0x6af   : > { %v6668_v57 = vpop.eup %6667  ;;  %v6430_v11 = vmul.f32 -1.442695, %v9044_v15  ;;  %v5268_v31 = vadd.f32 %v5232_v51, %v5184_v63  ;;  %v5316_v8 = vpop.f32.mrf.mxu3 }
 0x6b0   : > { %v6670_v62 = vpop.eup %6669  ;;  %v5454_v13 = vadd.f32 1.0, %v6668_v57  ;;  %v5151_v10 = vpop.f32.mrf.mxu1 }
 0x6b1   : > { %v5470_v5 = vmul.f32 %v6670_v62, %v5453_v4  ;;  %6671 = vpow2.f32 %v6430_v11  ;;  %v5352_v24 = vadd.f32 %v5316_v8, %v5268_v31  ;;  %vm5475_vm12 = vweird.f32 %v6670_v62  ;;  %v5726_v8 = vld [vmem:[%s6937_s16 + $0x8] sm:$0xff] }
 0x6b2   : > { %6673 = vrcp.f32 %v5454_v13  ;;  %v5185_v9 = vadd.f32 %v5151_v10, %v8937_v43  ;;  %vm5476_vm15 = vmor %vm5474_vm13, %vm5475_vm12  ;;  %v5493_v53 = vand.u32 2147483647, %v5454_v13  ;;  %v5495_v6 = vand.u32 2147483648, %v5454_v13 }
 0x6b3   : > { %v5471_v23 = vsub.f32 1.0, %v5470_v5  ;;  %v5372_v27 = vmul.f32 %v9023_v47, %v5352_v24  ;;  %vm5489_vm1 = vweird.f32 %v5454_v13 }
 0x6b4   : > { %v5496_v49 = vor.u32 1.1754944e-38, %v5495_v6  ;;  %vm5494_vm4 = vcmp.eq.f32.partialorder %v5493_v53, 8.507059e+37 }
 0x6b5   : > { %v5472_v41 = vmul.f32 %v6670_v62, %v5471_v23  ;;  %v9050_v14 = vadd.f32 %v9028_v59, %v5372_v27 }
 0x6b6   : > { %v5235_v54 = vpop.f32.mrf.mxu2 }
 0x6b7   : > { %v6672_v25 = vpop.eup %6671  ;;  %v5473_v20 = vadd.f32 %v6670_v62, %v5472_v41  ;;  %v6431_v50 = vmul.f32 -1.442695, %v9050_v14  ;;  %v5269_v42 = vadd.f32 %v5235_v54, %v5185_v9  ;;  %v5319_v52 = vpop.f32.mrf.mxu3 }
 0x6b8   : > { %v6674_v35 = vpop.eup %6673  ;;  %v9054_v12 = vadd.f32 1.0, %v6672_v25  ;;  %v5153_v30 = vpop.f32.mrf.mxu1 }
 0x6b9   : > { %v5477_v38 = vsel %vm5476_vm15, %v6670_v62, %v5473_v20  ;;  %v5485_v56 = vmul.f32 %v6674_v35, %v5454_v13  ;;  %6675 = vpow2.f32 %v6431_v50  ;;  %v5353_v37 = vadd.f32 %v5319_v52, %v5269_v42 }
 0x6ba   : > { %v5482_v43 = vsel %vm5479_vm0, %v5481_v2, %v5477_v38  ;;  %6677 = vrcp.f32 %v9054_v12  ;;  %vm5490_vm14 = vweird.f32 %v6674_v35  ;;  %v5186_v33 = vadd.f32 %v5153_v30, %v8944_v22  ;;  %v5727_v38 = vld [vmem:[%s6937_s16 + $0x10] sm:$0xff] }
 0x6bb   : > { %v5709_v21 = vmul.f32 %v5482_v43, %v9032_v40  ;;  %v5486_v34 = vsub.f32 1.0, %v5485_v56  ;;  %v5373_v44 = vmul.f32 %v9023_v47, %v5353_v37  ;;  %vm5491_vm3 = vmor %vm5489_vm1, %vm5490_vm14  ;;  %v5508_v10 = vand.u32 2147483647, %v9054_v12 }
 0x6bc   : > { %v5510_v5 = vand.u32 2147483648, %v9054_v12  ;;  %vm5504_vm2 = vweird.f32 %v9054_v12 }
 0x6bd   : > { %v5741_v32 = vadd.f32 %v5725_v18, %v5709_v21  ;;  %v5487_v1 = vmul.f32 %v6674_v35, %v5486_v34  ;;  %v9064_v40 = vadd.f32 %v9028_v59, %v5373_v44  ;;  %vm5509_vm6 = vcmp.eq.f32.partialorder %v5508_v10, 8.507059e+37 }
 0x6be   : > { %v5237_v61 = vpop.f32.mrf.mxu2  ;;  %v5511_v20 = vor.u32 1.1754944e-38, %v5510_v5 }
 0x6bf   : > { %v6676_v7 = vpop.eup %6675  ;;  %5757 = vst.msk [vmem:[%s6885_s18] sm:$0xff] %vm984_vm5, %v5741_v32  ;;  %v5488_v39 = vadd.f32 %v6674_v35, %v5487_v1  ;;  %v5321_v4 = vpop.f32.mrf.mxu3  ;;  %v5270_v63 = vadd.f32 %v5237_v61, %v5186_v33  ;;  %v6432_v11 = vmul.f32 -1.442695, %v9064_v40 }
 0x6c0   : > { %v6678_v16 = vpop.eup %6677  ;;  %v9066_v19 = vadd.f32 1.0, %v6676_v7  ;;  %v5156_v51 = vpop.f32.mrf.mxu1 }
 0x6c1   : > { %v5492_v57 = vsel %vm5491_vm3, %v6674_v35, %v5488_v39  ;;  %v5500_v22 = vmul.f32 %v6678_v16, %v9054_v12  ;;  %v5354_v24 = vadd.f32 %v5321_v4, %v5270_v63  ;;  %vm5505_vm9 = vweird.f32 %v6678_v16 }
 0x6c2   : > { %v5497_v31 = vsel %vm5494_vm4, %v5496_v49, %v5492_v57  ;;  %6679 = vrcp.f32 %v9066_v19  ;;  %v5187_v3 = vadd.f32 %v5156_v51, %v8953_v46  ;;  %vm5506_vm10 = vmor %vm5504_vm2, %vm5505_vm9  ;;  %v5523_v21 = vand.u32 2147483647, %v9066_v19  ;;  %v5728_v51 = vld [vmem:[%s6937_s16 + $0x18] sm:$0xff] }
 0x6c3   : > { %v5710_v62 = vmul.f32 %v5497_v31, %v9038_v55  ;;  %v5501_v13 = vsub.f32 1.0, %v5500_v22  ;;  %6681 = vpow2.f32 %v6432_v11  ;;  %v5374_v0 = vmul.f32 %v9023_v47, %v5354_v24 }
 0x6c4   : > { %v5525_v37 = vand.u32 2147483648, %v9066_v19  ;;  %vm5519_vm8 = vweird.f32 %v9066_v19  ;;  %vm5524_vm12 = vcmp.eq.f32.partialorder %v5523_v21, 8.507059e+37 }
 0x6c5   : > { %v5742_v23 = vadd.f32 %v5726_v8, %v5710_v62  ;;  %v5502_v27 = vmul.f32 %v6678_v16, %v5501_v13  ;;  %v9081_v50 = vadd.f32 %v9028_v59, %v5374_v0 }
 0x6c6   : > { %v5240_v41 = vpop.f32.mrf.mxu2 }
 0x6c7   : > { %5758 = vst.msk [vmem:[%s6885_s18 + $0x8] sm:$0xff] %vm984_vm5, %v5742_v23  ;;  %v5503_v9 = vadd.f32 %v6678_v16, %v5502_v27  ;;  %v5271_v55 = vadd.f32 %v5240_v41, %v5187_v3  ;;  %v5324_v54 = vpop.f32.mrf.mxu3  ;;  %v6433_v12 = vmul.f32 -1.442695, %v9081_v50 }
 0x6c8   : > { %v6680_v25 = vpop.eup %6679  ;;  %v5158_v42 = vpop.f32.mrf.mxu1 }
 0x6c9   : > { %v6682_v52 = vpop.eup %6681  ;;  %v5507_v46 = vsel %vm5506_vm10, %v6678_v16, %v5503_v9  ;;  %v5515_v35 = vmul.f32 %v6680_v25, %v9066_v19  ;;  %v5355_v2 = vadd.f32 %v5324_v54, %v5271_v55  ;;  %vm5520_vm7 = vweird.f32 %v6680_v25 }
 0x6ca   : > { %v5512_v30 = vsel %vm5509_vm6, %v5511_v20, %v5507_v46  ;;  %v5457_v56 = vadd.f32 1.0, %v6682_v52  ;;  %v5188_v53 = vadd.f32 %v5158_v42, %v8960_v48  ;;  %vm5521_vm11 = vmor %vm5519_vm8, %vm5520_vm7  ;;  %v5526_v48 = vor.u32 1.1754944e-38, %v5525_v37 }
 0x6cb   : > { %v5711_v43 = vmul.f32 %v5512_v30, %v9044_v15  ;;  %v5516_v18 = vsub.f32 1.0, %v5515_v35  ;;  %v5375_v34 = vmul.f32 %v9023_v47, %v5355_v2  ;;  %v5729_v35 = vld [vmem:[%s6937_s16 + $0x20] sm:$0xff] }
 0x6cc   : > { %6683 = vrcp.f32 %v5457_v56  ;;  %v5538_v5 = vand.u32 2147483647, %v5457_v56  ;;  %v5540_v24 = vand.u32 2147483648, %v5457_v56  ;;  %vm5534_vm15 = vweird.f32 %v5457_v56 }
 0x6cd   : > { %v5743_v6 = vadd.f32 %v5727_v38, %v5711_v43  ;;  %v5517_v32 = vmul.f32 %v6680_v25, %v5516_v18  ;;  %6685 = vpow2.f32 %v6433_v12  ;;  %v9092_v1 = vadd.f32 %v9028_v59, %v5375_v34 }
 0x6ce   : > { %v5242_v44 = vpop.f32.mrf.mxu2  ;;  %vm5539_vm14 = vcmp.eq.f32.partialorder %v5538_v5, 8.507059e+37 }
 0x6cf   : > { %5759 = vst.msk [vmem:[%s6885_s18 + $0x10] sm:$0xff] %vm984_vm5, %v5743_v6  ;;  %v5518_v15 = vadd.f32 %v6680_v25, %v5517_v32  ;;  %v6434_v33 = vmul.f32 -1.442695, %v9092_v1  ;;  %v5272_v61 = vadd.f32 %v5242_v44, %v5188_v53  ;;  %v5326_v7 = vpop.f32.mrf.mxu3 }
 0x6d0   : > { %v5161_v39 = vpop.f32.mrf.mxu1 }
 0x6d1   : > { %v5522_v4 = vsel %vm5521_vm11, %v6680_v25, %v5518_v15  ;;  %6687 = vpow2.f32 %v6434_v33  ;;  %v5356_v16 = vadd.f32 %v5326_v7, %v5272_v61  ;;  %v5189_v10 = vadd.f32 %v5161_v39, %v8969_v17 }
 0x6d2   : > { %v6684_v49 = vpop.eup %6683  ;;  %v5527_v63 = vsel %vm5524_vm12, %v5526_v48, %v5522_v4  ;;  %v5541_v25 = vor.u32 1.1754944e-38, %v5540_v24 }
 0x6d3   : > { %v6686_v57 = vpop.eup %6685  ;;  %v5712_v22 = vmul.f32 %v5527_v63, %v9050_v14  ;;  %v5530_v19 = vmul.f32 %v6684_v49, %v5457_v56  ;;  %v5376_v11 = vmul.f32 %v9023_v47, %v5356_v16  ;;  %vm5535_vm13 = vweird.f32 %v6684_v49 }
 0x6d4   : > { %v5458_v31 = vadd.f32 1.0, %v6686_v57  ;;  %vm5536_vm0 = vmor %vm5534_vm15, %vm5535_vm13 }
 0x6d5   : > { %v5744_v8 = vadd.f32 %v5728_v51, %v5712_v22  ;;  %v5531_v62 = vsub.f32 1.0, %v5530_v19  ;;  %v9103_v13 = vadd.f32 %v9028_v59, %v5376_v11  ;;  %v5730_v22 = vld [vmem:[%s6937_s16 + $0x28] sm:$0xff] }
 0x6d6   : > { %6689 = vrcp.f32 %v5458_v31  ;;  %v5245_v23 = vpop.f32.mrf.mxu2  ;;  %v5553_v32 = vand.u32 2147483647, %v5458_v31  ;;  %v5555_v44 = vand.u32 2147483648, %v5458_v31  ;;  %vm5549_vm3 = vweird.f32 %v5458_v31 }
 0x6d7   : > { %v6688_v27 = vpop.eup %6687  ;;  %5760 = vst.msk [vmem:[%s6885_s18 + $0x18] sm:$0xff] %vm984_vm5, %v5744_v8  ;;  %v5532_v3 = vmul.f32 %v6684_v49, %v5531_v62  ;;  %v6435_v14 = vmul.f32 -1.442695, %v9103_v13  ;;  %v5273_v0 = vadd.f32 %v5245_v23, %v5189_v10  ;;  %v5329_v41 = vpop.f32.mrf.mxu3 }
 0x6d8   : > { %v9109_v9 = vadd.f32 1.0, %v6688_v27  ;;  %v5163_v55 = vpop.f32.mrf.mxu1  ;;  %vm5554_vm9 = vcmp.eq.f32.partialorder %v5553_v32, 8.507059e+37  ;;  %v5556_v39 = vor.u32 1.1754944e-38, %v5555_v44  ;;  %v5732_v32 = vld [vmem:[%s6937_s16 + $0x38] sm:$0xff] }
 0x6d9   : > { %v5533_v54 = vadd.f32 %v6684_v49, %v5532_v3  ;;  %6691 = vpow2.f32 %v6435_v14  ;;  %v5357_v17 = vadd.f32 %v5329_v41, %v5273_v0  ;;  %v5190_v56 = vadd.f32 %v5163_v55, %v8976_v26  ;;  %v5731_v55 = vld [vmem:[%s6937_s16 + $0x30] sm:$0xff] }
 0x6da   : > { %6693 = vrcp.f32 %v9109_v9  ;;  %v5568_v4 = vand.u32 2147483647, %v9109_v9  ;;  %v5570_v16 = vand.u32 2147483648, %v9109_v9  ;;  %vm5564_vm10 = vweird.f32 %v9109_v9 }
 0x6db   : > { %v5537_v20 = vsel %vm5536_vm0, %v6684_v49, %v5533_v54  ;;  %v5377_v42 = vmul.f32 %v9023_v47, %v5357_v17 }
 0x6dc   : > { %v6690_v52 = vpop.eup %6689  ;;  %v5542_v46 = vsel %vm5539_vm14, %v5541_v25, %v5537_v20  ;;  %v5571_v23 = vor.u32 1.1754944e-38, %v5570_v16  ;;  %vm5569_vm7 = vcmp.eq.f32.partialorder %v5568_v4, 8.507059e+37 }
 0x6dd   : > { %v5713_v2 = vmul.f32 %v5542_v46, %v9064_v40  ;;  %v5545_v30 = vmul.f32 %v6690_v52, %v5458_v31  ;;  %v9116_v38 = vadd.f32 %v9028_v59, %v5377_v42  ;;  %vm5550_vm1 = vweird.f32 %v6690_v52 }
 0x6de   : > { %v5247_v12 = vpop.f32.mrf.mxu2  ;;  %vm5551_vm4 = vmor %vm5549_vm3, %vm5550_vm1 }
 0x6df   : > { %v6692_v43 = vpop.eup %6691  ;;  %v5745_v18 = vadd.f32 %v5729_v35, %v5713_v2  ;;  %v5546_v21 = vsub.f32 1.0, %v5545_v30  ;;  %v6436_v34 = vmul.f32 -1.442695, %v9116_v38  ;;  %v5274_v37 = vadd.f32 %v5247_v12, %v5190_v56  ;;  %v5331_v53 = vpop.f32.mrf.mxu3 }
 0x6e0   : > { %v6694_v6 = vpop.eup %6693  ;;  %v9120_v15 = vadd.f32 1.0, %v6692_v43  ;;  %v5166_v40 = vpop.f32.mrf.mxu1 }
 0x6e1   : > { %5761 = vst.msk [vmem:[%s6885_s18 + $0x20] sm:$0xff] %vm984_vm5, %v5745_v18  ;;  %v5547_v33 = vmul.f32 %v6690_v52, %v5546_v21  ;;  %v5560_v26 = vmul.f32 %v6694_v6, %v9109_v9  ;;  %6695 = vpow2.f32 %v6436_v34  ;;  %v5358_v48 = vadd.f32 %v5331_v53, %v5274_v37 }
 0x6e2   : > { %6697 = vrcp.f32 %v9120_v15  ;;  %vm5565_vm2 = vweird.f32 %v6694_v6  ;;  %v5191_v19 = vadd.f32 %v5166_v40, %v8985_v36  ;;  %v5583_v25 = vand.u32 2147483647, %v9120_v15 }
 0x6e3   : > { %v5548_v61 = vadd.f32 %v6690_v52, %v5547_v33  ;;  %v5561_v7 = vsub.f32 1.0, %v5560_v26  ;;  %v5378_v51 = vmul.f32 %v9023_v47, %v5358_v48  ;;  %vm5566_vm6 = vmor %vm5564_vm10, %vm5565_vm2  ;;  %v5585_v20 = vand.u32 2147483648, %v9120_v15 }
 0x6e4   : > { %vm5579_vm11 = vweird.f32 %v9120_v15  ;;  %vm5584_vm13 = vcmp.eq.f32.partialorder %v5583_v25, 8.507059e+37 }
 0x6e5   : > { %v5552_v49 = vsel %vm5551_vm4, %v6690_v52, %v5548_v61  ;;  %v5562_v63 = vmul.f32 %v6694_v6, %v5561_v7  ;;  %v9134_v10 = vadd.f32 %v9028_v59, %v5378_v51  ;;  %v5586_v18 = vor.u32 1.1754944e-38, %v5585_v20 }
 0x6e6   : > { %v5557_v57 = vsel %vm5554_vm9, %v5556_v39, %v5552_v49  ;;  %v5250_v11 = vpop.f32.mrf.mxu2 }
 0x6e7   : > { %v6696_v31 = vpop.eup %6695  ;;  %v5714_v8 = vmul.f32 %v5557_v57, %v9081_v50  ;;  %v5563_v62 = vadd.f32 %v6694_v6, %v5562_v63  ;;  %v5334_v5 = vpop.f32.mrf.mxu3  ;;  %v5275_v3 = vadd.f32 %v5250_v11, %v5191_v19  ;;  %v6437_v17 = vmul.f32 -1.442695, %v9134_v10 }
 0x6e8   : > { %v6698_v24 = vpop.eup %6697  ;;  %v9136_v27 = vadd.f32 1.0, %v6696_v31  ;;  %v5168_v36 = vpop.f32.mrf.mxu1 }
 0x6e9   : > { %v5746_v14 = vadd.f32 %v5730_v22, %v5714_v8  ;;  %v5567_v0 = vsel %vm5566_vm6, %v6694_v6, %v5563_v62  ;;  %v5575_v50 = vmul.f32 %v6698_v24, %v9120_v15  ;;  %vm5580_vm8 = vweird.f32 %v6698_v24 }
 0x6ea   : > { %v5572_v41 = vsel %vm5569_vm7, %v5571_v23, %v5567_v0  ;;  %6699 = vrcp.f32 %v9136_v27  ;;  %v5359_v42 = vadd.f32 %v5334_v5, %v5275_v3  ;;  %v5192_v35 = vadd.f32 %v5168_v36, %v8992_v58  ;;  %vm5581_vm12 = vmor %vm5579_vm11, %vm5580_vm8  ;;  %v5733_v5 = vld [vmem:[%s6937_s16 + $0x40] sm:$0xff] }
 0x6eb   : > { %5762 = vst.msk [vmem:[%s6885_s18 + $0x28] sm:$0xff] %vm984_vm5, %v5746_v14  ;;  %v5715_v9 = vmul.f32 %v5572_v41, %v9092_v1  ;;  %v5576_v54 = vsub.f32 1.0, %v5575_v50  ;;  %6701 = vpow2.f32 %v6437_v17  ;;  %v5598_v26 = vand.u32 2147483647, %v9136_v27 }
 0x6ec   : > { %v5379_v2 = vmul.f32 %v9023_v47, %v5359_v42  ;;  %v5600_v7 = vand.u32 2147483648, %v9136_v27  ;;  %vm5594_vm0 = vweird.f32 %v9136_v27 }
 0x6ed   : > { %v5747_v52 = vadd.f32 %v5731_v55, %v5715_v9  ;;  %v5577_v46 = vmul.f32 %v6698_v24, %v5576_v54  ;;  %vm5599_vm1 = vcmp.eq.f32.partialorder %v5598_v26, 8.507059e+37 }
 0x6ee   : > { %v5252_v30 = vpop.f32.mrf.mxu2  ;;  %v9154_v21 = vadd.f32 %v9028_v59, %v5379_v2  ;;  %v5601_v19 = vor.u32 1.1754944e-38, %v5600_v7 }
 0x6ef   : > { %5763 = vst.msk [vmem:[%s6885_s18 + $0x30] sm:$0xff] %vm984_vm5, %v5747_v52  ;;  %v5578_v1 = vadd.f32 %v6698_v24, %v5577_v46  ;;  %v5276_v56 = vadd.f32 %v5252_v30, %v5192_v35  ;;  %v5336_v12 = vpop.f32.mrf.mxu3 }
 0x6f0   : > { %v6700_v43 = vpop.eup %6699  ;;  %v5171_v34 = vpop.f32.mrf.mxu1  ;;  %v6438_v44 = vmul.f32 -1.442695, %v9154_v21 }
 0x6f1   : > { %v5582_v58 = vsel %vm5581_vm12, %v6698_v24, %v5578_v1  ;;  %v5590_v37 = vmul.f32 %v6700_v43, %v9136_v27  ;;  %v5360_v53 = vadd.f32 %v5336_v12, %v5276_v56  ;;  %v6702_v15 = vpop.eup %6701  ;;  %vm5595_vm15 = vweird.f32 %v6700_v43 }
 0x6f2   : > { %v5587_v6 = vsel %vm5584_vm13, %v5586_v18, %v5582_v58  ;;  %v5462_v48 = vadd.f32 1.0, %v6702_v15  ;;  %6703 = vpow2.f32 %v6438_v44  ;;  %v5193_v49 = vadd.f32 %v5171_v34, %v9001_v60  ;;  %vm5596_vm14 = vmor %vm5594_vm0, %vm5595_vm15  ;;  %v5734_v58 = vld [vmem:[%s6937_s16 + $0x48] sm:$0xff] }
 0x6f3   : > { %v5716_v40 = vmul.f32 %v5587_v6, %v9103_v13  ;;  %v5591_v33 = vsub.f32 1.0, %v5590_v37  ;;  %v5380_v61 = vmul.f32 %v9023_v47, %v5360_v53 }
 0x6f4   : > { %6705 = vrcp.f32 %v5462_v48  ;;  %v5613_v46 = vand.u32 2147483647, %v5462_v48  ;;  %vm5609_vm4 = vweird.f32 %v5462_v48 }
 0x6f5   : > { %v5748_v39 = vadd.f32 %v5732_v32, %v5716_v40  ;;  %v5592_v4 = vmul.f32 %v6700_v43, %v5591_v33  ;;  %v9164_v16 = vadd.f32 %v9028_v59, %v5380_v61 }
 0x6f6   : > { %v5255_v63 = vpop.f32.mrf.mxu2  ;;  %vm5614_vm2 = vcmp.eq.f32.partialorder %v5613_v46, 8.507059e+37 }
 0x6f7   : > { %5764 = vst.msk [vmem:[%s6885_s18 + $0x38] sm:$0xff] %vm984_vm5, %v5748_v39  ;;  %v5593_v13 = vadd.f32 %v6700_v43, %v5592_v4  ;;  %v6439_v51 = vmul.f32 -1.442695, %v9164_v16  ;;  %v5277_v57 = vadd.f32 %v5255_v63, %v5193_v49  ;;  %v5339_v22 = vpop.f32.mrf.mxu3 }
 0x6f8   : > { %v5173_v11 = vpop.f32.mrf.mxu1  ;;  %v6704_v8 = vpop.eup %6703 }
 0x6f9   : > { %v5597_v31 = vsel %vm5596_vm14, %v6700_v43, %v5593_v13  ;;  %6707 = vpow2.f32 %v6439_v51  ;;  %v5361_v60 = vadd.f32 %v5339_v22, %v5277_v57  ;;  %v5463_v23 = vadd.f32 1.0, %v6704_v8 }
 0x6fa   : > { %v5602_v62 = vsel %vm5599_vm1, %v5601_v19, %v5597_v31  ;;  %v6706_v3 = vpop.eup %6705  ;;  %v5194_v0 = vadd.f32 %v5173_v11, %v9008_v29  ;;  %v5735_v11 = vld [vmem:[%s6937_s16 + $0x50] sm:$0xff] }
 0x6fb   : > { %v5717_v24 = vmul.f32 %v5602_v62, %v9116_v38  ;;  %v5381_v27 = vmul.f32 %v9023_v47, %v5361_v60  ;;  %v5605_v14 = vmul.f32 %v6706_v3, %v5462_v48  ;;  %6709 = vrcp.f32 %v5463_v23 }
 0x6fc   : > { %v5615_v38 = vand.u32 2147483648, %v5462_v48  ;;  %vm5610_vm3 = vweird.f32 %v6706_v3  ;;  %v5628_v53 = vand.u32 2147483647, %v5463_v23  ;;  %v5630_v44 = vand.u32 2147483648, %v5463_v23 }
 0x6fd   : > { %v5749_v36 = vadd.f32 %v5733_v5, %v5717_v24  ;;  %v9177_v50 = vadd.f32 %v9028_v59, %v5381_v27  ;;  %v5606_v9 = vsub.f32 1.0, %v5605_v14  ;;  %vm5611_vm9 = vmor %vm5609_vm4, %vm5610_vm3  ;;  %vm5624_vm6 = vweird.f32 %v5463_v23 }
 0x6fe   : > { %v5257_v41 = vpop.f32.mrf.mxu2  ;;  %v5616_v1 = vor.u32 1.1754944e-38, %v5615_v38  ;;  %vm5629_vm8 = vcmp.eq.f32.partialorder %v5628_v53, 8.507059e+37  ;;  %v5631_v63 = vor.u32 1.1754944e-38, %v5630_v44 }
 0x6ff   : > { %v6708_v55 = vpop.eup %6707  ;;  %5765 = vst.msk [vmem:[%s6885_s18 + $0x40] sm:$0xff] %vm984_vm5, %v5749_v36  ;;  %v5278_v54 = vadd.f32 %v5257_v41, %v5194_v0  ;;  %v5341_v17 = vpop.f32.mrf.mxu3  ;;  %v6440_v20 = vmul.f32 -1.442695, %v9177_v50  ;;  %v5607_v52 = vmul.f32 %v6706_v3, %v5606_v9 }
 0x700   : > { %v9181_v25 = vadd.f32 1.0, %v6708_v55  ;;  %v5176_v42 = vpop.f32.mrf.mxu1 }
 0x701   : > { %v5362_v29 = vadd.f32 %v5341_v17, %v5278_v54  ;;  %v6710_v35 = vpop.eup %6709  ;;  %v5608_v2 = vadd.f32 %v6706_v3, %v5607_v52  ;;  %v5195_v18 = vadd.f32 %v5176_v42, %v9014_v45  ;;  %v5736_v17 = vld [vmem:[%s6937_s16 + $0x58] sm:$0xff] }
 0x702   : > { %6711 = vrcp.f32 %v9181_v25  ;;  %v5620_v56 = vmul.f32 %v6710_v35, %v5463_v23  ;;  %vm5625_vm10 = vweird.f32 %v6710_v35  ;;  %v5643_v51 = vand.u32 2147483647, %v9181_v25 }
 0x703   : > { %6713 = vpow2.f32 %v6440_v20  ;;  %v5382_v30 = vmul.f32 %v9023_v47, %v5362_v29  ;;  %v5612_v12 = vsel %vm5611_vm9, %v6706_v3, %v5608_v2  ;;  %vm5626_vm7 = vmor %vm5624_vm6, %vm5625_vm10  ;;  %v5645_v22 = vand.u32 2147483648, %v9181_v25 }
 0x704   : > { %v5617_v34 = vsel %vm5614_vm2, %v5616_v1, %v5612_v12  ;;  %v5621_v37 = vsub.f32 1.0, %v5620_v56  ;;  %vm5639_vm12 = vweird.f32 %v9181_v25  ;;  %vm5644_vm15 = vcmp.eq.f32.partialorder %v5643_v51, 8.507059e+37 }
 0x705   : > { %v9187_v43 = vadd.f32 %v9028_v59, %v5382_v30  ;;  %v5718_v32 = vmul.f32 %v5617_v34, %v9134_v10  ;;  %v5646_v14 = vor.u32 1.1754944e-38, %v5645_v22 }
 0x706   : > { %v5260_v6 = vpop.f32.mrf.mxu2  ;;  %v5622_v61 = vmul.f32 %v6710_v35, %v5621_v37  ;;  %v5737_v37 = vld [vmem:[%s6937_s16 + $0x60] sm:$0xff] }
 0x707   : > { %v6441_v15 = vmul.f32 -1.442695, %v9187_v43  ;;  %v5279_v40 = vadd.f32 %v5260_v6, %v5195_v18  ;;  %v5344_v33 = vpop.f32.mrf.mxu3  ;;  %v5750_v48 = vadd.f32 %v5734_v58, %v5718_v32 }
 0x708   : > { %v6712_v26 = vpop.eup %6711  ;;  %v5623_v39 = vadd.f32 %v6710_v35, %v5622_v61  ;;  %v5178_v10 = vpop.f32.mrf.mxu1 }
 0x709   : > { %v6714_v7 = vpop.eup %6713  ;;  %v5635_v45 = vmul.f32 %v6712_v26, %v9181_v25  ;;  %6715 = vpow2.f32 %v6441_v15  ;;  %v5363_v49 = vadd.f32 %v5344_v33, %v5279_v40  ;;  %5766 = vst.msk [vmem:[%s6885_s18 + $0x48] sm:$0xff] %vm984_vm5, %v5750_v48  ;;  %vm5640_vm11 = vweird.f32 %v6712_v26 }
 0x70a   : > { %v5465_v4 = vadd.f32 1.0, %v6714_v7  ;;  %v5627_v57 = vsel %vm5626_vm7, %v6710_v35, %v5623_v39  ;;  %v5196_v8 = vadd.f32 %v5178_v10, %v9017_v28  ;;  %vm5641_vm13 = vmor %vm5639_vm12, %vm5640_vm11 }
 0x70b   : > { %v5636_v13 = vsub.f32 1.0, %v5635_v45  ;;  %v5632_v19 = vsel %vm5629_vm8, %v5631_v63, %v5627_v57  ;;  %v5383_v60 = vmul.f32 %v9023_v47, %v5363_v49  ;;  %v5738_v45 = vld [vmem:[%s6937_s16 + $0x68] sm:$0xff] }
 0x70c   : > { %6717 = vrcp.f32 %v5465_v4  ;;  %v5719_v62 = vmul.f32 %v5632_v19, %v9154_v21  ;;  %v5660_v46 = vand.u32 2147483648, %v5465_v4  ;;  %v5658_v2 = vand.u32 2147483647, %v5465_v4 }
 0x70d   : > { %v5637_v31 = vmul.f32 %v6712_v26, %v5636_v13  ;;  %v9204_v27 = vadd.f32 %v9028_v59, %v5383_v60  ;;  %vm5654_vm14 = vweird.f32 %v5465_v4 }
 0x70e   : > { %v5262_v5 = vpop.f32.mrf.mxu2  ;;  %v5751_v36 = vadd.f32 %v5735_v11, %v5719_v62  ;;  %vm5659_vm3 = vcmp.eq.f32.partialorder %v5658_v2, 8.507059e+37 }
 0x70f   : > { %v6716_v24 = vpop.eup %6715  ;;  %v5638_v23 = vadd.f32 %v6712_v26, %v5637_v31  ;;  %v5280_v3 = vadd.f32 %v5262_v5, %v5196_v8  ;;  %v5346_v41 = vpop.f32.mrf.mxu3  ;;  %v6442_v21 = vmul.f32 -1.442695, %v9204_v27  ;;  %v5739_v8 = vld [vmem:[%s6937_s16 + $0x70] sm:$0xff] }
 0x710   : > { %v5466_v0 = vadd.f32 1.0, %v6716_v24  ;;  %5767 = vst.msk [vmem:[%s6885_s18 + $0x50] sm:$0xff] %vm984_vm5, %v5751_v36 }
 0x711   : > { %v5642_v28 = vsel %vm5641_vm13, %v6712_v26, %v5638_v23  ;;  %v5364_v55 = vadd.f32 %v5346_v41, %v5280_v3 }
 0x712   : > { %v6718_v9 = vpop.eup %6717  ;;  %v5647_v54 = vsel %vm5644_vm15, %v5646_v14, %v5642_v28  ;;  %6719 = vrcp.f32 %v5466_v0  ;;  %v5673_v53 = vand.u32 2147483647, %v5466_v0  ;;  %v5675_v6 = vand.u32 2147483648, %v5466_v0  ;;  %v5740_v28 = vld [vmem:[%s6937_s16 + $0x78] sm:$0xff] }
 0x713   : > { %v5720_v38 = vmul.f32 %v5647_v54, %v9164_v16  ;;  %v5650_v25 = vmul.f32 %v6718_v9, %v5465_v4  ;;  %6721 = vpow2.f32 %v6442_v21  ;;  %v5384_v20 = vmul.f32 %v9023_v47, %v5364_v55 }
 0x714   : > { %vm5655_vm0 = vweird.f32 %v6718_v9  ;;  %v5661_v47 = vor.u32 1.1754944e-38, %v5660_v46  ;;  %vm5669_vm9 = vweird.f32 %v5466_v0  ;;  %v5676_v26 = vor.u32 1.1754944e-38, %v5675_v6 }
 0x715   : > { %v5752_v42 = vadd.f32 %v5736_v17, %v5720_v38  ;;  %v5651_v52 = vsub.f32 1.0, %v5650_v25  ;;  %v9214_v29 = vadd.f32 %v9028_v59, %v5384_v20  ;;  %vm5656_vm1 = vmor %vm5654_vm14, %vm5655_vm0  ;;  %vm5674_vm10 = vcmp.eq.f32.partialorder %v5673_v53, 8.507059e+37 }
 0x717   : > { %5768 = vst.msk [vmem:[%s6885_s18 + $0x58] sm:$0xff] %vm984_vm5, %v5752_v42  ;;  %v5652_v35 = vmul.f32 %v6718_v9, %v5651_v52  ;;  %v6443_v1 = vmul.f32 -1.442695, %v9214_v29 }
 0x718   : > { %v6720_v30 = vpop.eup %6719 }
 0x719   : > { %v5653_v16 = vadd.f32 %v6718_v9, %v5652_v35  ;;  %v5665_v56 = vmul.f32 %v6720_v30, %v5466_v0  ;;  %v6722_v12 = vpop.eup %6721  ;;  %6723 = vpow2.f32 %v6443_v1  ;;  %vm5670_vm4 = vweird.f32 %v6720_v30 }
 0x71a   : > { %v5467_v34 = vadd.f32 1.0, %v6722_v12  ;;  %vm5671_vm2 = vmor %vm5669_vm9, %vm5670_vm4 }
 0x71b   : > { %v5657_v18 = vsel %vm5656_vm1, %v6718_v9, %v5653_v16  ;;  %v5666_v59 = vsub.f32 1.0, %v5665_v56 }
 0x71c   : > { %v5662_v58 = vsel %vm5659_vm3, %v5661_v47, %v5657_v18  ;;  %6725 = vrcp.f32 %v5467_v34  ;;  %v5690_v63 = vand.u32 2147483648, %v5467_v34  ;;  %v5688_v51 = vand.u32 2147483647, %v5467_v34 }
 0x71d   : > { %v5721_v32 = vmul.f32 %v5662_v58, %v9177_v50  ;;  %v5667_v44 = vmul.f32 %v6720_v30, %v5666_v59  ;;  %vm5684_vm7 = vweird.f32 %v5467_v34 }
 0x71e   : > { %v5691_v11 = vor.u32 1.1754944e-38, %v5690_v63  ;;  %vm5689_vm11 = vcmp.eq.f32.partialorder %v5688_v51, 8.507059e+37 }
 0x71f   : > { %v5753_v15 = vadd.f32 %v5737_v37, %v5721_v32  ;;  %v5668_v40 = vadd.f32 %v6720_v30, %v5667_v44  ;;  %v6724_v33 = vpop.eup %6723 }
 0x720   : > { %v5468_v7 = vadd.f32 1.0, %v6724_v33 }
 0x721   : > { %5769 = vst.msk [vmem:[%s6885_s18 + $0x60] sm:$0xff] %vm984_vm5, %v5753_v15  ;;  %v5672_v61 = vsel %vm5671_vm2, %v6720_v30, %v5668_v40 }
 0x722   : > { %v5677_v48 = vsel %vm5674_vm10, %v5676_v26, %v5672_v61  ;;  %v6726_v39 = vpop.eup %6725  ;;  %6727 = vrcp.f32 %v5468_v7  ;;  %v5705_v62 = vand.u32 2147483648, %v5468_v7  ;;  %v5703_v23 = vand.u32 2147483647, %v5468_v7 }
 0x723   : > { %v5722_v50 = vmul.f32 %v5677_v48, %v9187_v43  ;;  %v5680_v4 = vmul.f32 %v6726_v39, %v5467_v34  ;;  %vm5685_vm6 = vweird.f32 %v6726_v39  ;;  %vm5699_vm13 = vweird.f32 %v5468_v7 }
 0x724   : > { %vm5686_vm8 = vmor %vm5684_vm7, %vm5685_vm6  ;;  %v5706_v14 = vor.u32 1.1754944e-38, %v5705_v62  ;;  %vm5704_vm0 = vcmp.eq.f32.partialorder %v5703_v23, 8.507059e+37 }
 0x725   : > { %v5754_v49 = vadd.f32 %v5738_v45, %v5722_v50  ;;  %v5681_v10 = vsub.f32 1.0, %v5680_v4 }
 0x727   : > { %5770 = vst.msk [vmem:[%s6885_s18 + $0x68] sm:$0xff] %vm984_vm5, %v5754_v49  ;;  %v5682_v13 = vmul.f32 %v6726_v39, %v5681_v10 }
 0x728   : > { %v6728_v57 = vpop.eup %6727 }
 0x729   : > { %v5683_v22 = vadd.f32 %v6726_v39, %v5682_v13  ;;  %v5695_v19 = vmul.f32 %v6728_v57, %v5468_v7  ;;  %vm5700_vm12 = vweird.f32 %v6728_v57 }
 0x72a   : > { %vm5701_vm15 = vmor %vm5699_vm13, %vm5700_vm12 }
 0x72b   : > { %v5687_v31 = vsel %vm5686_vm8, %v6726_v39, %v5683_v22  ;;  %v5696_v43 = vsub.f32 1.0, %v5695_v19 }
 0x72c   : > { %v5692_v60 = vsel %vm5689_vm11, %v5691_v11, %v5687_v31 }
 0x72d   : > { %v5723_v5 = vmul.f32 %v5692_v60, %v9204_v27  ;;  %v5697_v24 = vmul.f32 %v6728_v57, %v5696_v43 }
 0x72f   : > { %v5755_v3 = vadd.f32 %v5739_v8, %v5723_v5  ;;  %v5698_v36 = vadd.f32 %v6728_v57, %v5697_v24 }
 0x731   : > { %5771 = vst.msk [vmem:[%s6885_s18 + $0x70] sm:$0xff] %vm984_vm5, %v5755_v3  ;;  %v5702_v0 = vsel %vm5701_vm15, %v6728_v57, %v5698_v36 }
 0x732   : > { %v5707_v41 = vsel %vm5704_vm0, %v5706_v14, %v5702_v0 }
 0x733   : > { %v5724_v21 = vmul.f32 %v5707_v41, %v9214_v29 }
 0x735   : > { %v5756_v55 = vadd.f32 %v5740_v28, %v5724_v21 }
 0x737   : > { %5772 = vst.msk [vmem:[%s6885_s18 + $0x78] sm:$0xff] %vm984_vm5, %v5756_v55 }
 0x738 PF: > { %s19_s13 = sadd.s32 1, %s6767_s13   ;;  %s9383_s30 = smov %s6759_s11 }
 0x739   : > { %p16_p1 = scmp.ge.s32.totalorder %s19_s13, 6   ;;  %s9384_s10 = smov %s6763_s12 }
 0x73a   : > { %s9385_s11 = smov %s9388_s14  ;;  %s9386_s12 = smov %s9392_s15 }
 0x73b   :  { %18 = sbr.rel (!%p16_p1) target bundleno = 3 (0x3), region = 136 }

</bundles_post_ra>
